<compile_context>
chip_gen: v5e
topology: v5e:2x2
jax: 0.10.0
libtpu: 0.0.40
codegen_flags: <defaults>
</compile_context>

<pallas_src>
import jax
import jax.numpy as jnp
from jax.experimental import pallas as pl
from jax.experimental.pallas import tpu as pltpu


HIDDEN = 132    # NNNet(132, 2, ...)
LAYERS = 2


def _round_up(x, m):
    return ((x + m - 1) // m) * m


def _gen_config():
    """Per-TPU-generation tiling / VMEM budget."""
    try:
        kind = jax.devices()[0].device_kind.lower()
    except Exception:
        kind = ""
    if "v7" in kind:
        # 64 MiB VMEM per TensorCore -> smaller tiles, explicit modest limit.
        return dict(target_rows=1024, max_rows=2048, vmem=40 * 2**20, tm=512)
    if "v6" in kind:
        # 128 MiB VMEM -> big tiles to amortize grid-step overhead.
        return dict(target_rows=2048, max_rows=4096, vmem=64 * 2**20, tm=1024)
    if "v5e" in kind or "v5 lite" in kind or "v5lite" in kind:
        # default scoped VMEM is only 16 MiB -> raise it explicitly.
        return dict(target_rows=1024, max_rows=2048, vmem=64 * 2**20, tm=512)
    # Unknown generation: conservative tiles, compiler-default VMEM limit.
    return dict(target_rows=1024, max_rows=2048, vmem=None, tm=512)


# ----------------------------------------------------------------------------
# Pallas kernels
# ----------------------------------------------------------------------------
def _mlp_kernel(x_ref, w1_ref, b1_ref, w2_ref, b2_ref, w3_ref, b3_ref, o_ref):
    """Fused 3-layer MLP: sigmoid(5*(relu(relu(xW1+b1)W2+b2)W3+b3)). bf16 MXU, f32 epilogue."""
    x = x_ref[...]                                                     # bf16 [tm, Din]
    h1 = jnp.dot(x, w1_ref[...], preferred_element_type=jnp.float32) + b1_ref[...]
    h1 = jnp.maximum(h1, 0.0).astype(jnp.bfloat16)
    h2 = jnp.dot(h1, w2_ref[...], preferred_element_type=jnp.float32) + b2_ref[...]
    h2 = jnp.maximum(h2, 0.0).astype(jnp.bfloat16)
    y = jnp.dot(h2, w3_ref[...], preferred_element_type=jnp.float32) + b3_ref[...]
    o_ref[...] = jax.nn.sigmoid(y * 5.0).astype(o_ref.dtype)


def _r_mlp_kernel(r_ref, qwj_ref, qwi_ref, w1r_ref, w2_ref, b2_ref, w3_ref,
                  b3_ref, o_ref):
    """R-branch fused MLP, concat-free, layer-1 on the VPU.

    h1[i,j,:] = relu( (Q@W1_Qj + b1)[j] + (Q@W1_Qi)[i] + sum_k R[i,j,k]*W1_R[k,:] )
    then layer-2/3 on the MXU + sigmoid(5x) epilogue.

    r_ref:[ti,tj,D2] f32 (HBM original, no wrapper cast),
    qwj_ref:[tj,HP] f32, qwi_ref:[ti,HP] f32, w1r_ref:[D2,HP] f32 (bf16-valued).
    """
    ti, tj, D2 = r_ref.shape
    HP = w2_ref.shape[0]
    O2 = o_ref.shape[-1]

    # Layer 1: VPU broadcast-FMAs instead of a K=5 MXU matmul (frees MXU cadence).
    # Round R to bf16 values (matching the reference's bf16 inputs) but keep the
    # arithmetic in f32 - exact products, f32 accumulation.
    r = r_ref[...].astype(jnp.bfloat16).astype(jnp.float32)            # (ti, tj, D2)
    h1 = qwj_ref[...][None, :, :] + qwi_ref[...][:, None, :]           # (ti, tj, HP)
    w1r = w1r_ref[...]                                                  # (D2, HP) f32
    for k in range(D2):                                                 # static unroll
        h1 = h1 + r[:, :, k:k + 1] * w1r[k, :]
    h1 = jnp.maximum(h1, 0.0).astype(jnp.bfloat16).reshape(ti * tj, HP)  # free merge (tj%8==0)

    h2 = jnp.dot(h1, w2_ref[...], preferred_element_type=jnp.float32) + b2_ref[...]
    h2 = jnp.maximum(h2, 0.0).astype(jnp.bfloat16)
    y = jnp.dot(h2, w3_ref[...], preferred_element_type=jnp.float32) + b3_ref[...]
    y = jax.nn.sigmoid(y * 5.0)
    o_ref[...] = y.reshape(ti, tj, O2).astype(o_ref.dtype)              # free split (tj%8==0)


# ----------------------------------------------------------------------------
# Kernel wrappers
# ----------------------------------------------------------------------------
def mlp_pallas(x, padded_params, cfg):
    """Apply the fused NNNet MLP to x:[M, Din] -> [M, Dout] (f32 out)."""
    w1, b1, w2, b2, w3, b3 = padded_params
    M, Din = x.shape
    HP = w1.shape[1]
    Dout = w3.shape[1]

    x = x.astype(jnp.bfloat16)
    tm_eff = min(cfg["tm"], _round_up(M, 8))     # big row tile; >=8-aligned sublanes
    Mp = _round_up(M, tm_eff)
    if Mp != M:
        x = jnp.pad(x, ((0, Mp - M), (0, 0)))

    const = lambda i: (0, 0)                     # resident weights/biases
    out = pl.pallas_call(
        _mlp_kernel,
        out_shape=jax.ShapeDtypeStruct((Mp, Dout), jnp.float32),
        grid_spec=pltpu.PrefetchScalarGridSpec(
            num_scalar_prefetch=0,
            grid=(Mp // tm_eff,),
            in_specs=[
                pl.BlockSpec((tm_eff, Din), lambda i: (i, 0)),
                pl.BlockSpec((Din, HP), const),
                pl.BlockSpec((1, HP), const),
                pl.BlockSpec((HP, HP), const),
                pl.BlockSpec((1, HP), const),
                pl.BlockSpec((HP, Dout), const),
                pl.BlockSpec((1, Dout), const),
            ],
            out_specs=pl.BlockSpec((tm_eff, Dout), lambda i: (i, 0)),
        ),
        compiler_params=pltpu.CompilerParams(
            dimension_semantics=("parallel",),
            vmem_limit_bytes=cfg["vmem"]),
    )(x, w1, b1, w2, b2, w3, b3)
    return out[:M]


def _pick_tiles(Np, b, target_rows, max_rows):
    """Pick (ti, tj): multiples of 8 dividing Np, ti*tj <= max_rows (~target_rows),
    and >= 2 parallel grid steps overall so both v7x TensorCores get work."""
    divs = [d for d in range(8, Np + 1, 8) if Np % d == 0]
    if not divs:                       # Np < 8 never happens (Np is rounded up to >= 8)
        divs = [Np]
    # j tile: as large as possible while leaving room for ti >= 8.
    tj_cands = [d for d in divs if d * 8 <= max_rows]
    tj = max(tj_cands) if tj_cands else divs[0]
    # i tile: grow until ~target_rows rows per kernel invocation.
    ti = divs[0]
    for d in divs:
        if d * tj <= max_rows:
            ti = d
        if d * tj >= target_rows:
            break
    # Megacore: guarantee >= 2 parallel grid iterations when possible.
    while b * (Np // ti) * (Np // tj) < 2 and ti > divs[0]:
        ti = max(d for d in divs if d < ti)
    return ti, tj


def r_branch_pallas(R, Q, padded_params, cfg):
    """R branch: out[b,i,j] = NNR(cat([R[b,i,j], Q[b,j], Q[b,i]])) without any HBM concat."""
    w1p, b1p, w2p, b2p, w3p, b3 = padded_params
    b, N, _, D2 = R.shape
    D1 = Q.shape[-1]
    HP = w2p.shape[0]
    O2 = w3p.shape[1]

    Np = _round_up(max(N, 8), 8)
    ti, tj = _pick_tiles(Np, b, cfg["target_rows"], cfg["max_rows"])

    # Split W1 by the feature layout of cat([R, Q_expand0(j), Q_expand1(i)], -1).
    w1_R = w1p[:D2].astype(jnp.float32)            # bf16 values, f32 storage (VPU path)
    w1_Qj = w1p[D2:D2 + D1]                        # bf16 (MXU)
    w1_Qi = w1p[D2 + D1:]                          # bf16 (MXU)

    # First-layer contributions of the broadcast Q rows, computed once per (b, n)
    # instead of once per (b, i, j).  b1 is folded into the j-contribution.
    Qb = Q.astype(jnp.bfloat16)
    QWj = jnp.einsum('bnd,dh->bnh', Qb, w1_Qj,
                     preferred_element_type=jnp.float32) + b1p          # [b,N,HP]
    QWi = jnp.einsum('bnd,dh->bnh', Qb, w1_Qi,
                     preferred_element_type=jnp.float32)                # [b,N,HP]

    if Np != N:
        # Zero-pad N to a multiple of 8; padded (i,j) outputs are sliced away below.
        R = jnp.pad(R, ((0, 0), (0, Np - N), (0, Np - N), (0, 0)))
        QWj = jnp.pad(QWj, ((0, 0), (0, Np - N), (0, 0)))
        QWi = jnp.pad(QWi, ((0, 0), (0, Np - N), (0, 0)))

    const = lambda bi, it, jt: (0, 0)
    out = pl.pallas_call(
        _r_mlp_kernel,
        out_shape=jax.ShapeDtypeStruct((b, Np, Np, O2), jnp.float32),
        grid_spec=pltpu.PrefetchScalarGridSpec(
            num_scalar_prefetch=0,
            grid=(b, Np // ti, Np // tj),
            in_specs=[
                # R fed as f32 straight from HBM (no wrapper-side bf16 copy).
                pl.BlockSpec((None, ti, tj, D2), lambda bi, it, jt: (bi, it, jt, 0)),
                pl.BlockSpec((None, tj, HP), lambda bi, it, jt: (bi, jt, 0)),   # Q@W1_Qj + b1
                pl.BlockSpec((None, ti, HP), lambda bi, it, jt: (bi, it, 0)),   # Q@W1_Qi
                pl.BlockSpec((D2, HP), const),
                pl.BlockSpec((HP, HP), const),
                pl.BlockSpec((1, HP), const),
                pl.BlockSpec((HP, O2), const),
                pl.BlockSpec((1, O2), const),
            ],
            out_specs=pl.BlockSpec((None, ti, tj, O2),
                                   lambda bi, it, jt: (bi, it, jt, 0)),
        ),
        compiler_params=pltpu.CompilerParams(
            dimension_semantics=("parallel", "parallel", "parallel"),
            vmem_limit_bytes=cfg["vmem"]),
    )(R, QWj, QWi, w1_R, w2p, b2p, w3p, b3)

    if Np != N:
        out = out[:, :N, :N, :]
    return out


# ----------------------------------------------------------------------------
# Parameters (deterministic, synthetic) + padding/casting for the kernels
# ----------------------------------------------------------------------------
def init_mlp_params(key, din, dout, hidden=HIDDEN):
    ks = jax.random.split(key, 6)

    def lin(kw, kb, fi, fo):
        w = jax.random.normal(kw, (fi, fo), jnp.float32) * (1.0 / jnp.sqrt(fi))
        b = jax.random.normal(kb, (1, fo), jnp.float32) * 0.01
        return w, b

    w1, b1 = lin(ks[0], ks[1], din, hidden)
    w2, b2 = lin(ks[2], ks[3], hidden, hidden)
    w3, b3 = lin(ks[4], ks[5], hidden, dout)
    return (w1, b1, w2, b2, w3, b3)


def init_spatial_relation_params(key, D, O):
    D0, D1, D2 = D
    O0, O1, O2 = O
    kP, kQ, kR = jax.random.split(key, 3)
    return {
        "P": init_mlp_params(kP, D0 + D1, O0),
        "Q": init_mlp_params(kQ, D1 + D0 + 2 * D2, O1),
        "R": init_mlp_params(kR, D2 + 2 * D1, O2),
    }


def pad_and_cast_mlp_params(params):
    """Zero-pad hidden 132 -> multiple of 128 (exact semantics) and cast weights to bf16."""
    w1, b1, w2, b2, w3, b3 = params
    H = w1.shape[1]
    hp = _round_up(H, 128)
    ph = hp - H
    bf = jnp.bfloat16
    return (
        jnp.pad(w1, ((0, 0), (0, ph))).astype(bf),
        jnp.pad(b1, ((0, 0), (0, ph))),                 # biases stay f32
        jnp.pad(w2, ((0, ph), (0, ph))).astype(bf),
        jnp.pad(b2, ((0, 0), (0, ph))),
        jnp.pad(w3, ((0, ph), (0, 0))).astype(bf),
        b3,
    )


# ----------------------------------------------------------------------------
# Forward pass
# ----------------------------------------------------------------------------
def _mlp_bf16_jax(x, params):
    """Plain-JAX MLP with the same bf16-MXU / f32-accumulate math as the kernels."""
    w1, b1, w2, b2, w3, b3 = params
    bf = jnp.bfloat16
    h1 = jnp.dot(x.astype(bf), w1.astype(bf), preferred_element_type=jnp.float32) + b1
    h1 = jnp.maximum(h1, 0.0)
    h2 = jnp.dot(h1.astype(bf), w2.astype(bf), preferred_element_type=jnp.float32) + b2
    h2 = jnp.maximum(h2, 0.0)
    y = jnp.dot(h2.astype(bf), w3.astype(bf), preferred_element_type=jnp.float32) + b3
    return jax.nn.sigmoid(y * 5.0)


def spatial_relation_forward(P, Q, R, params):
    b, D0 = P.shape
    _, N, D1 = Q.shape
    cfg = _gen_config()

    padQ = pad_and_cast_mlp_params(params["Q"])
    padR = pad_and_cast_mlp_params(params["R"])

    # P branch: only `b` rows -> not worth a pallas_call launch + weight DMA.
    P_in = jnp.concatenate([jnp.max(Q, axis=1), P], axis=1)
    P_out = _mlp_bf16_jax(P_in, params["P"])

    # Q branch: b*N rows; the concat here is tiny, the fused MLP runs in Pallas.
    P_exp = jnp.broadcast_to(P[:, None, :], (b, N, D0))
    R_red0 = jnp.max(R, axis=1)
    R_red1 = jnp.max(R, axis=2)
    Q_in = jnp.concatenate([P_exp, Q, R_red0, R_red1], axis=2).reshape(b * N, -1)
    Q_out = mlp_pallas(Q_in, padQ, cfg).reshape(b, N, -1)

    # R branch: dominant O(b*N^2) path, concat-free (i, j)-tiled kernel.
    R_out = r_branch_pallas(R, Q, padR, cfg)

    return P_out, Q_out, R_out


# ----------------------------------------------------------------------------
# Pure-JAX reference (concat-based, raw 132-wide weights, same bf16 math)
# ----------------------------------------------------------------------------
def spatial_relation_forward_ref(P, Q, R, params):
    b, D0 = P.shape
    _, N, D1 = Q.shape
    P_out = _mlp_bf16_jax(jnp.concatenate([jnp.max(Q, 1), P], 1), params["P"])
    P_exp = jnp.broadcast_to(P[:, None, :], (b, N, D0))
    Q_in = jnp.concatenate([P_exp, Q, jnp.max(R, 1), jnp.max(R, 2)],
                           axis=2).reshape(b * N, -1)
    Q_out = _mlp_bf16_jax(Q_in, params["Q"]).reshape(b, N, -1)
    R_in = jnp.concatenate(
        [R,
         jnp.broadcast_to(Q[:, None, :, :], (b, N, N, D1)),
         jnp.broadcast_to(Q[:, :, None, :], (b, N, N, D1))],
        axis=-1).reshape(b * N * N, -1)
    R_out = _mlp_bf16_jax(R_in, params["R"]).reshape(b, N, N, -1)
    return P_out, Q_out, R_out


# ----------------------------------------------------------------------------
if __name__ == "__main__":
    b, N = 2, 16
    D = (4, 6, 5)     # D0, D1, D2
    O = (3, 4, 2)     # O0, O1, O2

    key = jax.random.PRNGKey(0)
    kP, kQ, kR, kW = jax.random.split(key, 4)
    P = jax.random.normal(kP, (b, D[0]), jnp.float32)
    Q = jax.random.normal(kQ, (b, N, D[1]), jnp.float32)
    R = jax.random.normal(kR, (b, N, N, D[2]), jnp.float32)

    params = init_spatial_relation_params(kW, D, O)

    fwd = jax.jit(spatial_relation_forward)
    P_out, Q_out, R_out = fwd(P, Q, R, params)
    jax.block_until_ready((P_out, Q_out, R_out))

    Pr, Qr, Rr = spatial_relation_forward_ref(P, Q, R, params)
    assert P_out.shape == (b, O[0])
    assert Q_out.shape == (b, N, O[1])
    assert R_out.shape == (b, N, N, O[2])
    # bf16 matmuls: tolerance covers f32-summation-order + bf16-rounding effects
    assert jnp.allclose(P_out, Pr, atol=1e-2, rtol=1e-2)
    assert jnp.allclose(Q_out, Qr, atol=1e-2, rtol=1e-2)
    assert jnp.allclose(R_out, Rr, atol=1e-2, rtol=1e-2)

    print("KERNEL_OK")
</pallas_src>

<mosaic_0001>
module attributes {stable_mosaic.version = 11 : i64} {
  func.func @_mlp_kernel(%arg0: i32, %arg1: memref<32x20xbf16, #tpu.memory_space<vmem>>, %arg2: memref<20x256xbf16, #tpu.memory_space<vmem>>, %arg3: memref<1x256xf32, #tpu.memory_space<vmem>>, %arg4: memref<256x256xbf16, #tpu.memory_space<vmem>>, %arg5: memref<1x256xf32, #tpu.memory_space<vmem>>, %arg6: memref<256x4xbf16, #tpu.memory_space<vmem>>, %arg7: memref<1x4xf32, #tpu.memory_space<vmem>>, %arg8: memref<32x4xf32, #tpu.memory_space<vmem>>) attributes {dimension_semantics = [#tpu.dimension_semantics<parallel>], iteration_bounds = array<i64: 1>, scalar_prefetch = 0 : i64, scratch_operands = 0 : i64, tpu.core_type = #tpu.core_type<tc>, window_params = [{transform_indices = @transform_0, window_bounds = array<i64: 32, 20>}, {pipeline_mode = #tpu.pipeline_mode<synchronous>, transform_indices = @transform_1, window_bounds = array<i64: 20, 256>}, {pipeline_mode = #tpu.pipeline_mode<synchronous>, transform_indices = @transform_2, window_bounds = array<i64: 1, 256>}, {pipeline_mode = #tpu.pipeline_mode<synchronous>, transform_indices = @transform_3, window_bounds = array<i64: 256, 256>}, {pipeline_mode = #tpu.pipeline_mode<synchronous>, transform_indices = @transform_4, window_bounds = array<i64: 1, 256>}, {pipeline_mode = #tpu.pipeline_mode<synchronous>, transform_indices = @transform_5, window_bounds = array<i64: 256, 4>}, {pipeline_mode = #tpu.pipeline_mode<synchronous>, transform_indices = @transform_6, window_bounds = array<i64: 1, 4>}, {transform_indices = @transform_7, window_bounds = array<i64: 32, 4>}]} {
    %c0 = arith.constant 0 : index
    %c0_0 = arith.constant 0 : index
    %0 = vector.load %arg1[%c0, %c0_0] : memref<32x20xbf16, #tpu.memory_space<vmem>>, vector<32x20xbf16>
    %c0_1 = arith.constant 0 : index
    %c0_2 = arith.constant 0 : index
    %1 = vector.load %arg2[%c0_1, %c0_2] : memref<20x256xbf16, #tpu.memory_space<vmem>>, vector<20x256xbf16>
    %cst = arith.constant dense<0.000000e+00> : vector<32x256xf32>
    %2 = tpu.matmul %0, %1, %cst {dimension_numbers = #tpu.dot_dimension_numbers<[1], [0], [0], [1], [0, 0, 1, 1], [], []>} : vector<32x20xbf16>, vector<20x256xbf16>, vector<32x256xf32> -> vector<32x256xf32>
    %c0_3 = arith.constant 0 : index
    %c0_4 = arith.constant 0 : index
    %3 = vector.load %arg3[%c0_3, %c0_4] : memref<1x256xf32, #tpu.memory_space<vmem>>, vector<1x256xf32>
    %4 = vector.broadcast %3 : vector<1x256xf32> to vector<32x256xf32>
    %5 = arith.addf %2, %4 : vector<32x256xf32>
    %cst_5 = arith.constant 0.000000e+00 : f32
    %6 = vector.broadcast %cst_5 : f32 to vector<32x256xf32>
    %7 = arith.maximumf %5, %6 : vector<32x256xf32>
    %8 = arith.truncf %7 : vector<32x256xf32> to vector<32x256xbf16>
    %c0_6 = arith.constant 0 : index
    %c0_7 = arith.constant 0 : index
    %9 = vector.load %arg4[%c0_6, %c0_7] : memref<256x256xbf16, #tpu.memory_space<vmem>>, vector<256x256xbf16>
    %cst_8 = arith.constant dense<0.000000e+00> : vector<32x256xf32>
    %10 = tpu.matmul %8, %9, %cst_8 {dimension_numbers = #tpu.dot_dimension_numbers<[1], [0], [0], [1], [0, 0, 1, 1], [], []>} : vector<32x256xbf16>, vector<256x256xbf16>, vector<32x256xf32> -> vector<32x256xf32>
    %c0_9 = arith.constant 0 : index
    %c0_10 = arith.constant 0 : index
    %11 = vector.load %arg5[%c0_9, %c0_10] : memref<1x256xf32, #tpu.memory_space<vmem>>, vector<1x256xf32>
    %12 = vector.broadcast %11 : vector<1x256xf32> to vector<32x256xf32>
    %13 = arith.addf %10, %12 : vector<32x256xf32>
    %cst_11 = arith.constant 0.000000e+00 : f32
    %14 = vector.broadcast %cst_11 : f32 to vector<32x256xf32>
    %15 = arith.maximumf %13, %14 : vector<32x256xf32>
    %16 = arith.truncf %15 : vector<32x256xf32> to vector<32x256xbf16>
    %c0_12 = arith.constant 0 : index
    %c0_13 = arith.constant 0 : index
    %17 = vector.load %arg6[%c0_12, %c0_13] : memref<256x4xbf16, #tpu.memory_space<vmem>>, vector<256x4xbf16>
    %cst_14 = arith.constant dense<0.000000e+00> : vector<32x4xf32>
    %18 = tpu.matmul %16, %17, %cst_14 {dimension_numbers = #tpu.dot_dimension_numbers<[1], [0], [0], [1], [0, 0, 1, 1], [], []>} : vector<32x256xbf16>, vector<256x4xbf16>, vector<32x4xf32> -> vector<32x4xf32>
    %c0_15 = arith.constant 0 : index
    %c0_16 = arith.constant 0 : index
    %19 = vector.load %arg7[%c0_15, %c0_16] : memref<1x4xf32, #tpu.memory_space<vmem>>, vector<1x4xf32>
    %20 = vector.broadcast %19 : vector<1x4xf32> to vector<32x4xf32>
    %21 = arith.addf %18, %20 : vector<32x4xf32>
    %cst_17 = arith.constant 5.000000e+00 : f32
    %22 = vector.broadcast %cst_17 : f32 to vector<32x4xf32>
    %23 = arith.mulf %21, %22 : vector<32x4xf32>
    %24 = arith.negf %23 : vector<32x4xf32>
    %25 = math.exp %24 : vector<32x4xf32>
    %cst_18 = arith.constant 1.000000e+00 : f32
    %26 = vector.broadcast %cst_18 : f32 to vector<32x4xf32>
    %27 = arith.addf %26, %25 : vector<32x4xf32>
    %28 = arith.divf %26, %27 : vector<32x4xf32>
    %c0_19 = arith.constant 0 : index
    %c0_20 = arith.constant 0 : index
    %29 = vector.load %arg8[%c0_19, %c0_20] : memref<32x4xf32, #tpu.memory_space<vmem>>, vector<32x4xf32>
    tpu.vector_store %arg8[%c0_19, %c0_20], %28 {strides = array<i32>} : memref<32x4xf32, #tpu.memory_space<vmem>>, vector<32x4xf32>,
    return
  }
  func.func @transform_0(%arg0: i32) -> (i32, i32) {
    %c0_i32 = arith.constant 0 : i32
    %c0_i32_0 = arith.constant 0 : i32
    return %arg0, %c0_i32 : i32, i32
  }
  func.func @transform_1(%arg0: i32) -> (i32, i32) {
    %c0_i32 = arith.constant 0 : i32
    %c0_i32_0 = arith.constant 0 : i32
    %c0_i32_1 = arith.constant 0 : i32
    return %c0_i32, %c0_i32_0 : i32, i32
  }
  func.func @transform_2(%arg0: i32) -> (i32, i32) {
    %c0_i32 = arith.constant 0 : i32
    %c0_i32_0 = arith.constant 0 : i32
    %c0_i32_1 = arith.constant 0 : i32
    return %c0_i32, %c0_i32_0 : i32, i32
  }
  func.func @transform_3(%arg0: i32) -> (i32, i32) {
    %c0_i32 = arith.constant 0 : i32
    %c0_i32_0 = arith.constant 0 : i32
    %c0_i32_1 = arith.constant 0 : i32
    return %c0_i32, %c0_i32_0 : i32, i32
  }
  func.func @transform_4(%arg0: i32) -> (i32, i32) {
    %c0_i32 = arith.constant 0 : i32
    %c0_i32_0 = arith.constant 0 : i32
    %c0_i32_1 = arith.constant 0 : i32
    return %c0_i32, %c0_i32_0 : i32, i32
  }
  func.func @transform_5(%arg0: i32) -> (i32, i32) {
    %c0_i32 = arith.constant 0 : i32
    %c0_i32_0 = arith.constant 0 : i32
    %c0_i32_1 = arith.constant 0 : i32
    return %c0_i32, %c0_i32_0 : i32, i32
  }
  func.func @transform_6(%arg0: i32) -> (i32, i32) {
    %c0_i32 = arith.constant 0 : i32
    %c0_i32_0 = arith.constant 0 : i32
    %c0_i32_1 = arith.constant 0 : i32
    return %c0_i32, %c0_i32_0 : i32, i32
  }
  func.func @transform_7(%arg0: i32) -> (i32, i32) {
    %c0_i32 = arith.constant 0 : i32
    %c0_i32_0 = arith.constant 0 : i32
    return %arg0, %c0_i32 : i32, i32
  }
}

module attributes {stable_mosaic.version = 11 : i64} {
  func.func @_r_mlp_kernel(%arg0: i32, %arg1: i32, %arg2: i32, %arg3: memref<1x16x16x5xf32, #tpu.memory_space<vmem>>, %arg4: memref<1x16x256xf32, #tpu.memory_space<vmem>>, %arg5: memref<1x16x256xf32, #tpu.memory_space<vmem>>, %arg6: memref<5x256xf32, #tpu.memory_space<vmem>>, %arg7: memref<256x256xbf16, #tpu.memory_space<vmem>>, %arg8: memref<1x256xf32, #tpu.memory_space<vmem>>, %arg9: memref<256x2xbf16, #tpu.memory_space<vmem>>, %arg10: memref<1x2xf32, #tpu.memory_space<vmem>>, %arg11: memref<1x16x16x2xf32, #tpu.memory_space<vmem>>) attributes {dimension_semantics = [#tpu.dimension_semantics<parallel>, #tpu.dimension_semantics<parallel>, #tpu.dimension_semantics<parallel>], iteration_bounds = array<i64: 2, 1, 1>, scalar_prefetch = 0 : i64, scratch_operands = 0 : i64, tpu.core_type = #tpu.core_type<tc>, window_params = [{transform_indices = @transform_0, window_bounds = array<i64: 1, 16, 16, 5>}, {transform_indices = @transform_1, window_bounds = array<i64: 1, 16, 256>}, {transform_indices = @transform_2, window_bounds = array<i64: 1, 16, 256>}, {pipeline_mode = #tpu.pipeline_mode<synchronous>, transform_indices = @transform_3, window_bounds = array<i64: 5, 256>}, {pipeline_mode = #tpu.pipeline_mode<synchronous>, transform_indices = @transform_4, window_bounds = array<i64: 256, 256>}, {pipeline_mode = #tpu.pipeline_mode<synchronous>, transform_indices = @transform_5, window_bounds = array<i64: 1, 256>}, {pipeline_mode = #tpu.pipeline_mode<synchronous>, transform_indices = @transform_6, window_bounds = array<i64: 256, 2>}, {pipeline_mode = #tpu.pipeline_mode<synchronous>, transform_indices = @transform_7, window_bounds = array<i64: 1, 2>}, {transform_indices = @transform_8, window_bounds = array<i64: 1, 16, 16, 2>}]} {
    %c0 = arith.constant 0 : index
    %c0_0 = arith.constant 0 : index
    %c0_1 = arith.constant 0 : index
    %c0_2 = arith.constant 0 : index
    %0 = vector.load %arg3[%c0, %c0_0, %c0_1, %c0_2] : memref<1x16x16x5xf32, #tpu.memory_space<vmem>>, vector<1x16x16x5xf32>
    %1 = vector.shape_cast %0 : vector<1x16x16x5xf32> to vector<16x16x5xf32>
    %2 = arith.truncf %1 : vector<16x16x5xf32> to vector<16x16x5xbf16>
    %3 = arith.extf %2 : vector<16x16x5xbf16> to vector<16x16x5xf32>
    %c0_3 = arith.constant 0 : index
    %c0_4 = arith.constant 0 : index
    %c0_5 = arith.constant 0 : index
    %4 = vector.load %arg4[%c0_3, %c0_4, %c0_5] : memref<1x16x256xf32, #tpu.memory_space<vmem>>, vector<1x16x256xf32>
    %5 = vector.shape_cast %4 : vector<1x16x256xf32> to vector<16x256xf32>
    %6 = vector.shape_cast %5 : vector<16x256xf32> to vector<1x16x256xf32>
    %c0_6 = arith.constant 0 : index
    %c0_7 = arith.constant 0 : index
    %c0_8 = arith.constant 0 : index
    %7 = vector.load %arg5[%c0_6, %c0_7, %c0_8] : memref<1x16x256xf32, #tpu.memory_space<vmem>>, vector<1x16x256xf32>
    %8 = vector.shape_cast %7 : vector<1x16x256xf32> to vector<16x256xf32>
    %9 = vector.shape_cast %8 : vector<16x256xf32> to vector<16x1x256xf32>
    %10 = vector.broadcast %6 : vector<1x16x256xf32> to vector<16x16x256xf32>
    %11 = vector.broadcast %9 : vector<16x1x256xf32> to vector<16x16x256xf32>
    %12 = arith.addf %10, %11 : vector<16x16x256xf32>
    %c0_9 = arith.constant 0 : index
    %c0_10 = arith.constant 0 : index
    %13 = vector.load %arg6[%c0_9, %c0_10] : memref<5x256xf32, #tpu.memory_space<vmem>>, vector<5x256xf32>
    %14 = vector.extract_strided_slice %3 {offsets = [0, 0, 0], sizes = [16, 16, 1], strides = [1, 1, 1]} : vector<16x16x5xf32> to vector<16x16x1xf32>
    %15 = vector.extract_strided_slice %13 {offsets = [0, 0], sizes = [1, 256], strides = [1, 1]} : vector<5x256xf32> to vector<1x256xf32>
    %16 = vector.shape_cast %15 : vector<1x256xf32> to vector<256xf32>
    %17 = vector.shape_cast %16 : vector<256xf32> to vector<1x1x256xf32>
    %18 = vector.broadcast %14 : vector<16x16x1xf32> to vector<16x16x256xf32>
    %19 = vector.broadcast %17 : vector<1x1x256xf32> to vector<16x16x256xf32>
    %20 = arith.mulf %18, %19 : vector<16x16x256xf32>
    %21 = arith.addf %12, %20 : vector<16x16x256xf32>
    %22 = vector.extract_strided_slice %3 {offsets = [0, 0, 1], sizes = [16, 16, 1], strides = [1, 1, 1]} : vector<16x16x5xf32> to vector<16x16x1xf32>
    %23 = vector.extract_strided_slice %13 {offsets = [1, 0], sizes = [1, 256], strides = [1, 1]} : vector<5x256xf32> to vector<1x256xf32>
    %24 = vector.shape_cast %23 : vector<1x256xf32> to vector<256xf32>
    %25 = vector.shape_cast %24 : vector<256xf32> to vector<1x1x256xf32>
    %26 = vector.broadcast %22 : vector<16x16x1xf32> to vector<16x16x256xf32>
    %27 = vector.broadcast %25 : vector<1x1x256xf32> to vector<16x16x256xf32>
    %28 = arith.mulf %26, %27 : vector<16x16x256xf32>
    %29 = arith.addf %21, %28 : vector<16x16x256xf32>
    %30 = vector.extract_strided_slice %3 {offsets = [0, 0, 2], sizes = [16, 16, 1], strides = [1, 1, 1]} : vector<16x16x5xf32> to vector<16x16x1xf32>
    %31 = vector.extract_strided_slice %13 {offsets = [2, 0], sizes = [1, 256], strides = [1, 1]} : vector<5x256xf32> to vector<1x256xf32>
    %32 = vector.shape_cast %31 : vector<1x256xf32> to vector<256xf32>
    %33 = vector.shape_cast %32 : vector<256xf32> to vector<1x1x256xf32>
    %34 = vector.broadcast %30 : vector<16x16x1xf32> to vector<16x16x256xf32>
    %35 = vector.broadcast %33 : vector<1x1x256xf32> to vector<16x16x256xf32>
    %36 = arith.mulf %34, %35 : vector<16x16x256xf32>
    %37 = arith.addf %29, %36 : vector<16x16x256xf32>
    %38 = vector.extract_strided_slice %3 {offsets = [0, 0, 3], sizes = [16, 16, 1], strides = [1, 1, 1]} : vector<16x16x5xf32> to vector<16x16x1xf32>
    %39 = vector.extract_strided_slice %13 {offsets = [3, 0], sizes = [1, 256], strides = [1, 1]} : vector<5x256xf32> to vector<1x256xf32>
    %40 = vector.shape_cast %39 : vector<1x256xf32> to vector<256xf32>
    %41 = vector.shape_cast %40 : vector<256xf32> to vector<1x1x256xf32>
    %42 = vector.broadcast %38 : vector<16x16x1xf32> to vector<16x16x256xf32>
    %43 = vector.broadcast %41 : vector<1x1x256xf32> to vector<16x16x256xf32>
    %44 = arith.mulf %42, %43 : vector<16x16x256xf32>
    %45 = arith.addf %37, %44 : vector<16x16x256xf32>
    %46 = vector.extract_strided_slice %3 {offsets = [0, 0, 4], sizes = [16, 16, 1], strides = [1, 1, 1]} : vector<16x16x5xf32> to vector<16x16x1xf32>
    %47 = vector.extract_strided_slice %13 {offsets = [4, 0], sizes = [1, 256], strides = [1, 1]} : vector<5x256xf32> to vector<1x256xf32>
    %48 = vector.shape_cast %47 : vector<1x256xf32> to vector<256xf32>
    %49 = vector.shape_cast %48 : vector<256xf32> to vector<1x1x256xf32>
    %50 = vector.broadcast %46 : vector<16x16x1xf32> to vector<16x16x256xf32>
    %51 = vector.broadcast %49 : vector<1x1x256xf32> to vector<16x16x256xf32>
    %52 = arith.mulf %50, %51 : vector<16x16x256xf32>
    %53 = arith.addf %45, %52 : vector<16x16x256xf32>
    %cst = arith.constant 0.000000e+00 : f32
    %54 = vector.broadcast %cst : f32 to vector<16x16x256xf32>
    %55 = arith.maximumf %53, %54 : vector<16x16x256xf32>
    %56 = arith.truncf %55 : vector<16x16x256xf32> to vector<16x16x256xbf16>
    %57 = vector.shape_cast %56 : vector<16x16x256xbf16> to vector<256x256xbf16>
    %c0_11 = arith.constant 0 : index
    %c0_12 = arith.constant 0 : index
    %58 = vector.load %arg7[%c0_11, %c0_12] : memref<256x256xbf16, #tpu.memory_space<vmem>>, vector<256x256xbf16>
    %cst_13 = arith.constant dense<0.000000e+00> : vector<256x256xf32>
    %59 = tpu.matmul %57, %58, %cst_13 {dimension_numbers = #tpu.dot_dimension_numbers<[1], [0], [0], [1], [0, 0, 1, 1], [], []>} : vector<256x256xbf16>, vector<256x256xbf16>, vector<256x256xf32> -> vector<256x256xf32>
    %c0_14 = arith.constant 0 : index
    %c0_15 = arith.constant 0 : index
    %60 = vector.load %arg8[%c0_14, %c0_15] : memref<1x256xf32, #tpu.memory_space<vmem>>, vector<1x256xf32>
    %61 = vector.broadcast %60 : vector<1x256xf32> to vector<256x256xf32>
    %62 = arith.addf %59, %61 : vector<256x256xf32>
    %cst_16 = arith.constant 0.000000e+00 : f32
    %63 = vector.broadcast %cst_16 : f32 to vector<256x256xf32>
    %64 = arith.maximumf %62, %63 : vector<256x256xf32>
    %65 = arith.truncf %64 : vector<256x256xf32> to vector<256x256xbf16>
    %c0_17 = arith.constant 0 : index
    %c0_18 = arith.constant 0 : index
    %66 = vector.load %arg9[%c0_17, %c0_18] : memref<256x2xbf16, #tpu.memory_space<vmem>>, vector<256x2xbf16>
    %cst_19 = arith.constant dense<0.000000e+00> : vector<256x2xf32>
    %67 = tpu.matmul %65, %66, %cst_19 {dimension_numbers = #tpu.dot_dimension_numbers<[1], [0], [0], [1], [0, 0, 1, 1], [], []>} : vector<256x256xbf16>, vector<256x2xbf16>, vector<256x2xf32> -> vector<256x2xf32>
    %c0_20 = arith.constant 0 : index
    %c0_21 = arith.constant 0 : index
    %68 = vector.load %arg10[%c0_20, %c0_21] : memref<1x2xf32, #tpu.memory_space<vmem>>, vector<1x2xf32>
    %69 = vector.broadcast %68 : vector<1x2xf32> to vector<256x2xf32>
    %70 = arith.addf %67, %69 : vector<256x2xf32>
    %cst_22 = arith.constant 5.000000e+00 : f32
    %71 = vector.broadcast %cst_22 : f32 to vector<256x2xf32>
    %72 = arith.mulf %70, %71 : vector<256x2xf32>
    %73 = arith.negf %72 : vector<256x2xf32>
    %74 = math.exp %73 : vector<256x2xf32>
    %cst_23 = arith.constant 1.000000e+00 : f32
    %75 = vector.broadcast %cst_23 : f32 to vector<256x2xf32>
    %76 = arith.addf %75, %74 : vector<256x2xf32>
    %77 = arith.divf %75, %76 : vector<256x2xf32>
    %78 = vector.shape_cast %77 : vector<256x2xf32> to vector<16x16x2xf32>
    %c0_24 = arith.constant 0 : index
    %c0_25 = arith.constant 0 : index
    %c0_26 = arith.constant 0 : index
    %c0_27 = arith.constant 0 : index
    %79 = vector.load %arg11[%c0_24, %c0_25, %c0_26, %c0_27] : memref<1x16x16x2xf32, #tpu.memory_space<vmem>>, vector<1x16x16x2xf32>
    %80 = vector.shape_cast %79 : vector<1x16x16x2xf32> to vector<16x16x2xf32>
    %81 = vector.shape_cast %78 : vector<16x16x2xf32> to vector<1x16x16x2xf32>
    tpu.vector_store %arg11[%c0_24, %c0_25, %c0_26, %c0_27], %81 {strides = array<i32>} : memref<1x16x16x2xf32, #tpu.memory_space<vmem>>, vector<1x16x16x2xf32>,
    return
  }
  func.func @transform_0(%arg0: i32, %arg1: i32, %arg2: i32) -> (i32, i32, i32, i32) {
    %c0_i32 = arith.constant 0 : i32
    %c0_i32_0 = arith.constant 0 : i32
    return %arg0, %arg1, %arg2, %c0_i32 : i32, i32, i32, i32
  }
  func.func @transform_1(%arg0: i32, %arg1: i32, %arg2: i32) -> (i32, i32, i32) {
    %c0_i32 = arith.constant 0 : i32
    %c0_i32_0 = arith.constant 0 : i32
    return %arg0, %arg2, %c0_i32 : i32, i32, i32
  }
  func.func @transform_2(%arg0: i32, %arg1: i32, %arg2: i32) -> (i32, i32, i32) {
    %c0_i32 = arith.constant 0 : i32
    %c0_i32_0 = arith.constant 0 : i32
    return %arg0, %arg1, %c0_i32 : i32, i32, i32
  }
  func.func @transform_3(%arg0: i32, %arg1: i32, %arg2: i32) -> (i32, i32) {
    %c0_i32 = arith.constant 0 : i32
    %c0_i32_0 = arith.constant 0 : i32
    %c0_i32_1 = arith.constant 0 : i32
    return %c0_i32, %c0_i32_0 : i32, i32
  }
  func.func @transform_4(%arg0: i32, %arg1: i32, %arg2: i32) -> (i32, i32) {
    %c0_i32 = arith.constant 0 : i32
    %c0_i32_0 = arith.constant 0 : i32
    %c0_i32_1 = arith.constant 0 : i32
    return %c0_i32, %c0_i32_0 : i32, i32
  }
  func.func @transform_5(%arg0: i32, %arg1: i32, %arg2: i32) -> (i32, i32) {
    %c0_i32 = arith.constant 0 : i32
    %c0_i32_0 = arith.constant 0 : i32
    %c0_i32_1 = arith.constant 0 : i32
    return %c0_i32, %c0_i32_0 : i32, i32
  }
  func.func @transform_6(%arg0: i32, %arg1: i32, %arg2: i32) -> (i32, i32) {
    %c0_i32 = arith.constant 0 : i32
    %c0_i32_0 = arith.constant 0 : i32
    %c0_i32_1 = arith.constant 0 : i32
    return %c0_i32, %c0_i32_0 : i32, i32
  }
  func.func @transform_7(%arg0: i32, %arg1: i32, %arg2: i32) -> (i32, i32) {
    %c0_i32 = arith.constant 0 : i32
    %c0_i32_0 = arith.constant 0 : i32
    %c0_i32_1 = arith.constant 0 : i32
    return %c0_i32, %c0_i32_0 : i32, i32
  }
  func.func @transform_8(%arg0: i32, %arg1: i32, %arg2: i32) -> (i32, i32, i32, i32) {
    %c0_i32 = arith.constant 0 : i32
    %c0_i32_0 = arith.constant 0 : i32
    return %arg0, %arg1, %arg2, %c0_i32 : i32, i32, i32, i32
  }
}

</mosaic_0001>

<bundles_post_ra>
// kernel: spatial_relation_forward.2
= control target key start
LH: loop header
LB: loop body
LE: loop exit
PB: predicated region body
PF: predicated region fallthrough
CT: control target
= control target key end

     0   :  { %vm72_vm0 = vcmask 1041408   ;;  %vm65_vm1 = vcmask 162816   ;;  %vm665_vm5 = vcmask 31744   ;;  %s1307_s1 = inlined_call_operand.vmem [shape: bf16[20,256], index: 1, kind: input, shape index: {}]   ;;  %s1308_s3 = inlined_call_operand.vmem [shape: bf16[256,256], index: 3, kind: input, shape index: {}]   ;;  %s1309_s0 = inlined_call_operand.vmem [shape: bf16[32,20], index: 0, kind: input, shape index: {}]   ;;  %s1310_s2 = inlined_call_operand.vmem [shape: f32[1,256], index: 2, kind: input, shape index: {}]   ;;  %s1311_s5 = inlined_call_operand.vmem [shape: bf16[256,4], index: 5, kind: input, shape index: {}]   ;;  %s1312_s4 = inlined_call_operand.vmem [shape: f32[1,256], index: 4, kind: input, shape index: {}]   ;;  %s1313_s6 = inlined_call_operand.vmem [shape: f32[1,4], index: 6, kind: input, shape index: {}]   ;;  %s1314_s7 = inlined_call_operand.vmem [shape: f32[32,4], index: 7, kind: output, shape index: {}]  }
   0x1   :  { %v33_v0 = vld [vmem:[%s1307_s1 + $0x10] sm:$0x33]  ;;  %v684_v3 = vld [vmem:[%s1307_s1] sm:$0xf]  ;;  %v893_v4 = vld [vmem:[%s1307_s1 + $0x4] sm:$0xf0] }
   0x2   :  { %v57_v1 = vunpack.c.l.b16 %v33_v0  ;;  %v58_v2 = vunpack.c.h.b16 %v33_v0  ;;  %v892_v5 = vld [vmem:[%s1307_s1 + $0x4] sm:$0xf]  ;;  %v686_v6 = vld [vmem:[%s1307_s1 + $0x8] sm:$0xf0]  ;;  %v752_v7 = vld [vmem:[%s1308_s3 + $0x70] sm:$0xf]  ;;  %v685_v23 = vor.u32 %v893_v4, %v684_v3 }
   0x3   :  { %v909_v8 = vld [vmem:[%s1308_s3 + $0x74] sm:$0xf0]  ;;  %v816_v12 = vld [vmem:[%s1308_s3 + $0xf0] sm:$0xf]  ;;  %v908_v14 = vld [vmem:[%s1308_s3 + $0x74] sm:$0xf]  ;;  %v689_v24 = vor.u32 %v892_v5, %v686_v6 }
   0x4   :  { %v61_v9 = vpack.c.b16 %v57_v1, %v57_v1  ;;  %v62_v10 = vpack.c.b16 %v58_v2, %v58_v2  ;;  %v753_v11 = vor.u32 %v909_v8, %v752_v7  ;;  %v925_v13 = vld [vmem:[%s1308_s3 + $0xf4] sm:$0xf0]  ;;  %v754_v16 = vld [vmem:[%s1308_s3 + $0x78] sm:$0xf0]  ;;  %v924_v17 = vld [vmem:[%s1308_s3 + $0xf4] sm:$0xf] }
   0x5   :  { %v817_v15 = vor.u32 %v925_v13, %v816_v12  ;;  %v818_v18 = vld [vmem:[%s1308_s3 + $0xf8] sm:$0xf0]  ;;  %v744_v21 = vld [vmem:[%s1308_s3 + $0x60] sm:$0xf]  ;;  %v907_v22 = vld [vmem:[%s1308_s3 + $0x64] sm:$0xf0]  ;;  %v757_v28 = vor.u32 %v908_v14, %v754_v16 }
   0x6   :  { %v74_v19 = vsel %vm72_vm0, %v61_v9, 0  ;;  %v77_v20 = vsel %vm72_vm0, %v62_v10, 0  ;;  %327 = vmatpush.bf16.msra.mxu2 %v753_v11  ;;  %v745_v25 = vor.u32 %v907_v22, %v744_v21  ;;  %v808_v26 = vld [vmem:[%s1308_s3 + $0xe0] sm:$0xf]  ;;  %v923_v27 = vld [vmem:[%s1308_s3 + $0xe4] sm:$0xf0]  ;;  %v821_v29 = vor.u32 %v924_v17, %v818_v18 }
   0x7   :  { %85 = vmatpush.bf16.msra.mxu0 %v74_v19  ;;  %104 = vmatpush.bf16.msra.mxu1 %v77_v20  ;;  %v906_v30 = vld [vmem:[%s1308_s3 + $0x64] sm:$0xf]  ;;  %v746_v31 = vld [vmem:[%s1308_s3 + $0x68] sm:$0xf0]  ;;  %v809_v33 = vor.u32 %v923_v27, %v808_v26  ;;  %v736_v35 = vld [vmem:[%s1308_s3 + $0x50] sm:$0xf] }
   0x8   :  { %346 = vmatpush.bf16.msra.mxu3 %v817_v15  ;;  %v922_v32 = vld [vmem:[%s1308_s3 + $0xe4] sm:$0xf]  ;;  %v810_v34 = vld [vmem:[%s1308_s3 + $0xe8] sm:$0xf0]  ;;  %v905_v36 = vld [vmem:[%s1308_s3 + $0x54] sm:$0xf0]  ;;  %v749_v41 = vor.u32 %v906_v30, %v746_v31 }
   0x9   :  { %v890_v37 = vld [vmem:[%s1309_s0] sm:$0xff]  ;;  %v800_v38 = vld [vmem:[%s1308_s3 + $0xd0] sm:$0xf]  ;;  %v921_v39 = vld [vmem:[%s1308_s3 + $0xd4] sm:$0xf0]  ;;  %v737_v40 = vor.u32 %v905_v36, %v736_v35  ;;  %v813_v42 = vor.u32 %v922_v32, %v810_v34 }
   0xa   :  { %328 = vmatpush.bf16.msra.mxu2 %v745_v25  ;;  %v904_v43 = vld [vmem:[%s1308_s3 + $0x54] sm:$0xf]  ;;  %v728_v44 = vld [vmem:[%s1308_s3 + $0x40] sm:$0xf]  ;;  %v903_v45 = vld [vmem:[%s1308_s3 + $0x44] sm:$0xf0]  ;;  %v801_v46 = vor.u32 %v921_v39, %v800_v38 }
   0xb   :  { %86 = vmatpush.bf16.msra.mxu0 %v685_v23  ;;  %105 = vmatpush.bf16.msra.mxu1 %v689_v24  ;;  %v738_v47 = vld [vmem:[%s1308_s3 + $0x58] sm:$0xf0]  ;;  %v920_v48 = vld [vmem:[%s1308_s3 + $0xd4] sm:$0xf]  ;;  %v792_v50 = vld [vmem:[%s1308_s3 + $0xc0] sm:$0xf]  ;;  %v729_v52 = vor.u32 %v903_v45, %v728_v44 }
   0xc   :  { %347 = vmatpush.bf16.msra.mxu3 %v809_v33  ;;  %v802_v49 = vld [vmem:[%s1308_s3 + $0xd8] sm:$0xf0]  ;;  %v919_v51 = vld [vmem:[%s1308_s3 + $0xc4] sm:$0xf0]  ;;  %v741_v53 = vor.u32 %v904_v43, %v738_v47  ;;  %v902_v55 = vld [vmem:[%s1308_s3 + $0x44] sm:$0xf] }
   0xd   :  { %v805_v54 = vor.u32 %v920_v48, %v802_v49  ;;  %v793_v56 = vor.u32 %v919_v51, %v792_v50  ;;  %v730_v57 = vld [vmem:[%s1308_s3 + $0x48] sm:$0xf0]  ;;  %v918_v58 = vld [vmem:[%s1308_s3 + $0xc4] sm:$0xf]  ;;  %v720_v63 = vld [vmem:[%s1308_s3 + $0x30] sm:$0xf] }
   0xe   :  { %690 = vmatmul.msk.bf16.vlgmr.msra.gmra.mxu0 %vm65_vm1, %v890_v37  ;;  %692 = vmatmul.msk.bf16.vlgmr.msra.gmra.mxu1 %vm65_vm1, %v890_v37  ;;  %v794_v59 = vld [vmem:[%s1308_s3 + $0xc8] sm:$0xf0]  ;;  %v733_v60 = vor.u32 %v902_v55, %v730_v57  ;;  %v901_v0 = vld [vmem:[%s1308_s3 + $0x34] sm:$0xf0]  ;;  %v784_v1 = vld [vmem:[%s1308_s3 + $0xb0] sm:$0xf] }
   0xf   :  { %365 = vmatpush.bf16.msrb.mxu0 %v757_v28  ;;  %384 = vmatpush.bf16.msrb.mxu1 %v821_v29  ;;  %v797_v61 = vor.u32 %v918_v58, %v794_v59  ;;  %v891_v62 = vld [vmem:[%s1309_s0 + $0x8] sm:$0xff]  ;;  %v721_v2 = vor.u32 %v901_v0, %v720_v63  ;;  %v917_v3 = vld [vmem:[%s1308_s3 + $0xb4] sm:$0xf0]  ;;  %v900_v4 = vld [vmem:[%s1308_s3 + $0x34] sm:$0xf] }
  0x10   :  { %329 = vmatpush.bf16.msra.mxu2 %v737_v40  ;;  %348 = vmatpush.bf16.msra.mxu3 %v801_v46  ;;  %v722_v5 = vld [vmem:[%s1308_s3 + $0x38] sm:$0xf0]  ;;  %v785_v6 = vor.u32 %v917_v3, %v784_v1  ;;  %v916_v8 = vld [vmem:[%s1308_s3 + $0xb4] sm:$0xf]  ;;  %v712_v11 = vld [vmem:[%s1308_s3 + $0x20] sm:$0xf] }
  0x11   :  { %v725_v7 = vor.u32 %v900_v4, %v722_v5  ;;  %v786_v9 = vld [vmem:[%s1308_s3 + $0xb8] sm:$0xf0]  ;;  %v899_v12 = vld [vmem:[%s1308_s3 + $0x24] sm:$0xf0]  ;;  %v776_v14 = vld [vmem:[%s1308_s3 + $0xa0] sm:$0xf] }
  0x12   :  { %v789_v10 = vor.u32 %v916_v8, %v786_v9  ;;  %v713_v13 = vor.u32 %v899_v12, %v712_v11  ;;  %v915_v15 = vld [vmem:[%s1308_s3 + $0xa4] sm:$0xf0]  ;;  %v898_v16 = vld [vmem:[%s1308_s3 + $0x24] sm:$0xf]  ;;  %v714_v18 = vld [vmem:[%s1308_s3 + $0x28] sm:$0xf0] }
  0x13   :  { %366 = vmatpush.bf16.msrb.mxu0 %v749_v41  ;;  %385 = vmatpush.bf16.msrb.mxu1 %v813_v42  ;;  %v777_v17 = vor.u32 %v915_v15, %v776_v14  ;;  %v914_v19 = vld [vmem:[%s1308_s3 + $0xa4] sm:$0xf]  ;;  %v778_v20 = vld [vmem:[%s1308_s3 + $0xa8] sm:$0xf0]  ;;  %v717_v21 = vor.u32 %v898_v16, %v714_v18  ;;  %v704_v23 = vld [vmem:[%s1308_s3 + $0x10] sm:$0xf] }
  0x14   :  { %330 = vmatpush.bf16.msra.mxu2 %v729_v52  ;;  %349 = vmatpush.bf16.msra.mxu3 %v793_v56  ;;  %v781_v22 = vor.u32 %v914_v19, %v778_v20  ;;  %v897_v24 = vld [vmem:[%s1308_s3 + $0x14] sm:$0xf0]  ;;  %v768_v25 = vld [vmem:[%s1308_s3 + $0x90] sm:$0xf]  ;;  %v896_v28 = vld [vmem:[%s1308_s3 + $0x14] sm:$0xf] }
  0x15   :  { %v705_v26 = vor.u32 %v897_v24, %v704_v23  ;;  %v913_v27 = vld [vmem:[%s1308_s3 + $0x94] sm:$0xf0]  ;;  %v706_v29 = vld [vmem:[%s1308_s3 + $0x18] sm:$0xf0]  ;;  %v912_v32 = vld [vmem:[%s1308_s3 + $0x94] sm:$0xf] }
  0x16   :  { %v769_v30 = vor.u32 %v913_v27, %v768_v25  ;;  %v709_v31 = vor.u32 %v896_v28, %v706_v29  ;;  %v770_v33 = vld [vmem:[%s1308_s3 + $0x98] sm:$0xf0]  ;;  %v696_v35 = vld [vmem:[%s1308_s3] sm:$0xf]  ;;  %v895_v36 = vld [vmem:[%s1308_s3 + $0x4] sm:$0xf0] }
  0x17   :  { %367 = vmatpush.bf16.msrb.mxu0 %v741_v53  ;;  %386 = vmatpush.bf16.msrb.mxu1 %v805_v54  ;;  %v773_v34 = vor.u32 %v912_v32, %v770_v33  ;;  %v760_v37 = vld [vmem:[%s1308_s3 + $0x80] sm:$0xf]  ;;  %v697_v38 = vor.u32 %v895_v36, %v696_v35  ;;  %v911_v39 = vld [vmem:[%s1308_s3 + $0x84] sm:$0xf0]  ;;  %v894_v40 = vld [vmem:[%s1308_s3 + $0x4] sm:$0xf] }
  0x18   :  { %331 = vmatpush.bf16.msra.mxu2 %v721_v2  ;;  %350 = vmatpush.bf16.msra.mxu3 %v785_v6  ;;  %v698_v41 = vld [vmem:[%s1308_s3 + $0x8] sm:$0xf0]  ;;  %v761_v42 = vor.u32 %v911_v39, %v760_v37  ;;  %v910_v44 = vld [vmem:[%s1308_s3 + $0x84] sm:$0xf]  ;;  %v34_v47 = vld [vmem:[%s1310_s2] sm:$0x3] }
  0x19   :  { %v701_v43 = vor.u32 %v894_v40, %v698_v41  ;;  %v762_v45 = vld [vmem:[%s1308_s3 + $0x88] sm:$0xf0]  ;;  %v941_v50 = vld [vmem:[%s1311_s5 + $0x78] sm:$0xff]  ;;  %v940_v52 = vld [vmem:[%s1311_s5 + $0x70] sm:$0xff]  ;;  %v36_v54 = vperm.slane %v34_v47, 0  ;;  %v37_v55 = vperm.slane %v34_v47, 1 }
  0x1a   :  { %v765_v46 = vor.u32 %v910_v44, %v762_v45  ;;  %v933_v51 = vld [vmem:[%s1311_s5 + $0x38] sm:$0xff]  ;;  %v932_v53 = vld [vmem:[%s1311_s5 + $0x30] sm:$0xff]  ;;  %v939_v56 = vld [vmem:[%s1311_s5 + $0x68] sm:$0xff] }
  0x1b   :  { %368 = vmatpush.bf16.msrb.mxu0 %v733_v60  ;;  %387 = vmatpush.bf16.msrb.mxu1 %v797_v61  ;;  %v938_v63 = vld [vmem:[%s1311_s5 + $0x60] sm:$0xff]  ;;  %v931_v20 = vld [vmem:[%s1311_s5 + $0x28] sm:$0xff]  ;;  %v936_v23 = vld [vmem:[%s1311_s5 + $0x50] sm:$0xff] }
  0x1c   :  { %332 = vmatpush.bf16.msra.mxu2 %v713_v13  ;;  %351 = vmatpush.bf16.msra.mxu3 %v777_v17  ;;  %v929_v24 = vld [vmem:[%s1311_s5 + $0x18] sm:$0xff]  ;;  %v935_v25 = vld [vmem:[%s1311_s5 + $0x48] sm:$0xff]  ;;  %v934_v27 = vld [vmem:[%s1311_s5 + $0x40] sm:$0xff] }
  0x1d   :  { %v927_v28 = vld [vmem:[%s1311_s5 + $0x8] sm:$0xff]  ;;  %v926_v29 = vld [vmem:[%s1311_s5] sm:$0xff] }
  0x1e   :  { %691 = vmatmul.msk.bf16.gmra.mxu0 %vm65_vm1, %v891_v62  ;;  %693 = vmatmul.msk.bf16.gmra.mxu1 %vm65_vm1, %v891_v62 }
  0x1f   :  { %369 = vmatpush.bf16.msrb.mxu0 %v725_v7  ;;  %388 = vmatpush.bf16.msrb.mxu1 %v789_v10 }
  0x20   :  { %333 = vmatpush.bf16.msra.mxu2 %v705_v26  ;;  %352 = vmatpush.bf16.msra.mxu3 %v769_v30  ;;  %v928_v26 = vld [vmem:[%s1311_s5 + $0x10] sm:$0xff]  ;;  %v161_v30 = vld [vmem:[%s1312_s4] sm:$0x3] }
  0x21   :  { %v164_v33 = vperm.slane %v161_v30, 1  ;;  %v163_v37 = vperm.slane %v161_v30, 0 }
  0x23   :  { %370 = vmatpush.bf16.msrb.mxu0 %v717_v21  ;;  %389 = vmatpush.bf16.msrb.mxu1 %v781_v22  ;;  %v937_v21 = vld [vmem:[%s1311_s5 + $0x58] sm:$0xff]  ;;  %v930_v22 = vld [vmem:[%s1311_s5 + $0x20] sm:$0xff] }
  0x24   :  { %334 = vmatpush.bf16.msra.mxu2 %v697_v38  ;;  %353 = vmatpush.bf16.msra.mxu3 %v761_v42 }
  0x27   :  { %371 = vmatpush.bf16.msrb.mxu0 %v709_v31  ;;  %390 = vmatpush.bf16.msrb.mxu1 %v773_v34 }
  0x28   :  { %950 = vmatpush.bf16.msrb.mxu3 %v941_v50  ;;  %942 = vmatpush.bf16.msrb.mxu2 %v933_v51 }
  0x2b   :  { %372 = vmatpush.bf16.msrb.mxu0 %v701_v43  ;;  %391 = vmatpush.bf16.msrb.mxu1 %v765_v46 }
  0x2c   :  { %951 = vmatpush.bf16.msrb.mxu3 %v940_v52  ;;  %943 = vmatpush.bf16.msrb.mxu2 %v932_v53 }
  0x2f   :  { %566 = vmatpush.bf16.msra.mxu1 %v941_v50  ;;  %547 = vmatpush.bf16.msra.mxu0 %v933_v51 }
  0x30   :  { %952 = vmatpush.bf16.msrb.mxu3 %v939_v56  ;;  %944 = vmatpush.bf16.msrb.mxu2 %v931_v20 }
  0x33   :  { %567 = vmatpush.bf16.msra.mxu1 %v940_v52  ;;  %548 = vmatpush.bf16.msra.mxu0 %v932_v53 }
  0x34   :  { %953 = vmatpush.bf16.msrb.mxu3 %v938_v63  ;;  %945 = vmatpush.bf16.msrb.mxu2 %v930_v22 }
  0x37   :  { %568 = vmatpush.bf16.msra.mxu1 %v939_v56  ;;  %549 = vmatpush.bf16.msra.mxu0 %v931_v20 }
  0x38   :  { %954 = vmatpush.bf16.msrb.mxu3 %v937_v21  ;;  %946 = vmatpush.bf16.msrb.mxu2 %v929_v24 }
  0x3b   :  { %569 = vmatpush.bf16.msra.mxu1 %v938_v63  ;;  %550 = vmatpush.bf16.msra.mxu0 %v930_v22 }
  0x3c   :  { %955 = vmatpush.bf16.msrb.mxu3 %v936_v23  ;;  %947 = vmatpush.bf16.msrb.mxu2 %v928_v26 }
  0x3f   :  { %570 = vmatpush.bf16.msra.mxu1 %v937_v21  ;;  %551 = vmatpush.bf16.msra.mxu0 %v929_v24 }
  0x40   :  { %956 = vmatpush.bf16.msrb.mxu3 %v935_v25  ;;  %948 = vmatpush.bf16.msrb.mxu2 %v927_v28 }
  0x43   :  { %571 = vmatpush.bf16.msra.mxu1 %v936_v23  ;;  %552 = vmatpush.bf16.msra.mxu0 %v928_v26 }
  0x44   :  { %957 = vmatpush.bf16.msrb.mxu3 %v934_v27  ;;  %949 = vmatpush.bf16.msrb.mxu2 %v926_v29 }
  0x47   :  { %572 = vmatpush.bf16.msra.mxu1 %v935_v25  ;;  %553 = vmatpush.bf16.msra.mxu0 %v927_v28 }
  0x4b   :  { %573 = vmatpush.bf16.msra.mxu1 %v934_v27  ;;  %554 = vmatpush.bf16.msra.mxu0 %v926_v29 }
  0x8b   :  { %v88_v48 = vpop.f32.mrf.mxu0  ;;  %v107_v49 = vpop.f32.mrf.mxu1 }
  0x8c   :  { %v89_v57 = vadd.f32 %v88_v48, %v36_v54  ;;  %v108_v58 = vadd.f32 %v107_v49, %v37_v55 }
  0x8e   :  { %v117_v0 = vmax.f32 %v89_v57, 0.0  ;;  %v118_v1 = vmax.f32 %v108_v58, 0.0 }
  0x93   :  { %v90_v59 = vpop.f32.mrf.mxu0  ;;  %v109_v60 = vpop.f32.mrf.mxu1 }
  0x94   :  { %v91_v61 = vadd.f32 %v90_v59, %v36_v54  ;;  %v110_v62 = vadd.f32 %v109_v60, %v37_v55 }
  0x96   :  { %v119_v2 = vmax.f32 %v91_v61, 0.0  ;;  %v120_v3 = vmax.f32 %v110_v62, 0.0 }
  0x98   :  { %v125_v4 = vpack.c.bf16 %v119_v2, %v117_v0  ;;  %v126_v5 = vpack.c.bf16 %v120_v3, %v118_v1 }
  0x9a   :  { %335 = vmatmul.bf16.vlgmr.msra.gmra.mxu2 %v125_v4  ;;  %354 = vmatmul.bf16.vlgmr.msra.gmra.mxu3 %v126_v5 }
  0x9b   :  { %373 = vmatmul.bf16.vlgmr.msrb.gmra.mxu0 %v125_v4  ;;  %392 = vmatmul.bf16.vlgmr.msrb.gmra.mxu1 %v126_v5  ;;  %v93_v6 = vpop.f32.mrf.mxu0  ;;  %v112_v7 = vpop.f32.mrf.mxu1 }
  0x9c   :  { %v94_v8 = vadd.f32 %v93_v6, %v36_v54  ;;  %v113_v9 = vadd.f32 %v112_v7, %v37_v55 }
  0x9e   :  { %v121_v14 = vmax.f32 %v94_v8, 0.0  ;;  %v122_v15 = vmax.f32 %v113_v9, 0.0 }
  0xa3   :  { %v95_v10 = vpop.f32.mrf.mxu0  ;;  %v114_v11 = vpop.f32.mrf.mxu1 }
  0xa4   :  { %v96_v12 = vadd.f32 %v95_v10, %v36_v54  ;;  %v115_v13 = vadd.f32 %v114_v11, %v37_v55 }
  0xa6   :  { %v123_v16 = vmax.f32 %v96_v12, 0.0  ;;  %v124_v17 = vmax.f32 %v115_v13, 0.0  ;;  %v958_v13 = vld [vmem:[%s1313_s6] ss:$0 sm:$0xff] }
  0xa8   :  { %v127_v18 = vpack.c.bf16 %v123_v16, %v121_v14  ;;  %v128_v19 = vpack.c.bf16 %v124_v17, %v122_v15 }
  0xaa   :  { %340 = vmatmul.bf16.gmra.mxu2 %v127_v18  ;;  %359 = vmatmul.bf16.gmra.mxu3 %v128_v19 }
  0xab   :  { %378 = vmatmul.bf16.gmra.mxu0 %v127_v18  ;;  %397 = vmatmul.bf16.gmra.mxu1 %v128_v19 }
 0x118   :  { %v374_v31 = vpop.f32.mrf.mxu0  ;;  %v393_v32 = vpop.f32.mrf.mxu1 }
 0x119   :  { %v375_v34 = vadd.f32 %v374_v31, %v164_v33 }
 0x11b   :  { %v394_v40 = vadd.f32 %v393_v32, %v375_v34 }
 0x11d   :  { %v336_v35 = vpop.f32.mrf.mxu2  ;;  %v355_v36 = vpop.f32.mrf.mxu3  ;;  %v404_v44 = vmax.f32 %v394_v40, 0.0 }
 0x11e   :  { %v337_v42 = vadd.f32 %v336_v35, %v163_v37 }
 0x120   :  { %v376_v38 = vpop.f32.mrf.mxu0  ;;  %v395_v39 = vpop.f32.mrf.mxu1  ;;  %v356_v48 = vadd.f32 %v355_v36, %v337_v42 }
 0x121   :  { %v377_v41 = vadd.f32 %v376_v38, %v164_v33 }
 0x122   :  { %v403_v54 = vmax.f32 %v356_v48, 0.0 }
 0x123   :  { %v396_v43 = vadd.f32 %v395_v39, %v377_v41 }
 0x125   :  { %v406_v45 = vmax.f32 %v396_v43, 0.0  ;;  %v338_v46 = vpop.f32.mrf.mxu2  ;;  %v357_v47 = vpop.f32.mrf.mxu3 }
 0x126   :  { %v339_v49 = vadd.f32 %v338_v46, %v163_v37 }
 0x127   :  { %v412_v50 = vpack.c.bf16 %v406_v45, %v404_v44 }
 0x128   :  { %v358_v51 = vadd.f32 %v357_v47, %v339_v49  ;;  %v379_v52 = vpop.f32.mrf.mxu0  ;;  %v398_v53 = vpop.f32.mrf.mxu1 }
 0x129   :  { %574 = vmatmul.bf16.vlgmr.msra.gmra.mxu1 %v412_v50  ;;  %v380_v57 = vadd.f32 %v379_v52, %v164_v33 }
 0x12a   :  { %v405_v55 = vmax.f32 %v358_v51, 0.0 }
 0x12b   :  { %v399_v61 = vadd.f32 %v398_v53, %v380_v57 }
 0x12c   :  { %v411_v56 = vpack.c.bf16 %v405_v55, %v403_v54 }
 0x12d   :  { %v341_v58 = vpop.f32.mrf.mxu2  ;;  %v360_v59 = vpop.f32.mrf.mxu3  ;;  %v408_v2 = vmax.f32 %v399_v61, 0.0 }
 0x12e   :  { %555 = vmatmul.bf16.vlgmr.msra.gmra.mxu0 %v411_v56  ;;  %v342_v63 = vadd.f32 %v341_v58, %v163_v37 }
 0x130   :  { %v381_v60 = vpop.f32.mrf.mxu0  ;;  %v400_v0 = vpop.f32.mrf.mxu1  ;;  %v361_v5 = vadd.f32 %v360_v59, %v342_v63 }
 0x131   :  { %v382_v62 = vadd.f32 %v381_v60, %v164_v33 }
 0x132   :  { %v407_v10 = vmax.f32 %v361_v5, 0.0 }
 0x133   :  { %v401_v1 = vadd.f32 %v400_v0, %v382_v62 }
 0x135   :  { %v410_v3 = vmax.f32 %v401_v1, 0.0  ;;  %v343_v4 = vpop.f32.mrf.mxu2  ;;  %v362_v8 = vpop.f32.mrf.mxu3 }
 0x136   :  { %v344_v6 = vadd.f32 %v343_v4, %v163_v37 }
 0x137   :  { %v414_v7 = vpack.c.bf16 %v410_v3, %v408_v2 }
 0x138   :  { %v363_v9 = vadd.f32 %v362_v8, %v344_v6 }
 0x139   :  { %579 = vmatmul.bf16.vlgmr.msrb.gmra.mxu3 %v414_v7 }
 0x13a   :  { %v409_v11 = vmax.f32 %v363_v9, 0.0 }
 0x13c   :  { %v413_v12 = vpack.c.bf16 %v409_v11, %v407_v10 }
 0x13e   :  { %560 = vmatmul.bf16.vlgmr.msrb.gmra.mxu2 %v413_v12 }
 0x1a6   :  { %v575_v14 = vpop.f32.mrf.mxu1 }
 0x1ab   :  { %v556_v15 = vpop.f32.mrf.mxu0 }
 0x1ac   :  { %v557_v16 = vadd.f32 %v958_v13, %v556_v15 }
 0x1ae   :  { %v576_v17 = vadd.f32 %v575_v14, %v557_v16  ;;  %v577_v22 = vpop.f32.mrf.mxu1 }
 0x1b0   :  { %v886_v18 = vmul.f32 -5.0, %v576_v17 }
 0x1b2   :  { %v593_v19 = vmul.f32 1.442695, %v886_v18 }
 0x1b3   :  { %v558_v20 = vpop.f32.mrf.mxu0 }
 0x1b4   :  { %959 = vpow2.f32 %v593_v19  ;;  %v559_v21 = vadd.f32 %v958_v13, %v558_v20 }
 0x1b6   :  { %v578_v23 = vadd.f32 %v577_v22, %v559_v21 }
 0x1b8   :  { %v887_v24 = vmul.f32 -5.0, %v578_v23 }
 0x1ba   :  { %v960_v25 = vpop.eup %959  ;;  %v595_v26 = vmul.f32 1.442695, %v887_v24 }
 0x1bb   :  { %v601_v27 = vadd.f32 1.0, %v960_v25 }
 0x1bc   :  { %961 = vpow2.f32 %v595_v26  ;;  %v580_v28 = vpop.f32.mrf.mxu3 }
 0x1bd   :  { %963 = vrcp.f32 %v601_v27  ;;  %v616_v38 = vand.u32 2147483648, %v601_v27  ;;  %v614_v40 = vand.u32 2147483647, %v601_v27  ;;  %vm610_vm3 = vweird.f32 %v601_v27 }
 0x1bf   :  { %v617_v46 = vor.u32 1.1754944e-38, %v616_v38  ;;  %vm615_vm6 = vcmp.eq.f32.partialorder %v614_v40, 8.507059e+37 }
 0x1c1   :  { %v561_v29 = vpop.f32.mrf.mxu2 }
 0x1c2   :  { %v962_v30 = vpop.eup %961  ;;  %v562_v31 = vadd.f32 %v958_v13, %v561_v29 }
 0x1c3   :  { %v964_v32 = vpop.eup %963  ;;  %v602_v33 = vadd.f32 1.0, %v962_v30 }
 0x1c4   :  { %v606_v34 = vmul.f32 %v964_v32, %v601_v27  ;;  %v581_v35 = vadd.f32 %v580_v28, %v562_v31  ;;  %vm611_vm2 = vweird.f32 %v964_v32  ;;  %v582_v47 = vpop.f32.mrf.mxu3 }
 0x1c5   :  { %965 = vrcp.f32 %v602_v33  ;;  %vm612_vm4 = vmor %vm610_vm3, %vm611_vm2  ;;  %v631_v54 = vand.u32 2147483648, %v602_v33  ;;  %v629_v57 = vand.u32 2147483647, %v602_v33  ;;  %vm625_vm8 = vweird.f32 %v602_v33 }
 0x1c6   :  { %v607_v36 = vsub.f32 1.0, %v606_v34  ;;  %v888_v37 = vmul.f32 -5.0, %v581_v35 }
 0x1c7   :  { %v632_v61 = vor.u32 1.1754944e-38, %v631_v54  ;;  %vm630_vm10 = vcmp.eq.f32.partialorder %v629_v57, 8.507059e+37 }
 0x1c8   :  { %v608_v39 = vmul.f32 %v964_v32, %v607_v36  ;;  %v597_v41 = vmul.f32 1.442695, %v888_v37 }
 0x1c9   :  { %v563_v42 = vpop.f32.mrf.mxu2 }
 0x1ca   :  { %v609_v43 = vadd.f32 %v964_v32, %v608_v39  ;;  %967 = vpow2.f32 %v597_v41  ;;  %v564_v44 = vadd.f32 %v958_v13, %v563_v42 }
 0x1cb   :  { %v966_v45 = vpop.eup %965 }
 0x1cc   :  { %v613_v48 = vsel %vm612_vm4, %v964_v32, %v609_v43  ;;  %v621_v49 = vmul.f32 %v966_v45, %v602_v33  ;;  %v583_v50 = vadd.f32 %v582_v47, %v564_v44  ;;  %vm626_vm7 = vweird.f32 %v966_v45 }
 0x1cd   :  { %v618_v51 = vsel %vm615_vm6, %v617_v46, %v613_v48  ;;  %vm627_vm9 = vmor %vm625_vm8, %vm626_vm7 }
 0x1ce   :  { %666 = vst.msk [vmem:[%s1314_s7] sm:$0xff] %vm665_vm5, %v618_v51  ;;  %v622_v52 = vsub.f32 1.0, %v621_v49  ;;  %v889_v53 = vmul.f32 -5.0, %v583_v50 }
 0x1d0   :  { %v968_v55 = vpop.eup %967  ;;  %v623_v56 = vmul.f32 %v966_v45, %v622_v52  ;;  %v599_v58 = vmul.f32 1.442695, %v889_v53 }
 0x1d1   :  { %v603_v59 = vadd.f32 1.0, %v968_v55 }
 0x1d2   :  { %v624_v60 = vadd.f32 %v966_v45, %v623_v56  ;;  %969 = vpow2.f32 %v599_v58 }
 0x1d3   :  { %971 = vrcp.f32 %v603_v59  ;;  %v646_v5 = vand.u32 2147483648, %v603_v59  ;;  %v644_v7 = vand.u32 2147483647, %v603_v59  ;;  %vm640_vm12 = vweird.f32 %v603_v59 }
 0x1d4   :  { %v628_v62 = vsel %vm627_vm9, %v966_v45, %v624_v60 }
 0x1d5   :  { %v633_v63 = vsel %vm630_vm10, %v632_v61, %v628_v62  ;;  %v647_v10 = vor.u32 1.1754944e-38, %v646_v5  ;;  %vm645_vm14 = vcmp.eq.f32.partialorder %v644_v7, 8.507059e+37 }
 0x1d6   :  { %667 = vst.msk [vmem:[%s1314_s7 + $0x8] sm:$0xff] %vm665_vm5, %v633_v63 }
 0x1d8   :  { %v970_v0 = vpop.eup %969 }
 0x1d9   :  { %v972_v1 = vpop.eup %971  ;;  %v604_v2 = vadd.f32 1.0, %v970_v0 }
 0x1da   :  { %v636_v3 = vmul.f32 %v972_v1, %v603_v59  ;;  %vm641_vm11 = vweird.f32 %v972_v1 }
 0x1db   :  { %973 = vrcp.f32 %v604_v2  ;;  %vm642_vm13 = vmor %vm640_vm12, %vm641_vm11  ;;  %v661_v15 = vand.u32 2147483648, %v604_v2  ;;  %v659_v17 = vand.u32 2147483647, %v604_v2  ;;  %vm655_vm0 = vweird.f32 %v604_v2 }
 0x1dc   :  { %v637_v4 = vsub.f32 1.0, %v636_v3 }
 0x1dd   :  { %v662_v19 = vor.u32 1.1754944e-38, %v661_v15  ;;  %vm660_vm2 = vcmp.eq.f32.partialorder %v659_v17, 8.507059e+37 }
 0x1de   :  { %v638_v6 = vmul.f32 %v972_v1, %v637_v4 }
 0x1e0   :  { %v639_v8 = vadd.f32 %v972_v1, %v638_v6 }
 0x1e1   :  { %v974_v9 = vpop.eup %973 }
 0x1e2   :  { %v643_v11 = vsel %vm642_vm13, %v972_v1, %v639_v8  ;;  %v651_v12 = vmul.f32 %v974_v9, %v604_v2  ;;  %vm656_vm15 = vweird.f32 %v974_v9 }
 0x1e3   :  { %v648_v13 = vsel %vm645_vm14, %v647_v10, %v643_v11  ;;  %vm657_vm1 = vmor %vm655_vm0, %vm656_vm15 }
 0x1e4   :  { %668 = vst.msk [vmem:[%s1314_s7 + $0x10] sm:$0xff] %vm665_vm5, %v648_v13  ;;  %v652_v14 = vsub.f32 1.0, %v651_v12 }
 0x1e6   :  { %v653_v16 = vmul.f32 %v974_v9, %v652_v14 }
 0x1e8   :  { %v654_v18 = vadd.f32 %v974_v9, %v653_v16 }
 0x1ea   :  { %v658_v20 = vsel %vm657_vm1, %v974_v9, %v654_v18 }
 0x1eb   :  { %v663_v21 = vsel %vm660_vm2, %v662_v19, %v658_v20 }
 0x1ec   :  { %669 = vst.msk [vmem:[%s1314_s7 + $0x18] sm:$0xff] %vm665_vm5, %v663_v21 }

// kernel: spatial_relation_forward.3
= control target key start
LH: loop header
LB: loop body
LE: loop exit
PB: predicated region body
PF: predicated region fallthrough
CT: control target
= control target key end

     0   :  { %s5110_s27 = smov 0   ;;  %s5112_s28 = smov 0   ;;  %s7356_s0 = inlined_call_operand.vmem [shape: f32[2,16,16,5], index: 0, kind: input, shape index: {}]   ;;  %s7357_s1 = inlined_call_operand.vmem [shape: f32[2,16,256], index: 1, kind: input, shape index: {}]   ;;  %s7358_s2 = inlined_call_operand.vmem [shape: f32[2,16,256], index: 2, kind: input, shape index: {}]   ;;  %s7359_s3 = inlined_call_operand.vmem [shape: f32[5,256], index: 3, kind: input, shape index: {}]   ;;  %s7360_s4 = inlined_call_operand.vmem [shape: bf16[256,256], index: 4, kind: input, shape index: {}]   ;;  %s7361_s5 = inlined_call_operand.vmem [shape: f32[1,256], index: 5, kind: input, shape index: {}]   ;;  %s7362_s6 = inlined_call_operand.vmem [shape: bf16[256,2], index: 6, kind: input, shape index: {}]   ;;  %s7363_s7 = inlined_call_operand.vmem [shape: f32[1,2], index: 7, kind: input, shape index: {}]   ;;  %s7364_s8 = inlined_call_operand.vmem [shape: f32[2,16,16,2], index: 8, kind: output, shape index: {}]  }
   0x1   :  { %s5114_s29 = smov 0  }
   0x2 LB: > { %s37_s30 = sadd.s32 1, %s5054_s28  ;;  %p4112_p0 = scmp.ge.s32.totalorder %s5058_s29, 1  ;;  %s5058_s29 = sphi %s5114_s29, %s18_s29   ;;  %s5054_s28 = sphi %s5112_s28, %s7624_s28   ;;  %s5050_s27 = sphi %s5110_s27, %s7623_s27  }
   0x3   : > { %p39_p1 = scmp.ge.s32.totalorder %s37_s30, 2  ;;  %p336_p2 = scmp.lt.s32.totalorder %s5058_s29, 3 }
   0x5   : > { %s7626_s30 = smov (%p39_p1, %s37_s30), 0  ;;  %p337_p3 = pnand %p4112_p0, %p336_p2 }
   0x7   : > { %340 = sbr.rel (%p337_p3) target bundleno = 911 (0x38f), region = 52 }
   0xc   : > { %p410_p4 = scmp.lt.s32.totalorder %s5050_s27, 1  ;;  %v5060_v0 = vmov 0   ;;  %v7369_v49 = vmov 1   ;;  %v7367_v52 = vmov 2   ;;  %vm583_vm0 = vcmask 1044484  }
   0xd   : > { %4466 = vset.pattern.permute.xlu2 %v5060_v0  ;;  %4455 = vset.pattern.permute.xlu1 %v5060_v0  ;;  %v7365_v56 = vmov 3   ;;  %v7371_v58 = vmov 4   ;;  %vm586_vm1 = vcmask 1045509   ;;  %vm577_vm2 = vcmask 1042434  }
   0xe   : > { %4444 = vset.pattern.permute.xlu0 %v5060_v0  ;;  %s7628_s27 = smov (!%p410_p4, %s5050_s27), 1  ;;  %vm572_vm3 = vcmask 1040384   ;;  %vm580_vm4 = vcmask 1043459   ;;  %vm574_vm5 = vcmask 1041409   ;;  %vm589_vm6 = vcmask 1046534  }
   0xf   : > { %s4347_s9 = sshll.u32 %s7628_s27, 8  ;;  %s4348_s13 = sshll.u32 %s7628_s27, 5  ;;  %vm592_vm7 = vcmask 1046528   ;;  %vm3918_vm11 = vcmask 15360  }
  0x10   : > { %s5136_s12 = scalar_lea.vmem %s7356_s0, %s4347_s9  ;;  %s5261_s16 = scalar_lea.vmem %s7358_s2, %s4348_s13 }
  0x11   : > { %v470_v1 = vld [vmem:[%s5136_s12 + $0x40] sm:$0xff]  ;;  %v471_v2 = vld [vmem:[%s5136_s12 + $0x48] sm:$0xff]  ;;  %v472_v7 = vld [vmem:[%s5136_s12 + $0x50] sm:$0xff]  ;;  %s433_s19 = scalar_lea.vmem %s7357_s1, %s4348_s13  ;;  %s7111_s20 = scalar_lea.vmem %s7364_s8, %s4347_s9 }
  0x12   : > { %v5141_v3 = vld [vmem:[%s5136_s12 + $0x20] sm:$0xff]  ;;  %v5144_v4 = vld [vmem:[%s5136_s12 + $0x28] sm:$0xff]  ;;  %v473_v8 = vld [vmem:[%s5136_s12 + $0x58] sm:$0xff]  ;;  %v5154_v13 = vpack.i.bf16 %v471_v2, %v470_v1 }
  0x13   : > { %7411 = vst [vmem:[#allocation2_spill] sm:$0xff] %v5144_v4  ;;  %v462_v5 = vld [vmem:[%s5136_s12] sm:$0xff]  ;;  %v463_v6 = vld [vmem:[%s5136_s12 + $0x8] sm:$0xff]  ;;  %v468_v9 = vld [vmem:[%s5136_s12 + $0x30] sm:$0xff]  ;;  %v5158_v14 = vpack.i.bf16 %v5144_v4, %v5141_v3  ;;  %v5171_v22 = vpack.i.bf16 %v473_v8, %v472_v7 }
  0x14   : > { %v469_v10 = vld [vmem:[%s5136_s12 + $0x38] sm:$0xff]  ;;  %v464_v11 = vld [vmem:[%s5136_s12 + $0x10] sm:$0xff]  ;;  %7412 = vst [vmem:[#allocation3_spill] sm:$0xff] %v5154_v13  ;;  %v5160_v15 = vpack.i.bf16 %v463_v6, %v462_v5  ;;  %4468 = vperm.xlu2 %4466, %v5154_v13   ;;  %v478_v16 = vld [vmem:[%s5136_s12 + $0x80] sm:$0xff] }
  0x15   : > { %v465_v12 = vld [vmem:[%s5136_s12 + $0x18] sm:$0xff]  ;;  %7413 = vst [vmem:[#allocation4_spill] sm:$0xff] %v5158_v14  ;;  %4457 = vperm.xlu1 %4455, %v5158_v14   ;;  %v479_v17 = vld [vmem:[%s5136_s12 + $0x88] sm:$0xff]  ;;  %v476_v18 = vld [vmem:[%s5136_s12 + $0x70] sm:$0xff]  ;;  %v5173_v23 = vpack.i.bf16 %v469_v10, %v468_v9  ;;  %v4540_v51 = vpack.i.bf16 %v478_v16, %v5141_v3 }
  0x16   : > { %7414 = vst [vmem:[#allocation5_spill] sm:$0xff] %v5160_v15  ;;  %4446 = vperm.xlu0 %4444, %v5160_v15   ;;  %v477_v19 = vld [vmem:[%s5136_s12 + $0x78] sm:$0xff]  ;;  %v474_v20 = vld [vmem:[%s5136_s12 + $0x60] sm:$0xff]  ;;  %v475_v21 = vld [vmem:[%s5136_s12 + $0x68] sm:$0xff]  ;;  %v5175_v24 = vpack.i.bf16 %v465_v12, %v464_v11  ;;  %v4487_v31 = vpack.i.bf16 %v479_v17, %v478_v16 }
  0x17   : > { %7415 = vst [vmem:[#allocation6_spill] sm:$0xff] %v5171_v22  ;;  %v5179_v25 = vld [vmem:[%s5136_s12 + $0xb0] sm:$0xff]  ;;  %v5182_v26 = vld [vmem:[%s5136_s12 + $0xb8] sm:$0xff]  ;;  %v482_v27 = vld [vmem:[%s5136_s12 + $0xa0] sm:$0xff]  ;;  %v5192_v32 = vpack.i.bf16 %v477_v19, %v476_v18  ;;  %v5194_v33 = vpack.i.bf16 %v475_v21, %v474_v20 }
  0x18   : > { %7416 = vst [vmem:[#allocation7_spill] sm:$0xff] %v5173_v23  ;;  %v5188_v28 = vld [vmem:[%s5136_s12 + $0xa8] sm:$0xff]  ;;  %v480_v29 = vld [vmem:[%s5136_s12 + $0x90] sm:$0xff]  ;;  %v481_v30 = vld [vmem:[%s5136_s12 + $0x98] sm:$0xff]  ;;  %v5216_v40 = vpack.i.bf16 %v5182_v26, %v5179_v25 }
  0x19   : > { %7417 = vst [vmem:[#allocation8_spill] sm:$0xff] %v5175_v24  ;;  %v5197_v34 = vld [vmem:[%s5136_s12 + $0xe0] sm:$0xff]  ;;  %v5202_v35 = vld [vmem:[%s5136_s12 + $0xe8] sm:$0xff]  ;;  %v5205_v36 = vld [vmem:[%s5136_s12 + $0xd0] sm:$0xff]  ;;  %v5219_v41 = vpack.i.bf16 %v5188_v28, %v482_v27  ;;  %v4492_v42 = vpack.i.bf16 %v481_v30, %v480_v29  ;;  %v4545_v50 = vpack.i.bf16 %v480_v29, %v479_v17  ;;  %v4568_v53 = vpack.i.bf16 %v482_v27, %v481_v30 }
  0x1a   : > { %7418 = vst [vmem:[#allocation9_spill] sm:$0xff] %v5192_v32  ;;  %v5208_v37 = vld [vmem:[%s5136_s12 + $0xd8] sm:$0xff]  ;;  %v486_v38 = vld [vmem:[%s5136_s12 + $0xc0] sm:$0xff]  ;;  %v5212_v39 = vld [vmem:[%s5136_s12 + $0xc8] sm:$0xff]  ;;  %v5231_v45 = vpack.i.bf16 %v5202_v35, %v5197_v34  ;;  %v4592_v62 = vpack.i.bf16 %v5179_v25, %v5188_v28 }
  0x1b   : > { %7419 = vst [vmem:[#allocation10_spill] sm:$0xff] %v5194_v33  ;;  %v5224_v43 = vld [vmem:[%s5136_s12 + $0xf0] sm:$0xff]  ;;  %v5227_v44 = vld [vmem:[%s5136_s12 + $0xf8] sm:$0xff]  ;;  %v5235_v46 = vpack.i.bf16 %v5208_v37, %v5205_v36  ;;  %v5238_v47 = vpack.i.bf16 %v5212_v39, %v486_v38  ;;  %v5264_v54 = vld [vmem:[%s5261_s16] sm:$0xff]  ;;  %v4616_v61 = vpack.i.bf16 %v486_v38, %v5182_v26 }
  0x1c   : > { %4473 = vperm.xlu2 %4466, %v5171_v22   ;;  %7420 = vst [vmem:[#allocation11_spill] sm:$0xff] %v5227_v44  ;;  %v5245_v48 = vpack.i.bf16 %v5227_v44, %v5224_v43  ;;  %v563_v55 = vld [vmem:[%s5261_s16 + $0x8] sm:$0xff]  ;;  %v5301_v2 = vld [vmem:[%s7359_s3] sm:$0x1f]  ;;  %v5316_v8 = vld [vmem:[%s433_s19 + $0x10] sm:$0xff] }
  0x1d   : > { %4462 = vperm.xlu1 %4455, %v5173_v23   ;;  %7421 = vst [vmem:[#allocation12_spill] sm:$0xff] %v5231_v45  ;;  %v5268_v57 = vrot.slane %v563_v55, 7  ;;  %v5306_v3 = vld [vmem:[%s7359_s3 + $0x8] sm:$0x1f]  ;;  %v5310_v5 = vld [vmem:[%s433_s19] sm:$0xff]  ;;  %v565_v9 = vld [vmem:[%s5261_s16 + $0x18] sm:$0xff] }
  0x1e   : > { %4451 = vperm.xlu0 %4444, %v5175_v24   ;;  %7422 = vst [vmem:[#allocation13_spill] sm:$0xff] %v5245_v48  ;;  %v5314_v7 = vld [vmem:[%s433_s19 + $0x8] sm:$0xff]  ;;  %v5320_v10 = vld [vmem:[%s433_s19 + $0x18] sm:$0xff]  ;;  %v5323_v11 = vperm.slane %v5301_v2, 0  ;;  %v5326_v12 = vperm.slane %v5306_v3, 0  ;;  %v5331_v21 = vrot.slane %v565_v9, 7 }
  0x1f   : > { %v584_v59 = vsel %vm583_vm0, %v5264_v54, %v5268_v57  ;;  %v587_v60 = vsel %vm586_vm1, %v5264_v54, %v5268_v57  ;;  %v5295_v0 = vsel %vm577_vm2, %v5264_v54, %v5268_v57  ;;  %7423 = vst [vmem:[#allocation14_spill] sm:$0xff] %v5301_v2  ;;  %v5335_v25 = vsel %vm572_vm3, %v5264_v54, %v5268_v57  ;;  %v5339_v29 = vld [vmem:[%s5261_s16 + $0x10] sm:$0xff] }
  0x20   : > { %v585_v63 = vrot.slane %v584_v59, 4  ;;  %v588_v16 = vrot.slane %v587_v60, 5  ;;  %v595_v38 = vsel %vm572_vm3, %v5339_v29, %v5331_v21  ;;  %v600_v9 = vsel %vm580_vm4, %v5339_v29, %v5331_v21 }
  0x22   : > { %v618_v1 = vperm.slane %v585_v63, 0  ;;  %v619_v6 = vperm.slane %v585_v63, 1  ;;  %v620_v30 = vperm.slane %v588_v16, 0  ;;  %v626_v63 = vperm.slane %v595_v38, 0 }
  0x24   : > { %4488 = vperm.xlu2 %4466, %v4487_v31   ;;  %v690_v17 = vadd.f32 %v618_v1, %v5310_v5  ;;  %v691_v18 = vadd.f32 %v619_v6, %v5314_v7  ;;  %v692_v19 = vadd.f32 %v618_v1, %v5316_v8  ;;  %v693_v26 = vadd.f32 %v619_v6, %v5320_v10 }
  0x25   : > { %4483 = vperm.xlu1 %4455, %v5192_v32   ;;  %v627_v1 = vperm.slane %v595_v38, 1  ;;  %v5380_v38 = vadd.f32 %v626_v63, %v5310_v5 }
  0x26   : > { %4478 = vperm.xlu0 %4444, %v5194_v33  }
  0x2c   : > { %4503 = vperm.xlu2 %4466, %v5216_v40  }
  0x2d   : > { %4498 = vperm.xlu1 %4455, %v5219_v41  }
  0x2e   : > { %4493 = vperm.xlu0 %4444, %v4492_v42  }
  0x34   : > { %4518 = vperm.xlu2 %4466, %v5231_v45  }
  0x35   : > { %4513 = vperm.xlu1 %4455, %v5235_v46  }
  0x36   : > { %4508 = vperm.xlu0 %4444, %v5238_v47  }
  0x3c   : > { %4533 = vset.pattern.permute.xlu2 %v7369_v49 }
  0x3d   : > { %4527 = vset.pattern.permute.xlu1 %v7369_v49  ;;  %4535 = vperm.xlu2 %4533, %v5175_v24  }
  0x3e   : > { %4523 = vperm.xlu0 %4444, %v5245_v48   ;;  %4529 = vperm.xlu1 %4527, %v5160_v15  }
  0x45   : > { %4550 = vset.pattern.permute.xlu2 %v7367_v52 }
  0x46   : > { %4539 = vset.pattern.permute.xlu0 %v7369_v49  ;;  %4546 = vperm.xlu1 %4527, %v4545_v50  }
  0x47   : > { %4541 = vperm.xlu0 %4539, %v4540_v51   ;;  %4552 = vperm.xlu2 %4550, %v4487_v31  }
  0x4e   : > { %4556 = vset.pattern.permute.xlu1 %v7365_v56 }
  0x4f   : > { %4569 = vperm.xlu0 %4539, %v4568_v53   ;;  %4562 = vset.pattern.permute.xlu2 %v7371_v58 }
  0x50   : > { %4558 = vperm.xlu1 %4556, %v4487_v31   ;;  %4564 = vperm.xlu2 %4562, %v4487_v31   ;;  %v621_v31 = vperm.slane %v588_v16, 1  ;;  %v575_v16 = vsel %vm574_vm5, %v5264_v54, %v5268_v57 }
  0x52   : > { %v695_v6 = vadd.f32 %v621_v31, %v5314_v7 }
  0x57   : > { %4585 = vset.pattern.permute.xlu0 %v7371_v58 }
  0x58   : > { %4573 = vset.pattern.permute.xlu1 %v7367_v52  ;;  %4587 = vperm.xlu0 %4585, %v4492_v42  }
  0x59   : > { %4579 = vset.pattern.permute.xlu2 %v7365_v56  ;;  %4575 = vperm.xlu1 %4573, %v4492_v42  }
  0x5a   : > { %4581 = vperm.xlu2 %4579, %v4492_v42  }
  0x60   : > { %4615 = vset.pattern.permute.xlu0 %v7369_v49 }
  0x61   : > { %4591 = vset.pattern.permute.xlu1 %v7369_v49  ;;  %4617 = vperm.xlu0 %4615, %v4616_v61  }
  0x62   : > { %4597 = vset.pattern.permute.xlu2 %v7367_v52  ;;  %4593 = vperm.xlu1 %4591, %v4592_v62   ;;  %v694_v62 = vadd.f32 %v620_v30, %v5310_v5 }
  0x63   : > { %4599 = vperm.xlu2 %4597, %v5219_v41  }
  0x69   : > { %4645 = vset.pattern.permute.xlu0 %v7367_v52 }
  0x6a   : > { %4603 = vset.pattern.permute.xlu1 %v7365_v56  ;;  %4647 = vperm.xlu0 %4645, %v5238_v47  }
  0x6b   : > { %4609 = vset.pattern.permute.xlu2 %v7371_v58  ;;  %4605 = vperm.xlu1 %4603, %v5219_v41  }
  0x6c   : > { %4611 = vperm.xlu2 %4609, %v5219_v41   ;;  %v5346_v41 = vsel %vm580_vm4, %v5264_v54, %v5268_v57 }
  0x6e   : > { %v4469_v20 = vpop.permute.xlu2 %4468 }
  0x6f   : > { %v4471_v27 = vunpack.i.h.bf16 %v4469_v20  ;;  %v4470_v28 = vunpack.i.l.bf16 %v4469_v20  ;;  %v579_v20 = vrot.slane %v5295_v0, 2 }
  0x71   : > { %v920_v42 = vmul.f32 %v4471_v27, %v5323_v11  ;;  %v921_v50 = vmul.f32 %v4471_v27, %v5326_v12  ;;  %v918_v51 = vmul.f32 %v4470_v28, %v5323_v11  ;;  %v919_v53 = vmul.f32 %v4470_v28, %v5326_v12 }
  0x72   : > { %4675 = vset.pattern.permute.xlu0 %v7365_v56  ;;  %v4640_v28 = vpack.i.bf16 %v5205_v36, %v5212_v39  ;;  %v614_v36 = vperm.slane %v579_v20, 0  ;;  %v615_v39 = vperm.slane %v579_v20, 1  ;;  %v582_v20 = vrot.slane %v5346_v41, 3 }
  0x73   : > { %v5353_v55 = vadd.f32 %v920_v42, %v692_v19  ;;  %v5355_v59 = vadd.f32 %v921_v50, %v693_v26  ;;  %v5357_v60 = vadd.f32 %v918_v51, %v690_v17  ;;  %v5359_v61 = vadd.f32 %v919_v53, %v691_v18  ;;  %4621 = vset.pattern.permute.xlu1 %v7367_v52 }
  0x74   : > { %4677 = vperm.xlu0 %4675, %v5235_v46   ;;  %4627 = vset.pattern.permute.xlu2 %v7365_v56  ;;  %v696_v17 = vadd.f32 %v620_v30, %v5316_v8  ;;  %v697_v18 = vadd.f32 %v621_v31, %v5320_v10  ;;  %v5383_v42 = vadd.f32 %v627_v1, %v5314_v7  ;;  %v601_v50 = vrot.slane %v600_v9, 3 }
  0x75   : > { %7424 = vst [vmem:[#allocation15_spill] sm:$0xff] %v5353_v55  ;;  %4623 = vperm.xlu1 %4621, %v5216_v40   ;;  %4629 = vperm.xlu2 %4627, %v5216_v40   ;;  %v5390_v53 = vadd.f32 %v626_v63, %v5316_v8  ;;  %v7441_v55 = vmov 4  }
  0x76   : > { %7425 = vst [vmem:[#allocation16_spill] sm:$0xff] %v5355_v59  ;;  %v4474_v19 = vpop.permute.xlu2 %4473  ;;  %v632_v63 = vperm.slane %v601_v50, 0  ;;  %v5476_v59 = vperm.slane %v5301_v2, 1 }
  0x77   : > { %7426 = vst [vmem:[#allocation17_spill] sm:$0xff] %v5357_v60  ;;  %v4476_v26 = vunpack.i.h.bf16 %v4474_v19  ;;  %v4475_v27 = vunpack.i.l.bf16 %v4474_v19  ;;  %v606_v19 = vsel %vm589_vm6, %v5339_v29, %v5331_v21 }
  0x78   : > { %7427 = vst [vmem:[#allocation18_spill] sm:$0xff] %v5359_v61 }
  0x79   : > { %7428 = vst [vmem:[#allocation19_spill] sm:$0xff] %v5383_v42  ;;  %v924_v30 = vmul.f32 %v4476_v26, %v5323_v11  ;;  %v925_v31 = vmul.f32 %v4476_v26, %v5326_v12  ;;  %v922_v51 = vmul.f32 %v4475_v27, %v5323_v11  ;;  %v923_v0 = vmul.f32 %v4475_v27, %v5326_v12 }
  0x7a   : > { %v5405_v27 = vadd.f32 %v627_v1, %v5320_v10  ;;  %v682_v1 = vadd.f32 %v614_v36, %v5310_v5 }
  0x7b   : > { %v5395_v56 = vadd.f32 %v924_v30, %v696_v17  ;;  %v5397_v9 = vadd.f32 %v925_v31, %v697_v18  ;;  %v5399_v52 = vadd.f32 %v922_v51, %v694_v62  ;;  %v5401_v26 = vadd.f32 %v923_v0, %v695_v6 }
  0x7c   : > { %4705 = vset.pattern.permute.xlu0 %v7371_v58  ;;  %v633_v17 = vperm.slane %v601_v50, 1  ;;  %v607_v18 = vrot.slane %v606_v19, 6  ;;  %v593_v62 = vsel %vm592_vm7, %v5268_v57, %v5264_v54  ;;  %v5416_v6 = vsel %vm589_vm6, %v5264_v54, %v5268_v57 }
  0x7d   : > { %7429 = vst [vmem:[#allocation20_spill] sm:$0xff] %v5395_v56  ;;  %4633 = vset.pattern.permute.xlu1 %v7371_v58  ;;  %4707 = vperm.xlu0 %4705, %v5231_v45   ;;  %v683_v50 = vadd.f32 %v615_v39, %v5314_v7  ;;  %v684_v30 = vadd.f32 %v614_v36, %v5316_v8  ;;  %v610_v31 = vperm.slane %v5335_v25, 0  ;;  %v576_v51 = vrot.slane %v575_v16, 1 }
  0x7e   : > { %7430 = vst [vmem:[#allocation21_spill] sm:$0xff] %v5397_v9  ;;  %4639 = vset.pattern.permute.xlu2 %v7369_v49  ;;  %4635 = vperm.xlu1 %4633, %v5216_v40   ;;  %v5420_v41 = vpop.permute.xlu2 %4488  ;;  %v5427_v0 = vadd.f32 %v632_v63, %v5310_v5  ;;  %v685_v54 = vadd.f32 %v615_v39, %v5320_v10  ;;  %v611_v57 = vperm.slane %v5335_v25, 1  ;;  %v616_v40 = vperm.slane %v582_v20, 0 }
  0x7f   : > { %7431 = vst [vmem:[#allocation22_spill] sm:$0xff] %v5399_v52  ;;  %4641 = vperm.xlu2 %4639, %v4640_v28   ;;  %v5432_v19 = vadd.f32 %v633_v17, %v5314_v7  ;;  %v5435_v28 = vadd.f32 %v632_v63, %v5316_v8  ;;  %v5437_v49 = vperm.slane %v607_v18, 0  ;;  %v617_v36 = vperm.slane %v582_v20, 1 }
  0x80   : > { %7432 = vst [vmem:[#allocation23_spill] sm:$0xff] %v5401_v26  ;;  %v5440_v58 = vadd.f32 %v633_v17, %v5320_v10  ;;  %v5444_v26 = vperm.slane %v607_v18, 1  ;;  %v674_v25 = vadd.f32 %v610_v31, %v5310_v5  ;;  %v612_v39 = vperm.slane %v576_v51, 0 }
  0x81   : > { %7433 = vst [vmem:[#allocation24_spill] sm:$0xff] %v5427_v0  ;;  %v613_v52 = vperm.slane %v576_v51, 1  ;;  %v675_v9 = vadd.f32 %v611_v57, %v5314_v7  ;;  %v676_v63 = vadd.f32 %v610_v31, %v5316_v8  ;;  %v677_v56 = vadd.f32 %v611_v57, %v5320_v10 }
  0x82   : > { %7434 = vst [vmem:[#allocation25_spill] sm:$0xff] %v5432_v19  ;;  %v5451_v20 = vadd.f32 %v616_v40, %v5310_v5  ;;  %v7437_v17 = vmov 2   ;;  %v5456_v16 = vadd.f32 %v5437_v49, %v5310_v5  ;;  %v5459_v18 = vadd.f32 %v617_v36, %v5314_v7 }
  0x83   : > { %7435 = vst [vmem:[#allocation26_spill] sm:$0xff] %v5435_v28  ;;  %v5462_v51 = vadd.f32 %v616_v40, %v5316_v8  ;;  %v5465_v61 = vadd.f32 %v617_v36, %v5320_v10  ;;  %v7439_v31 = vmov 3   ;;  %v5473_v60 = vadd.f32 %v5444_v26, %v5314_v7 }
  0x84   : > { %7436 = vst [vmem:[#allocation27_spill] sm:$0xff] %v5440_v58  ;;  %v5481_v33 = vadd.f32 %v612_v39, %v5310_v5  ;;  %v5484_v14 = vadd.f32 %v613_v52, %v5314_v7  ;;  %v594_v32 = vrot.slane %v593_v62, 7  ;;  %v4491_v48 = vunpack.i.h.bf16 %v5420_v41 }
  0x85   : > { %4735 = vset.pattern.permute.xlu0 %v7437_v17  ;;  %7438 = vst [vmem:[#allocation28_spill] sm:$0xff] %v5456_v16  ;;  %v4490_v2 = vunpack.i.l.bf16 %v5420_v41  ;;  %v5493_v16 = vadd.f32 %v613_v52, %v5320_v10  ;;  %v591_v45 = vrot.slane %v5416_v6, 6 }
  0x86   : > { %4651 = vset.pattern.permute.xlu1 %v7439_v31  ;;  %4737 = vperm.xlu0 %4735, %v5160_v15   ;;  %v5469_v57 = vpop.permute.xlu2 %4503  ;;  %7440 = vst [vmem:[#allocation29_spill] sm:$0xff] %v5473_v60  ;;  %v5487_v15 = vadd.f32 %v612_v39, %v5316_v8  ;;  %v624_v41 = vperm.slane %v594_v32, 0  ;;  %v625_v58 = vperm.slane %v594_v32, 1 }
  0x87   : > { %4657 = vset.pattern.permute.xlu2 %v7441_v55  ;;  %4653 = vperm.xlu1 %4651, %v5238_v47   ;;  %v4458_v40 = vpop.permute.xlu1 %4457 }
  0x88   : > { %v4447_v36 = vpop.permute.xlu0 %4446  ;;  %4659 = vperm.xlu2 %4657, %v5238_v47   ;;  %v4460_v22 = vunpack.i.h.bf16 %v4458_v40  ;;  %v4459_v4 = vunpack.i.l.bf16 %v4458_v40  ;;  %v5503_v40 = vperm.slane %v5306_v3, 1  ;;  %v5518_v47 = vmul.f32 %v4491_v48, %v5323_v11 }
  0x89   : > { %v4449_v44 = vunpack.i.h.bf16 %v4447_v36  ;;  %v4448_v60 = vunpack.i.l.bf16 %v4447_v36 }
  0x8a   : > { %v912_v19 = vmul.f32 %v4460_v22, %v5323_v11  ;;  %v913_v39 = vmul.f32 %v4460_v22, %v5326_v12  ;;  %v910_v62 = vmul.f32 %v4459_v4, %v5323_v11  ;;  %v911_v0 = vmul.f32 %v4459_v4, %v5326_v12 }
  0x8b   : > { %v904_v22 = vmul.f32 %v4449_v44, %v5323_v11  ;;  %v905_v4 = vmul.f32 %v4449_v44, %v5326_v12  ;;  %v902_v32 = vmul.f32 %v4448_v60, %v5323_v11  ;;  %v903_v42 = vmul.f32 %v4448_v60, %v5326_v12 }
  0x8c   : > { %v5505_v52 = vadd.f32 %v912_v19, %v684_v30  ;;  %v5507_v36 = vadd.f32 %v913_v39, %v685_v54  ;;  %v5509_v6 = vadd.f32 %v910_v62, %v682_v1  ;;  %v5511_v28 = vadd.f32 %v911_v0, %v683_v50 }
  0x8d   : > { %v5521_v30 = vmul.f32 %v4491_v48, %v5326_v12  ;;  %v5524_v54 = vmul.f32 %v4490_v2, %v5323_v11  ;;  %v5527_v1 = vmul.f32 %v4490_v2, %v5326_v12  ;;  %v5532_v44 = vadd.f32 %v904_v22, %v676_v63 }
  0x8e   : > { %7442 = vst [vmem:[#allocation30_spill] sm:$0xff] %v5505_v52  ;;  %4763 = vset.pattern.permute.xlu0 %v7441_v55  ;;  %v5530_v50 = vpop.permute.xlu2 %4518  ;;  %v5534_v0 = vadd.f32 %v905_v4, %v677_v56  ;;  %v5536_v60 = vadd.f32 %v902_v32, %v674_v25  ;;  %v5538_v19 = vadd.f32 %v903_v42, %v675_v9  ;;  %v7449_v48 = vmov 1  }
  0x8f   : > { %7443 = vst [vmem:[#allocation31_spill] sm:$0xff] %v5507_v36  ;;  %4663 = vset.pattern.permute.xlu1 %v7449_v48  ;;  %v4463_v39 = vpop.permute.xlu1 %4462  ;;  %4765 = vperm.xlu0 %4763, %v5175_v24   ;;  %v702_v52 = vadd.f32 %v624_v41, %v5310_v5  ;;  %v703_v63 = vadd.f32 %v625_v58, %v5314_v7  ;;  %v622_v25 = vperm.slane %v591_v45, 0 }
  0x90   : > { %7444 = vst [vmem:[#allocation32_spill] sm:$0xff] %v5509_v6  ;;  %v4452_v62 = vpop.permute.xlu0 %4451  ;;  %4669 = vset.pattern.permute.xlu2 %v7437_v17  ;;  %v4465_v2 = vunpack.i.h.bf16 %v4463_v39  ;;  %v4464_v36 = vunpack.i.l.bf16 %v4463_v39  ;;  %v7450_v56 = vpack.i.bf16 %v5197_v34, %v5208_v37  ;;  %v704_v42 = vadd.f32 %v624_v41, %v5316_v8 }
  0x91   : > { %7445 = vst [vmem:[#allocation33_spill] sm:$0xff] %v5511_v28  ;;  %4671 = vperm.xlu2 %4669, %v5235_v46   ;;  %v705_v9 = vadd.f32 %v625_v58, %v5320_v10  ;;  %v5554_v22 = vsel %vm577_vm2, %v5339_v29, %v5331_v21  ;;  %v4454_v4 = vunpack.i.h.bf16 %v4452_v62  ;;  %v4453_v32 = vunpack.i.l.bf16 %v4452_v62 }
  0x92   : > { %7446 = vst [vmem:[#allocation34_spill] sm:$0xff] %v5532_v44  ;;  %4665 = vperm.xlu1 %4663, %v7450_v56   ;;  %v623_v39 = vperm.slane %v591_v45, 1  ;;  %v916_v24 = vmul.f32 %v4465_v2, %v5323_v11  ;;  %v917_v34 = vmul.f32 %v4465_v2, %v5326_v12  ;;  %v914_v37 = vmul.f32 %v4464_v36, %v5323_v11 }
  0x93   : > { %7447 = vst [vmem:[#allocation35_spill] sm:$0xff] %v5534_v0  ;;  %v915_v56 = vmul.f32 %v4464_v36, %v5326_v12  ;;  %v4506_v41 = vunpack.i.h.bf16 %v5469_v57  ;;  %v5565_v28 = vsel %vm574_vm5, %v5339_v29, %v5331_v21  ;;  %v908_v6 = vmul.f32 %v4454_v4, %v5323_v11 }
  0x94   : > { %7448 = vst [vmem:[#allocation36_spill] sm:$0xff] %v5538_v19  ;;  %v5568_v62 = vadd.f32 %v916_v24, %v5462_v51  ;;  %v5571_v45 = vadd.f32 %v917_v34, %v5465_v61  ;;  %v5574_v2 = vadd.f32 %v914_v37, %v5451_v20  ;;  %v909_v58 = vmul.f32 %v4454_v4, %v5326_v12 }
  0x95   : > { %v5577_v36 = vadd.f32 %v915_v56, %v5459_v18  ;;  %v906_v0 = vmul.f32 %v4453_v32, %v5323_v11  ;;  %v907_v44 = vmul.f32 %v4453_v32, %v5326_v12  ;;  %v4505_v24 = vunpack.i.l.bf16 %v5469_v57 }
  0x96   : > { %7451 = vst [vmem:[#allocation37_spill] sm:$0xff] %v5568_v62  ;;  %v698_v61 = vadd.f32 %v622_v25, %v5310_v5  ;;  %v699_v34 = vadd.f32 %v623_v39, %v5314_v7  ;;  %v700_v20 = vadd.f32 %v622_v25, %v5316_v8  ;;  %v972_v18 = vadd.f32 %v908_v6, %v5487_v15 }
  0x97   : > { %7452 = vst [vmem:[#allocation38_spill] sm:$0xff] %v5571_v45  ;;  %v4484_v51 = vpop.permute.xlu1 %4483  ;;  %v973_v56 = vadd.f32 %v909_v58, %v5493_v16  ;;  %v970_v4 = vadd.f32 %v906_v0, %v5481_v33  ;;  %v971_v45 = vadd.f32 %v907_v44, %v5484_v14  ;;  %4791 = vset.pattern.permute.xlu0 %v7437_v17  ;;  %v4536_v32 = vpop.permute.xlu2 %4535 }
  0x98   : > { %7453 = vst [vmem:[#allocation39_spill] sm:$0xff] %v5574_v2  ;;  %v4479_v37 = vpop.permute.xlu0 %4478  ;;  %4793 = vperm.xlu0 %4791, %v5173_v23   ;;  %v4486_v57 = vunpack.i.h.bf16 %v4484_v51  ;;  %v4485_v62 = vunpack.i.l.bf16 %v4484_v51  ;;  %v948_v2 = vmul.f32 %v4506_v41, %v5323_v11  ;;  %v701_v15 = vadd.f32 %v623_v39, %v5320_v10 }
  0x99   : > { %7454 = vst [vmem:[#allocation40_spill] sm:$0xff] %v5577_v36  ;;  %v4481_v36 = vunpack.i.h.bf16 %v4479_v37  ;;  %v4480_v25 = vunpack.i.l.bf16 %v4479_v37  ;;  %4687 = vset.pattern.permute.xlu2 %v7449_v48  ;;  %v4538_v14 = vunpack.i.h.bf16 %v4536_v32  ;;  %v4537_v33 = vunpack.i.l.bf16 %v4536_v32 }
  0x9a   : > { %4681 = vset.pattern.permute.xlu1 %v7441_v55  ;;  %v932_v16 = vmul.f32 %v4486_v57, %v5323_v11  ;;  %v933_v6 = vmul.f32 %v4486_v57, %v5326_v12  ;;  %v930_v44 = vmul.f32 %v4485_v62, %v5323_v11  ;;  %v931_v0 = vmul.f32 %v4485_v62, %v5326_v12 }
  0x9b   : > { %4683 = vperm.xlu1 %4681, %v5235_v46   ;;  %v7455_v58 = vpack.i.bf16 %v5224_v43, %v5202_v35  ;;  %v928_v51 = vmul.f32 %v4481_v36, %v5323_v11  ;;  %v929_v46 = vmul.f32 %v4481_v36, %v5326_v12  ;;  %v926_v39 = vmul.f32 %v4480_v25, %v5323_v11 }
  0x9c   : > { %v927_v37 = vmul.f32 %v4480_v25, %v5326_v12  ;;  %v5609_v32 = vadd.f32 %v932_v16, %v704_v42  ;;  %v5611_v23 = vadd.f32 %v933_v6, %v705_v9  ;;  %v5613_v57 = vadd.f32 %v930_v44, %v702_v52 }
  0x9d   : > { %4689 = vperm.xlu2 %4687, %v7455_v58   ;;  %v5615_v19 = vadd.f32 %v931_v0, %v703_v63  ;;  %v5617_v62 = vadd.f32 %v928_v51, %v700_v20  ;;  %v5619_v35 = vadd.f32 %v929_v46, %v701_v15  ;;  %v5621_v43 = vadd.f32 %v926_v39, %v698_v61 }
  0x9e   : > { %7456 = vst [vmem:[#allocation41_spill] sm:$0xff] %v5609_v32  ;;  %v5623_v58 = vadd.f32 %v927_v37, %v699_v34  ;;  %v1166_v36 = vmul.f32 %v4538_v14, %v5476_v59  ;;  %v1167_v25 = vmul.f32 %v4538_v14, %v5503_v40  ;;  %v1164_v42 = vmul.f32 %v4537_v33, %v5476_v59 }
  0x9f   : > { %7457 = vst [vmem:[#allocation42_spill] sm:$0xff] %v5611_v23  ;;  %v1165_v9 = vmul.f32 %v4537_v33, %v5503_v40  ;;  %v4499_v52 = vpop.permute.xlu1 %4498  ;;  %v949_v63 = vmul.f32 %v4506_v41, %v5326_v12  ;;  %v946_v20 = vmul.f32 %v4505_v24, %v5323_v11  ;;  %v947_v61 = vmul.f32 %v4505_v24, %v5326_v12 }
  0xa0   : > { %7458 = vst [vmem:[#allocation43_spill] sm:$0xff] %v5613_v57  ;;  %v5629_v16 = vpop.permute.xlu0 %4493  ;;  %v4521_v34 = vunpack.i.h.bf16 %v5530_v50  ;;  %v5635_v15 = vadd.f32 %v1164_v42, %v970_v4  ;;  %v5639_v14 = vadd.f32 %v1166_v36, %v972_v18  ;;  %v5641_v44 = vadd.f32 %v1167_v25, %v973_v56  ;;  %4821 = vset.pattern.permute.xlu0 %v7439_v31 }
  0xa1   : > { %7459 = vst [vmem:[#allocation44_spill] sm:$0xff] %v5615_v19  ;;  %v5637_v6 = vadd.f32 %v1165_v9, %v971_v45  ;;  %v732_v33 = vadd.f32 %v5437_v49, %v5316_v8  ;;  %v4520_v41 = vunpack.i.l.bf16 %v5530_v50  ;;  %v7468_v0 = vrot.slane %v5554_v22, 2  ;;  %4823 = vperm.xlu0 %4821, %v5154_v13   ;;  %v7473_v22 = vld [vmem:[#allocation27_spill] sm:$0xff]  ;;  %v7484_v19 = vld [vmem:[#allocation29_spill] sm:$0xff] }
  0xa2   : > { %7460 = vst [vmem:[#allocation45_spill] sm:$0xff] %v5617_v62  ;;  %v5652_v45 = vadd.f32 %v5518_v47, %v5390_v53  ;;  %v733_v18 = vadd.f32 %v5444_v26, %v5320_v10  ;;  %v597_v49 = vrot.slane %v5565_v28, 1  ;;  %v5662_v50 = vadd.f32 %v5521_v30, %v5405_v27  ;;  %v7470_v53 = vld [vmem:[#allocation19_spill] sm:$0xff]  ;;  %v7471_v26 = vld [vmem:[#allocation26_spill] sm:$0xff]  ;;  %v7475_v28 = vld [vmem:[#allocation24_spill] sm:$0xff] }
  0xa3   : > { %7461 = vst [vmem:[#allocation46_spill] sm:$0xff] %v5619_v35  ;;  %v630_v24 = vperm.slane %v7468_v0, 0  ;;  %4693 = vset.pattern.permute.xlu1 %v7437_v17  ;;  %v7469_v56 = vmov %v7468_v0  ;;  %v5666_v51 = vadd.f32 %v5524_v54, %v5380_v38  ;;  %v5670_v47 = vadd.f32 %v5527_v1, %v7470_v53  ;;  %v7477_v27 = vld [vmem:[#allocation25_spill] sm:$0xff]  ;;  %v7479_v54 = vld [vmem:[#allocation12_spill] sm:$0xff] }
  0xa4   : > { %7462 = vst [vmem:[#allocation47_spill] sm:$0xff] %v5621_v43  ;;  %v631_v4 = vperm.slane %v7469_v56, 1  ;;  %v5673_v46 = vadd.f32 %v948_v2, %v7471_v26  ;;  %v5677_v39 = vadd.f32 %v949_v63, %v7473_v22  ;;  %v5680_v37 = vadd.f32 %v946_v20, %v7475_v28  ;;  %4695 = vperm.xlu1 %4693, %v7479_v54  }
  0xa5   : > { %7463 = vst [vmem:[#allocation48_spill] sm:$0xff] %v5623_v58  ;;  %4699 = vset.pattern.permute.xlu2 %v7439_v31  ;;  %v5683_v30 = vadd.f32 %v947_v61, %v7477_v27  ;;  %v960_v38 = vmul.f32 %v4521_v34, %v5323_v11  ;;  %v961_v1 = vmul.f32 %v4521_v34, %v5326_v12  ;;  %v4501_v63 = vunpack.i.h.bf16 %v4499_v52  ;;  %v7482_v27 = vld [vmem:[#allocation28_spill] sm:$0xff] }
  0xa6   : > { %7464 = vst [vmem:[#allocation49_spill] sm:$0xff] %v5635_v15  ;;  %v958_v2 = vmul.f32 %v4520_v41, %v5323_v11  ;;  %v959_v36 = vmul.f32 %v4520_v41, %v5326_v12  ;;  %v714_v25 = vadd.f32 %v630_v24, %v5310_v5  ;;  %4701 = vperm.xlu2 %4699, %v7479_v54   ;;  %v628_v20 = vperm.slane %v597_v49, 0 }
  0xa7   : > { %7465 = vst [vmem:[#allocation50_spill] sm:$0xff] %v5637_v6  ;;  %v715_v42 = vadd.f32 %v631_v4, %v5314_v7  ;;  %v716_v9 = vadd.f32 %v630_v24, %v5316_v8  ;;  %v5694_v61 = vpop.permute.xlu1 %4513  ;;  %v717_v34 = vadd.f32 %v631_v4, %v5320_v10  ;;  %v4500_v56 = vunpack.i.l.bf16 %v4499_v52  ;;  %v7486_v52 = vld [vmem:[#allocation11_spill] sm:$0xff]  ;;  %v7487_v4 = vld [vmem:[#allocation2_spill] sm:$0xff] }
  0xa8   : > { %7466 = vst [vmem:[#allocation51_spill] sm:$0xff] %v5639_v14  ;;  %v5696_v0 = vpop.permute.xlu0 %4508  ;;  %v604_v41 = vsel %vm586_vm1, %v5339_v29, %v5331_v21  ;;  %v5702_v53 = vadd.f32 %v960_v38, %v732_v33  ;;  %v629_v26 = vperm.slane %v597_v49, 1  ;;  %v4496_v22 = vunpack.i.h.bf16 %v5629_v16 }
  0xa9   : > { %7467 = vst [vmem:[#allocation52_spill] sm:$0xff] %v5641_v44  ;;  %v4495_v24 = vunpack.i.l.bf16 %v5629_v16  ;;  %v5706_v28 = vadd.f32 %v961_v1, %v733_v18  ;;  %v5709_v54 = vadd.f32 %v958_v2, %v7482_v27  ;;  %v5712_v57 = vadd.f32 %v959_v36, %v7484_v19  ;;  %4851 = vset.pattern.permute.xlu0 %v7441_v55  ;;  %v4553_v19 = vpop.permute.xlu2 %4552  ;;  %v7488_v2 = vld [vmem:[#allocation6_spill] sm:$0xff]  ;;  %v7491_v44 = vld [vmem:[#allocation13_spill] sm:$0xff] }
  0xaa   : > { %7472 = vst [vmem:[#allocation19_spill] sm:$0xff] %v5673_v46  ;;  %v4712_v23 = vpack.i.bf16 %v7487_v4, %v7486_v52  ;;  %v944_v32 = vmul.f32 %v4501_v63, %v5323_v11  ;;  %v710_v33 = vadd.f32 %v628_v20, %v5310_v5  ;;  %v712_v49 = vadd.f32 %v628_v20, %v5316_v8  ;;  %v7489_v4 = vld [vmem:[#allocation14_spill] sm:$0xff] }
  0xab   : > { %7474 = vst [vmem:[#allocation26_spill] sm:$0xff] %v5677_v39  ;;  %v605_v38 = vrot.slane %v604_v41, 5  ;;  %v945_v16 = vmul.f32 %v4501_v63, %v5326_v12  ;;  %v942_v18 = vmul.f32 %v4500_v56, %v5323_v11  ;;  %v943_v1 = vmul.f32 %v4500_v56, %v5326_v12  ;;  %4853 = vperm.xlu0 %4851, %v7488_v2   ;;  %v4171_v46 = vld [vmem:[%s7360_s4 + $0x60] sm:$0xf] }
  0xac   : > { %7476 = vst [vmem:[#allocation27_spill] sm:$0xff] %v5680_v37  ;;  %v713_v36 = vadd.f32 %v629_v26, %v5320_v10  ;;  %v940_v27 = vmul.f32 %v4496_v22, %v5323_v11  ;;  %v941_v52 = vmul.f32 %v4496_v22, %v5326_v12  ;;  %v938_v20 = vmul.f32 %v4495_v24, %v5323_v11  ;;  %v7504_v37 = vld [vmem:[#allocation35_spill] sm:$0xff] }
  0xad   : > { %7478 = vst [vmem:[#allocation24_spill] sm:$0xff] %v5683_v30  ;;  %4711 = vset.pattern.permute.xlu1 %v7449_v48  ;;  %v711_v41 = vadd.f32 %v629_v26, %v5314_v7  ;;  %v939_v63 = vmul.f32 %v4495_v24, %v5326_v12  ;;  %v5732_v35 = vperm.slane %v7489_v4, 2  ;;  %v4555_v56 = vunpack.i.h.bf16 %v4553_v19 }
  0xae   : > { %7480 = vst [vmem:[#allocation25_spill] sm:$0xff] %v5702_v53  ;;  %4717 = vset.pattern.permute.xlu2 %v7437_v17  ;;  %4713 = vperm.xlu1 %4711, %v4712_v23   ;;  %v5735_v62 = vadd.f32 %v944_v32, %v716_v9  ;;  %v636_v58 = vperm.slane %v605_v38, 0  ;;  %v5738_v22 = vperm.slane %v5306_v3, 2  ;;  %v4554_v43 = vunpack.i.l.bf16 %v4553_v19 }
  0xaf   : > { %7481 = vst [vmem:[#allocation12_spill] sm:$0xff] %v5706_v28  ;;  %4719 = vperm.xlu2 %4717, %v7491_v44   ;;  %v5741_v14 = vadd.f32 %v945_v16, %v717_v34  ;;  %v5743_v26 = vadd.f32 %v942_v18, %v714_v25  ;;  %v5745_v24 = vadd.f32 %v943_v1, %v715_v42  ;;  %v637_v6 = vperm.slane %v605_v38, 1  ;;  %v7498_v28 = vld [vmem:[#allocation9_spill] sm:$0xff] }
  0xb0   : > { %7483 = vst [vmem:[#allocation28_spill] sm:$0xff] %v5709_v54  ;;  %v4530_v15 = vpop.permute.xlu1 %4529  ;;  %v5749_v23 = vadd.f32 %v941_v52, %v713_v36  ;;  %v5751_v32 = vadd.f32 %v938_v20, %v710_v33  ;;  %v602_v9 = vsel %vm583_vm0, %v5339_v29, %v5331_v21  ;;  %v5756_v19 = vpop.permute.xlu0 %4523  ;;  %v5758_v34 = vadd.f32 %v939_v63, %v711_v41 }
  0xb1   : > { %7485 = vst [vmem:[#allocation29_spill] sm:$0xff] %v5712_v57  ;;  %v5747_v57 = vadd.f32 %v940_v27, %v712_v49  ;;  %v4516_v25 = vunpack.i.h.bf16 %v5694_v61  ;;  %v4515_v42 = vunpack.i.l.bf16 %v5694_v61  ;;  %v5763_v38 = vmul.f32 %v4555_v56, %v5732_v35  ;;  %v5782_v54 = vpop.permute.xlu2 %4564 }
  0xb2   : > { %7490 = vst [vmem:[#allocation11_spill] sm:$0xff] %v5735_v62  ;;  %v726_v49 = vadd.f32 %v636_v58, %v5310_v5  ;;  %v5767_v33 = vmul.f32 %v4555_v56, %v5738_v22  ;;  %v5770_v16 = vmul.f32 %v4554_v43, %v5732_v35  ;;  %v5773_v18 = vmul.f32 %v4554_v43, %v5738_v22 }
  0xb3   : > { %7492 = vst [vmem:[#allocation2_spill] sm:$0xff] %v5741_v14  ;;  %v727_v1 = vadd.f32 %v637_v6, %v5314_v7  ;;  %v728_v36 = vadd.f32 %v636_v58, %v5316_v8  ;;  %v729_v61 = vadd.f32 %v637_v6, %v5320_v10  ;;  %v603_v27 = vrot.slane %v602_v9, 4  ;;  %4881 = vset.pattern.permute.xlu0 %v7449_v48 }
  0xb4   : > { %7493 = vst [vmem:[#allocation14_spill] sm:$0xff] %v5743_v26  ;;  %v4532_v52 = vunpack.i.h.bf16 %v4530_v15  ;;  %v4531_v20 = vunpack.i.l.bf16 %v4530_v15  ;;  %v956_v41 = vmul.f32 %v4516_v25, %v5323_v11  ;;  %v957_v63 = vmul.f32 %v4516_v25, %v5326_v12  ;;  %4883 = vperm.xlu0 %4881, %v7498_v28   ;;  %v4179_v25 = vld [vmem:[%s7360_s4 + $0x70] sm:$0xf]  ;;  %v4382_v28 = vld [vmem:[%s7360_s4 + $0xf4] sm:$0xf0] }
  0xb5   : > { %7494 = vst [vmem:[#allocation13_spill] sm:$0xff] %v5745_v24  ;;  %v954_v56 = vmul.f32 %v4515_v42, %v5323_v11  ;;  %v608_v43 = vsel %vm592_vm7, %v5331_v21, %v5339_v29  ;;  %v4366_v21 = vld [vmem:[%s7360_s4 + $0x74] sm:$0xf0]  ;;  %v955_v29 = vmul.f32 %v4515_v42, %v5326_v12  ;;  %v634_v53 = vperm.slane %v603_v27, 0  ;;  %v7500_v42 = vld [vmem:[#allocation36_spill] sm:$0xff] }
  0xb6   : > { %7495 = vst [vmem:[#allocation53_spill] sm:$0xff] %v5747_v57  ;;  %4723 = vset.pattern.permute.xlu1 %v7439_v31  ;;  %v1162_v58 = vmul.f32 %v4532_v52, %v5476_v59  ;;  %v1163_v6 = vmul.f32 %v4532_v52, %v5503_v40  ;;  %v1160_v15 = vmul.f32 %v4531_v20, %v5476_v59  ;;  %v635_v2 = vperm.slane %v603_v27, 1  ;;  %v7502_v27 = vld [vmem:[#allocation34_spill] sm:$0xff]  ;;  %v7515_v57 = vld [vmem:[#allocation33_spill] sm:$0xff] }
  0xb7   : > { %7496 = vst [vmem:[#allocation54_spill] sm:$0xff] %v5749_v23  ;;  %v1161_v9 = vmul.f32 %v4531_v20, %v5503_v40  ;;  %v4511_v52 = vunpack.i.h.bf16 %v5696_v0  ;;  %4729 = vset.pattern.permute.xlu2 %v7441_v55  ;;  %v4243_v20 = vld [vmem:[%s7360_s4 + $0xf0] sm:$0xf]  ;;  %4725 = vperm.xlu1 %4723, %v7491_v44  }
  0xb8   : > { %7497 = vst [vmem:[#allocation55_spill] sm:$0xff] %v5758_v34  ;;  %v5808_v13 = vpop.permute.xlu1 %4546  ;;  %v5811_v30 = vadd.f32 %v1160_v15, %v5536_v60  ;;  %v5817_v62 = vadd.f32 %v1162_v58, %v7502_v27  ;;  %v5820_v39 = vadd.f32 %v1163_v6, %v7504_v37  ;;  %v4364_v60 = vld [vmem:[%s7360_s4 + $0x64] sm:$0xf0]  ;;  %v5829_v15 = vadd.f32 %v956_v41, %v728_v36  ;;  %v4235_v37 = vld [vmem:[%s7360_s4 + $0xe0] sm:$0xf] }
  0xb9   : > { %v5814_v14 = vadd.f32 %v1161_v9, %v7500_v42  ;;  %v5831_v9 = vadd.f32 %v957_v63, %v729_v61  ;;  %v4510_v58 = vunpack.i.l.bf16 %v5696_v0  ;;  %v609_v42 = vrot.slane %v608_v43, 7  ;;  %v4380_v6 = vld [vmem:[%s7360_s4 + $0xe4] sm:$0xf0]  ;;  %4731 = vperm.xlu2 %4729, %v7491_v44   ;;  %v4362_v44 = vld [vmem:[%s7360_s4 + $0x54] sm:$0xf0] }
  0xba   : > { %7499 = vst [vmem:[#allocation56_spill] sm:$0xff] %v5811_v30  ;;  %v5840_v27 = vadd.f32 %v954_v56, %v726_v49  ;;  %v5842_v30 = vpop.permute.xlu0 %4541  ;;  %v5844_v36 = vadd.f32 %v955_v29, %v727_v1  ;;  %v724_v61 = vadd.f32 %v634_v53, %v5316_v8  ;;  %v952_v0 = vmul.f32 %v4511_v52, %v5323_v11 }
  0xbb   : > { %7501 = vst [vmem:[#allocation36_spill] sm:$0xff] %v5814_v14  ;;  %v4244_v14 = vor.u32 %v4382_v28, %v4243_v20  ;;  %v953_v41 = vmul.f32 %v4511_v52, %v5326_v12  ;;  %v725_v63 = vadd.f32 %v635_v2, %v5320_v10  ;;  %v4526_v43 = vunpack.i.h.bf16 %v5756_v19 }
  0xbc   : > { %7503 = vst [vmem:[#allocation34_spill] sm:$0xff] %v5817_v62  ;;  %v4172_v49 = vor.u32 %v4364_v60, %v4171_v46  ;;  %v4236_v56 = vor.u32 %v4380_v6, %v4235_v37  ;;  %v4525_v28 = vunpack.i.l.bf16 %v5756_v19  ;;  %v4543_v1 = vunpack.i.l.bf16 %v5842_v30  ;;  %v4163_v46 = vld [vmem:[%s7360_s4 + $0x50] sm:$0xf]  ;;  %v5871_v37 = vpop.permute.xlu2 %4581  ;;  %4905 = vset.pattern.permute.xlu0 %v7441_v55 }
  0xbd   : > { %7505 = vst [vmem:[#allocation35_spill] sm:$0xff] %v5820_v39  ;;  %v4180_v39 = vor.u32 %v4366_v21, %v4179_v25  ;;  %4407 = vmatpush.bf16.msra.mxu3 %v4244_v14  ;;  %v640_v25 = vperm.slane %v609_v42, 0  ;;  %v950_v21 = vmul.f32 %v4510_v58, %v5323_v11  ;;  %v951_v29 = vmul.f32 %v4510_v58, %v5326_v12  ;;  %v4227_v6 = vld [vmem:[%s7360_s4 + $0xd0] sm:$0xf] }
  0xbe   : > { %7506 = vst [vmem:[#allocation57_spill] sm:$0xff] %v5829_v15  ;;  %v5857_v52 = vperm.slane %v7489_v4, 4  ;;  %v5860_v20 = vperm.slane %v5306_v3, 4  ;;  %2605 = vmatpush.bf16.msra.mxu1 %v4244_v14  ;;  %v723_v19 = vadd.f32 %v635_v2, %v5314_v7  ;;  %v4567_v60 = vunpack.i.h.bf16 %v5782_v54  ;;  %v4155_v15 = vld [vmem:[%s7360_s4 + $0x40] sm:$0xf] }
  0xbf   : > { %7507 = vst [vmem:[#allocation58_spill] sm:$0xff] %v5831_v9  ;;  %4399 = vmatpush.bf16.msra.mxu2 %v4180_v39  ;;  %2516 = vmatpush.bf16.msra.mxu0 %v4180_v39  ;;  %v722_v39 = vadd.f32 %v634_v53, %v5310_v5  ;;  %v641_v58 = vperm.slane %v609_v42, 1  ;;  %v4378_v9 = vld [vmem:[%s7360_s4 + $0xd4] sm:$0xf0]  ;;  %v5880_v14 = vadd.f32 %v952_v0, %v724_v61  ;;  %v4566_v2 = vunpack.i.l.bf16 %v5782_v54  ;;  %v4360_v54 = vld [vmem:[%s7360_s4 + $0x44] sm:$0xf0] }
  0xc0   : > { %7508 = vst [vmem:[#allocation59_spill] sm:$0xff] %v5840_v27  ;;  %v5882_v53 = vadd.f32 %v953_v41, %v725_v63  ;;  %v1168_v42 = vmul.f32 %v4543_v1, %v5476_v59  ;;  %v734_v62 = vadd.f32 %v640_v25, %v5310_v5  ;;  %v965_v27 = vmul.f32 %v4526_v43, %v5326_v12  ;;  %v7512_v0 = vld [vmem:[#allocation5_spill] sm:$0xff]  ;;  %v4219_v41 = vld [vmem:[%s7360_s4 + $0xc0] sm:$0xf]  ;;  %v4376_v5 = vld [vmem:[%s7360_s4 + $0xc4] sm:$0xf0] }
  0xc1   : > { %7509 = vst [vmem:[#allocation60_spill] sm:$0xff] %v5844_v36  ;;  %4408 = vmatpush.bf16.msra.mxu3 %v4236_v56  ;;  %v964_v36 = vmul.f32 %v4526_v43, %v5323_v11  ;;  %v962_v61 = vmul.f32 %v4525_v28, %v5323_v11  ;;  %4742 = vperm.xlu1 %4723, %v7512_v0   ;;  %v4544_v55 = vunpack.i.h.bf16 %v5842_v30  ;;  %v4548_v23 = vunpack.i.l.bf16 %v5808_v13 }
  0xc2   : > { %7510 = vst [vmem:[#allocation61_spill] sm:$0xff] %v5880_v14  ;;  %v5903_v63 = vpop.permute.xlu1 %4558  ;;  %v1169_v43 = vmul.f32 %v4543_v1, %v5503_v40  ;;  %v4164_v14 = vor.u32 %v4362_v44, %v4163_v46  ;;  %v4228_v24 = vor.u32 %v4378_v9, %v4227_v6  ;;  %v736_v26 = vadd.f32 %v640_v25, %v5316_v8  ;;  %v4358_v44 = vld [vmem:[%s7360_s4 + $0x34] sm:$0xf0]  ;;  %v4372_v6 = vld [vmem:[%s7360_s4 + $0xa4] sm:$0xf0] }
  0xc3   : > { %7511 = vst [vmem:[#allocation62_spill] sm:$0xff] %v5882_v53  ;;  %4400 = vmatpush.bf16.msra.mxu2 %v4172_v49  ;;  %v7513_v53 = vld [vmem:[#allocation32_spill] sm:$0xff]  ;;  %2517 = vmatpush.bf16.msra.mxu0 %v4172_v49  ;;  %v737_v48 = vadd.f32 %v641_v58, %v5320_v10  ;;  %v4156_v1 = vor.u32 %v4360_v54, %v4155_v15 }
  0xc4   : > { %v5907_v11 = vadd.f32 %v1168_v42, %v7513_v53  ;;  %2606 = vmatpush.bf16.msra.mxu1 %v4236_v56  ;;  %v5914_v34 = vadd.f32 %v1169_v43, %v7515_v57  ;;  %v4220_v53 = vor.u32 %v4376_v5, %v4219_v41  ;;  %v5916_v42 = vadd.f32 %v950_v21, %v722_v39  ;;  %v4147_v56 = vld [vmem:[%s7360_s4 + $0x30] sm:$0xf]  ;;  %v5964_v39 = vpop.permute.xlu2 %4599 }
  0xc5   : > { %4409 = vmatpush.bf16.msra.mxu3 %v4228_v24  ;;  %v5918_v9 = vadd.f32 %v951_v29, %v723_v19  ;;  %v5921_v8 = vmul.f32 %v4567_v60, %v5857_v52  ;;  %v5924_v10 = vmul.f32 %v4567_v60, %v5860_v20  ;;  %4747 = vperm.xlu2 %4729, %v7512_v0  }
  0xc6   : > { %7514 = vst [vmem:[#allocation5_spill] sm:$0xff] %v5907_v11  ;;  %v5928_v30 = vmul.f32 %v4566_v2, %v5857_v52  ;;  %v5931_v57 = vmul.f32 %v4566_v2, %v5860_v20  ;;  %v735_v15 = vadd.f32 %v641_v58, %v5314_v7  ;;  %v963_v49 = vmul.f32 %v4525_v28, %v5326_v12  ;;  %v4211_v7 = vld [vmem:[%s7360_s4 + $0xb0] sm:$0xf]  ;;  %v4374_v12 = vld [vmem:[%s7360_s4 + $0xb4] sm:$0xf0] }
  0xc7   : > { %7516 = vst [vmem:[#allocation32_spill] sm:$0xff] %v5914_v34  ;;  %4401 = vmatpush.bf16.msra.mxu2 %v4164_v14  ;;  %2518 = vmatpush.bf16.msra.mxu0 %v4164_v14  ;;  %v5938_v25 = vadd.f32 %v964_v36, %v736_v26  ;;  %v5940_v21 = vadd.f32 %v965_v27, %v737_v48  ;;  %v5961_v36 = vperm.slane %v5306_v3, 3  ;;  %v4584_v28 = vunpack.i.h.bf16 %v5871_v37  ;;  %v4203_v58 = vld [vmem:[%s7360_s4 + $0xa0] sm:$0xf] }
  0xc8   : > { %v1192_v29 = vmul.f32 %v4544_v55, %v5476_v59  ;;  %v1193_v46 = vmul.f32 %v4544_v55, %v5503_v40  ;;  %2607 = vmatpush.bf16.msra.mxu1 %v4228_v24  ;;  %v5953_v26 = vadd.f32 %v962_v61, %v734_v62  ;;  %v1194_v48 = vmul.f32 %v4548_v23, %v5476_v59  ;;  %v4139_v62 = vld [vmem:[%s7360_s4 + $0x20] sm:$0xf] }
  0xc9   : > { %7517 = vst [vmem:[#allocation33_spill] sm:$0xff] %v5938_v25  ;;  %v1195_v27 = vmul.f32 %v4548_v23, %v5503_v40  ;;  %4410 = vmatpush.bf16.msra.mxu3 %v4220_v53  ;;  %v5958_v55 = vperm.slane %v7489_v4, 3  ;;  %v4560_v24 = vunpack.i.l.bf16 %v5903_v63  ;;  %4751 = vset.pattern.permute.xlu1 %v7437_v17  ;;  %v4356_v4 = vld [vmem:[%s7360_s4 + $0x24] sm:$0xf0]  ;;  %v4549_v23 = vunpack.i.h.bf16 %v5808_v13 }
  0xca   : > { %7518 = vst [vmem:[#allocation63_spill] sm:$0xff] %v5940_v21  ;;  %v4561_v3 = vunpack.i.h.bf16 %v5903_v63  ;;  %v4148_v19 = vor.u32 %v4358_v44, %v4147_v56  ;;  %v4212_v60 = vor.u32 %v4374_v12, %v4211_v7  ;;  %v1256_v2 = vadd.f32 %v1192_v29, %v5666_v51  ;;  %v7519_v63 = vld [vmem:[#allocation8_spill] sm:$0xff] }
  0xcb   : > { %4402 = vmatpush.bf16.msra.mxu2 %v4156_v1  ;;  %v5982_v14 = vpop.permute.xlu1 %4575  ;;  %2519 = vmatpush.bf16.msra.mxu0 %v4156_v1  ;;  %v1257_v61 = vadd.f32 %v1193_v46, %v5670_v47  ;;  %v1258_v13 = vadd.f32 %v1194_v48, %v5652_v45  ;;  %v1259_v0 = vadd.f32 %v1195_v27, %v5662_v50  ;;  %v4131_v51 = vld [vmem:[%s7360_s4 + $0x10] sm:$0xf]  ;;  %v4354_v45 = vld [vmem:[%s7360_s4 + $0x14] sm:$0xf0]  ;;  %v4583_v47 = vunpack.i.l.bf16 %v5871_v37  ;;  %v6001_v1 = vpop.permute.xlu0 %4569 }
  0xcc   : > { %2608 = vmatpush.bf16.msra.mxu1 %v4220_v53  ;;  %v4140_v54 = vor.u32 %v4356_v4, %v4139_v62  ;;  %v1708_v41 = vmul.f32 %v4560_v24, %v5958_v55  ;;  %v1709_v5 = vmul.f32 %v4560_v24, %v5961_v36  ;;  %4753 = vperm.xlu1 %4751, %v7519_v63   ;;  %v4195_v29 = vld [vmem:[%s7360_s4 + $0x90] sm:$0xf]  ;;  %v4370_v46 = vld [vmem:[%s7360_s4 + $0x94] sm:$0xf0]  ;;  %v4123_v4 = vld [vmem:[%s7360_s4] sm:$0xf] }
  0xcd   : > { %4411 = vmatpush.bf16.msra.mxu3 %v4212_v60  ;;  %4757 = vset.pattern.permute.xlu2 %v7439_v31  ;;  %v4204_v43 = vor.u32 %v4372_v6, %v4203_v58  ;;  %v5998_v50 = vadd.f32 %v963_v49, %v735_v15  ;;  %v1710_v53 = vmul.f32 %v4561_v3, %v5958_v55  ;;  %v4368_v58 = vld [vmem:[%s7360_s4 + $0x84] sm:$0xf0] }
  0xce   : > { %v1711_v56 = vmul.f32 %v4561_v3, %v5961_v36  ;;  %4759 = vperm.xlu2 %4757, %v7519_v63   ;;  %v6013_v15 = vmul.f32 %v4584_v28, %v5958_v55  ;;  %v1196_v37 = vmul.f32 %v4549_v23, %v5476_v59  ;;  %v1514_v49 = vadd.f32 %v5770_v16, %v1256_v2  ;;  %v6043_v2 = vpop.permute.xlu2 %4611  ;;  %v4365_v63 = vld [vmem:[%s7360_s4 + $0x74] sm:$0xf] }
  0xcf   : > { %4403 = vmatpush.bf16.msra.mxu2 %v4148_v19  ;;  %7520 = vst [vmem:[#allocation8_spill] sm:$0xff] %v5998_v50  ;;  %v1515_v44 = vadd.f32 %v5773_v18, %v1257_v61  ;;  %2520 = vmatpush.bf16.msra.mxu0 %v4148_v19  ;;  %v1516_v7 = vadd.f32 %v5763_v38, %v1258_v13  ;;  %v4571_v18 = vunpack.i.l.bf16 %v6001_v1  ;;  %v4187_v19 = vld [vmem:[%s7360_s4 + $0x80] sm:$0xf]  ;;  %v4577_v61 = vunpack.i.l.bf16 %v5982_v14 }
  0xd0   : > { %v1517_v12 = vadd.f32 %v5767_v33, %v1259_v0  ;;  %v4132_v48 = vor.u32 %v4354_v45, %v4131_v51  ;;  %v1772_v27 = vadd.f32 %v1708_v41, %v1514_v49  ;;  %v4196_v62 = vor.u32 %v4370_v46, %v4195_v29  ;;  %2609 = vmatpush.bf16.msra.mxu1 %v4212_v60  ;;  %v4352_v33 = vld [vmem:[%s7360_s4 + $0x4] sm:$0xf0]  ;;  %v7521_v45 = vld [vmem:[#allocation4_spill] sm:$0xff] }
  0xd1   : > { %4412 = vmatpush.bf16.msra.mxu3 %v4204_v43  ;;  %v1773_v24 = vadd.f32 %v1709_v5, %v1515_v44  ;;  %v6024_v16 = vmul.f32 %v4584_v28, %v5961_v36  ;;  %v1774_v3 = vadd.f32 %v1710_v53, %v1516_v7  ;;  %v6037_v60 = vmul.f32 %v4583_v47, %v5958_v55  ;;  %v7522_v49 = vld [vmem:[#allocation55_spill] sm:$0xff] }
  0xd2   : > { %v1775_v38 = vadd.f32 %v1711_v56, %v1517_v12  ;;  %v6040_v28 = vmul.f32 %v4583_v47, %v5961_v36  ;;  %v1197_v6 = vmul.f32 %v4549_v23, %v5503_v40  ;;  %v1260_v0 = vadd.f32 %v1196_v37, %v5751_v32  ;;  %v4181_v23 = vld [vmem:[%s7360_s4 + $0x78] sm:$0xf0] }
  0xd3   : > { %4404 = vmatpush.bf16.msra.mxu2 %v4140_v54  ;;  %2521 = vmatpush.bf16.msra.mxu0 %v4140_v54  ;;  %v4602_v41 = vunpack.i.h.bf16 %v5964_v39  ;;  %v4578_v5 = vunpack.i.h.bf16 %v5982_v14  ;;  %v2030_v51 = vadd.f32 %v5928_v30, %v1772_v27  ;;  %v2031_v54 = vadd.f32 %v5931_v57, %v1773_v24  ;;  %v4588_v46 = vpop.permute.xlu0 %4587 }
  0xd4   : > { %v6046_v13 = vpop.permute.xlu1 %4593  ;;  %4770 = vperm.xlu1 %4751, %v7521_v45   ;;  %v4124_v32 = vor.u32 %v4352_v33, %v4123_v4  ;;  %v4188_v47 = vor.u32 %v4368_v58, %v4187_v19  ;;  %v1198_v14 = vmul.f32 %v4571_v18, %v5476_v59  ;;  %v1199_v53 = vmul.f32 %v4571_v18, %v5503_v40 }
  0xd5   : > { %4413 = vmatpush.bf16.msra.mxu3 %v4196_v62  ;;  %v2032_v56 = vadd.f32 %v5921_v8, %v1774_v3  ;;  %v2033_v29 = vadd.f32 %v5924_v10, %v1775_v38  ;;  %v1454_v37 = vmul.f32 %v4577_v61, %v5732_v35  ;;  %v1455_v30 = vmul.f32 %v4577_v61, %v5738_v22  ;;  %v7524_v3 = vld [vmem:[#allocation54_spill] sm:$0xff] }
  0xd6   : > { %4775 = vperm.xlu2 %4757, %v7521_v45   ;;  %v4184_v57 = vor.u32 %v4365_v63, %v4181_v23  ;;  %2610 = vmatpush.bf16.msra.mxu1 %v4204_v43  ;;  %v1261_v44 = vadd.f32 %v1197_v6, %v7522_v49  ;;  %v6069_v7 = vmul.f32 %v4602_v41, %v5732_v35  ;;  %v4601_v12 = vunpack.i.l.bf16 %v5964_v39 }
  0xd7   : > { %4405 = vmatpush.bf16.msra.mxu2 %v4132_v48  ;;  %2522 = vmatpush.bf16.msra.mxu0 %v4132_v48  ;;  %v4572_v8 = vunpack.i.h.bf16 %v6001_v1  ;;  %v1456_v10 = vmul.f32 %v4578_v5, %v5732_v35  ;;  %v1457_v27 = vmul.f32 %v4578_v5, %v5738_v22  ;;  %v2094_v24 = vmax.f32 %v2030_v51, 0.0  ;;  %v7523_v48 = vld [vmem:[#allocation53_spill] sm:$0xff] }
  0xd8   : > { %v2095_v4 = vmax.f32 %v2031_v54, 0.0  ;;  %v6076_v43 = vmul.f32 %v4602_v41, %v5738_v22  ;;  %v1262_v18 = vadd.f32 %v1198_v14, %v7523_v48  ;;  %v1263_v38 = vadd.f32 %v1199_v53, %v7524_v3 }
  0xd9   : > { %4414 = vmatpush.bf16.msra.mxu3 %v4188_v47  ;;  %v4589_v33 = vunpack.i.l.bf16 %v4588_v46  ;;  %v1518_v39 = vadd.f32 %v1454_v37, %v1260_v0  ;;  %v1519_v19 = vadd.f32 %v1455_v30, %v1261_v44  ;;  %v2096_v1 = vmax.f32 %v2032_v56, 0.0  ;;  %v6089_v0 = vpop.permute.xlu2 %4629 }
  0xda   : > { %v2097_v58 = vmax.f32 %v2033_v29, 0.0  ;;  %2611 = vmatpush.bf16.msra.mxu1 %v4196_v62  ;;  %v6081_v6 = vmul.f32 %v4601_v12, %v5732_v35  ;;  %v6084_v61 = vmul.f32 %v4601_v12, %v5738_v22  ;;  %v1200_v41 = vmul.f32 %v4572_v8, %v5476_v59  ;;  %v4381_v62 = vld [vmem:[%s7360_s4 + $0xf4] sm:$0xf] }
  0xdb   : > { %4406 = vmatpush.bf16.msra.mxu2 %v4124_v32  ;;  %2523 = vmatpush.bf16.msra.mxu0 %v4124_v32  ;;  %v2142_v5 = vpack.c.bf16 %v2095_v4, %v2094_v24  ;;  %v1520_v23 = vadd.f32 %v1456_v10, %v1262_v18  ;;  %v1521_v51 = vadd.f32 %v1457_v27, %v1263_v38  ;;  %v4590_v54 = vunpack.i.h.bf16 %v4588_v46  ;;  %v4245_v32 = vld [vmem:[%s7360_s4 + $0xf8] sm:$0xf0]  ;;  %v4618_v24 = vpop.permute.xlu0 %4617 }
  0xdc   : > { %v2143_v14 = vpack.c.bf16 %v2097_v58, %v2096_v1  ;;  %v7525_v53 = vmov 4   ;;  %v1970_v56 = vmul.f32 %v4589_v33, %v5857_v52  ;;  %v1971_v29 = vmul.f32 %v4589_v33, %v5860_v20 }
  0xdd   : > { %v6087_v63 = vpop.permute.xlu1 %4605  ;;  %4779 = vset.pattern.permute.xlu1 %v7525_v53  ;;  %v2260_v37 = vunpack.c.l.b16 %v2142_v5  ;;  %v2261_v30 = vunpack.c.h.b16 %v2142_v5  ;;  %v7526_v46 = vmov 1   ;;  %v1777_v49 = vadd.f32 %v6040_v28, %v1519_v19 }
  0xde   : > { %4785 = vset.pattern.permute.xlu2 %v7526_v46  ;;  %v2262_v44 = vunpack.c.l.b16 %v2143_v14  ;;  %v2263_v12 = vunpack.c.h.b16 %v2143_v14  ;;  %2612 = vmatpush.bf16.msra.mxu1 %v4188_v47  ;;  %v1201_v10 = vmul.f32 %v4572_v8, %v5503_v40  ;;  %v4614_v27 = vunpack.i.h.bf16 %v6043_v2  ;;  %v7529_v8 = vld [vmem:[#allocation14_spill] sm:$0xff] }
  0xdf   : > { %2694 = vmatpush.bf16.msrb.mxu2 %v4184_v57  ;;  %v1776_v57 = vadd.f32 %v6037_v60, %v1518_v39  ;;  %v4248_v4 = vor.u32 %v4381_v62, %v4245_v32  ;;  %v1972_v48 = vmul.f32 %v4590_v54, %v5857_v52  ;;  %v1778_v18 = vadd.f32 %v6013_v15, %v1520_v23  ;;  %v7530_v15 = vld [vmem:[#allocation13_spill] sm:$0xff]  ;;  %v7531_v23 = vld [vmem:[#allocation7_spill] sm:$0xff] }
  0xe0   : > { %v6107_v3 = vpack.c.b16 %v2262_v44, %v2260_v37  ;;  %v6109_v38 = vpack.c.b16 %v2263_v12, %v2261_v30  ;;  %v4613_v60 = vunpack.i.l.bf16 %v6043_v2  ;;  %v1973_v28 = vmul.f32 %v4590_v54, %v5860_v20  ;;  %4781 = vperm.xlu1 %4779, %v7521_v45   ;;  %4787 = vperm.xlu2 %4785, %v7531_v23  }
  0xe1   : > { %v1779_v47 = vadd.f32 %v6024_v16, %v1521_v51  ;;  %2783 = vmatpush.bf16.msrb.mxu3 %v4248_v4  ;;  %v6116_v33 = vadd.f32 %v1200_v41, %v7529_v8  ;;  %v2034_v39 = vadd.f32 %v1970_v56, %v1776_v57  ;;  %v2035_v19 = vadd.f32 %v1971_v29, %v1777_v49  ;;  %v4642_v44 = vpop.permute.xlu2 %4641 }
  0xe2   : > { %7527 = vst [vmem:[#allocation4_spill] sm:$0xff] %v6107_v3  ;;  %v4620_v1 = vunpack.i.h.bf16 %v4618_v24  ;;  %2564 = vmatmul.bf16.vlgmr.msra.gmra.mxu2 %v6107_v3  ;;  %2653 = vmatmul.bf16.vlgmr.msra.gmra.mxu3 %v6109_v38  ;;  %v6121_v58 = vadd.f32 %v1201_v10, %v7530_v15  ;;  %v4632_v2 = vunpack.i.h.bf16 %v6089_v0  ;;  %v4619_v5 = vunpack.i.l.bf16 %v4618_v24  ;;  %v7532_v15 = vld [vmem:[#allocation19_spill] sm:$0xff] }
  0xe3   : > { %7528 = vst [vmem:[#allocation55_spill] sm:$0xff] %v6109_v38  ;;  %v4596_v16 = vunpack.i.h.bf16 %v6046_v13  ;;  %v6127_v45 = vmul.f32 %v4614_v27, %v5857_v52  ;;  %v6130_v41 = vmul.f32 %v4614_v27, %v5860_v20  ;;  %v2036_v51 = vadd.f32 %v1972_v48, %v1778_v18 }
  0xe4   : > { %v4595_v54 = vunpack.i.l.bf16 %v6046_v13  ;;  %v6134_v14 = vmul.f32 %v4613_v60, %v5857_v52  ;;  %v6137_v62 = vmul.f32 %v4613_v60, %v5860_v20  ;;  %v2037_v32 = vadd.f32 %v1973_v28, %v1779_v47 }
  0xe5   : > { %v4631_v56 = vunpack.i.l.bf16 %v6089_v0  ;;  %v2098_v37 = vmax.f32 %v2034_v39, 0.0  ;;  %v2099_v30 = vmax.f32 %v2035_v19, 0.0  ;;  %v1208_v57 = vmul.f32 %v4620_v1, %v5476_v59  ;;  %v4363_v19 = vld [vmem:[%s7360_s4 + $0x64] sm:$0xf] }
  0xe6   : > { %v1209_v49 = vmul.f32 %v4620_v1, %v5503_v40  ;;  %v6145_v13 = vmul.f32 %v4632_v2, %v5958_v55  ;;  %v1206_v12 = vmul.f32 %v4619_v5, %v5476_v59  ;;  %v1207_v10 = vmul.f32 %v4619_v5, %v5503_v40  ;;  %v4173_v1 = vld [vmem:[%s7360_s4 + $0x68] sm:$0xf0] }
  0xe7   : > { %v6140_v29 = vpop.permute.xlu1 %4623  ;;  %v1204_v27 = vmul.f32 %v4596_v16, %v5476_v59  ;;  %v2100_v24 = vmax.f32 %v2036_v51, 0.0  ;;  %v6151_v0 = vmul.f32 %v4632_v2, %v5961_v36  ;;  %v1202_v4 = vmul.f32 %v4595_v54, %v5476_v59  ;;  %v7534_v51 = vld [vmem:[#allocation27_spill] sm:$0xff] }
  0xe8   : > { %v2101_v48 = vmax.f32 %v2037_v32, 0.0  ;;  %v6155_v18 = vmul.f32 %v4631_v56, %v5958_v55  ;;  %v6158_v60 = vmul.f32 %v4631_v56, %v5961_v36  ;;  %4797 = vset.pattern.permute.xlu1 %v7439_v31  ;;  %v6162_v28 = vadd.f32 %v1208_v57, %v5916_v42  ;;  %v7533_v42 = vld [vmem:[#allocation26_spill] sm:$0xff]  ;;  %v4648_v32 = vpop.permute.xlu0 %4647  ;;  %4803 = vset.pattern.permute.xlu2 %v7525_v53 }
  0xe9   : > { %v6165_v47 = vadd.f32 %v1209_v49, %v5918_v9  ;;  %v1203_v8 = vmul.f32 %v4595_v54, %v5503_v40  ;;  %4799 = vperm.xlu1 %4797, %v7531_v23   ;;  %v2144_v39 = vpack.c.bf16 %v2099_v30, %v2098_v37  ;;  %v6176_v2 = vadd.f32 %v1206_v12, %v7532_v15  ;;  %v4379_v56 = vld [vmem:[%s7360_s4 + $0xe4] sm:$0xf]  ;;  %v4237_v37 = vld [vmem:[%s7360_s4 + $0xe8] sm:$0xf0]  ;;  %v6197_v11 = vpop.permute.xlu2 %4659 }
  0xea   : > { %v6179_v5 = vadd.f32 %v1207_v10, %v7533_v42  ;;  %v1205_v9 = vmul.f32 %v4596_v16, %v5503_v40  ;;  %v6183_v54 = vadd.f32 %v1204_v27, %v7534_v51  ;;  %v7535_v30 = vld [vmem:[#allocation11_spill] sm:$0xff]  ;;  %v4644_v49 = vunpack.i.h.bf16 %v4642_v44  ;;  %4805 = vperm.xlu2 %4803, %v7531_v23   ;;  %v7536_v51 = vld [vmem:[#allocation2_spill] sm:$0xff] }
  0xeb   : > { %v1266_v57 = vadd.f32 %v1202_v4, %v7535_v30  ;;  %v4608_v12 = vunpack.i.h.bf16 %v6087_v63  ;;  %v4607_v16 = vunpack.i.l.bf16 %v6087_v63  ;;  %v2145_v10 = vpack.c.bf16 %v2101_v48, %v2100_v24 }
  0xec   : > { %v2264_v27 = vunpack.c.l.b16 %v2144_v39  ;;  %v2265_v15 = vunpack.c.h.b16 %v2144_v39  ;;  %v4176_v42 = vor.u32 %v4363_v19, %v4173_v1  ;;  %v1267_v38 = vadd.f32 %v1203_v8, %v7536_v51  ;;  %v7543_v51 = vld [vmem:[#allocation61_spill] sm:$0xff] }
  0xed   : > { %v4643_v3 = vunpack.i.l.bf16 %v4642_v44  ;;  %v4650_v34 = vunpack.i.h.bf16 %v4648_v32  ;;  %v4240_v21 = vor.u32 %v4379_v56, %v4237_v37  ;;  %v4649_v4 = vunpack.i.l.bf16 %v4648_v32  ;;  %v7539_v37 = vld [vmem:[#allocation24_spill] sm:$0xff] }
  0xee   : > { %v1522_v30 = vadd.f32 %v6081_v6, %v6116_v33  ;;  %v2266_v63 = vunpack.c.l.b16 %v2145_v10  ;;  %v2267_v50 = vunpack.c.h.b16 %v2145_v10  ;;  %2695 = vmatpush.bf16.msrb.mxu2 %v4176_v42  ;;  %v1212_v23 = vmul.f32 %v4644_v49, %v5476_v59  ;;  %v7541_v10 = vld [vmem:[#allocation59_spill] sm:$0xff] }
  0xef   : > { %v1718_v24 = vmul.f32 %v4608_v12, %v5958_v55  ;;  %v1719_v48 = vmul.f32 %v4608_v12, %v5961_v36  ;;  %2784 = vmatpush.bf16.msrb.mxu3 %v4240_v21  ;;  %v1716_v44 = vmul.f32 %v4607_v16, %v5958_v55  ;;  %v1717_v8 = vmul.f32 %v4607_v16, %v5961_v36 }
  0xf0   : > { %v6199_v25 = vpop.permute.xlu1 %4635  ;;  %v6208_v39 = vpack.c.b16 %v2266_v63, %v2264_v27  ;;  %v6210_v19 = vpack.c.b16 %v2267_v50, %v2265_v15  ;;  %v1213_v6 = vmul.f32 %v4644_v49, %v5503_v40  ;;  %v1210_v33 = vmul.f32 %v4643_v3, %v5476_v59  ;;  %v6229_v16 = vpop.permute.xlu0 %4677  ;;  %v7542_v27 = vld [vmem:[#allocation60_spill] sm:$0xff] }
  0xf1   : > { %v1211_v1 = vmul.f32 %v4643_v3, %v5503_v40  ;;  %v1523_v32 = vadd.f32 %v6084_v61, %v6121_v58  ;;  %4809 = vset.pattern.permute.xlu1 %v7526_v46  ;;  %v1524_v21 = vadd.f32 %v6069_v7, %v1266_v57  ;;  %v1525_v56 = vadd.f32 %v6076_v43, %v1267_v38  ;;  %v7540_v58 = vld [vmem:[#allocation3_spill] sm:$0xff] }
  0xf2   : > { %7537 = vst [vmem:[#allocation53_spill] sm:$0xff] %v6208_v39  ;;  %2569 = vmatmul.bf16.gmra.mxu2 %v6208_v39  ;;  %2658 = vmatmul.bf16.gmra.mxu3 %v6210_v19  ;;  %v4625_v50 = vunpack.i.l.bf16 %v6140_v29  ;;  %v1269_v49 = vadd.f32 %v1205_v9, %v7539_v37  ;;  %v1466_v12 = vmul.f32 %v4649_v4, %v5732_v35  ;;  %v4626_v61 = vunpack.i.h.bf16 %v6140_v29  ;;  %v7555_v39 = vld [vmem:[#allocation34_spill] sm:$0xff] }
  0xf3   : > { %7538 = vst [vmem:[#allocation54_spill] sm:$0xff] %v6210_v19  ;;  %v1467_v3 = vmul.f32 %v4649_v4, %v5738_v22  ;;  %4815 = vset.pattern.permute.xlu2 %v7437_v17  ;;  %4811 = vperm.xlu1 %4809, %v7540_v58   ;;  %v1780_v7 = vadd.f32 %v1716_v44, %v1522_v30  ;;  %v7544_v30 = vld [vmem:[#allocation62_spill] sm:$0xff] }
  0xf4   : > { %v1781_v43 = vadd.f32 %v1717_v8, %v1523_v32  ;;  %v1782_v38 = vadd.f32 %v1718_v24, %v1524_v21  ;;  %v1783_v57 = vadd.f32 %v1719_v48, %v1525_v56  ;;  %4817 = vperm.xlu2 %4815, %v7540_v58   ;;  %v6233_v9 = vadd.f32 %v1212_v23, %v7541_v10  ;;  %v6254_v32 = vpop.permute.xlu2 %4671 }
  0xf5   : > { %v6236_v15 = vadd.f32 %v1213_v6, %v7542_v27  ;;  %v1468_v29 = vmul.f32 %v4650_v34, %v5732_v35  ;;  %v1469_v42 = vmul.f32 %v4650_v34, %v5738_v22  ;;  %v1274_v4 = vadd.f32 %v1210_v33, %v7543_v51 }
  0xf6   : > { %v1275_v63 = vadd.f32 %v1211_v1, %v7544_v30  ;;  %v1462_v24 = vmul.f32 %v4625_v50, %v5732_v35  ;;  %v1463_v48 = vmul.f32 %v4625_v50, %v5738_v22  ;;  %v6247_v23 = vadd.f32 %v1466_v12, %v6162_v28  ;;  %v4361_v28 = vld [vmem:[%s7360_s4 + $0x54] sm:$0xf] }
  0xf7   : > { %v6250_v8 = vadd.f32 %v1467_v3, %v6165_v47  ;;  %v1464_v6 = vmul.f32 %v4626_v61, %v5732_v35  ;;  %v1465_v34 = vmul.f32 %v4626_v61, %v5738_v22  ;;  %v2038_v33 = vadd.f32 %v6134_v14, %v1780_v7  ;;  %v4165_v47 = vld [vmem:[%s7360_s4 + $0x58] sm:$0xf0] }
  0xf8   : > { %v2039_v1 = vadd.f32 %v6137_v62, %v1781_v43  ;;  %v2040_v21 = vadd.f32 %v6127_v45, %v1782_v38  ;;  %v2041_v56 = vadd.f32 %v6130_v41, %v1783_v57  ;;  %v6266_v50 = vadd.f32 %v1468_v29, %v1274_v4  ;;  %v4377_v43 = vld [vmem:[%s7360_s4 + $0xd4] sm:$0xf]  ;;  %v7545_v29 = vld [vmem:[#allocation6_spill] sm:$0xff]  ;;  %v6291_v51 = vpop.permute.xlu0 %4707 }
  0xf9   : > { %v6244_v44 = vpop.permute.xlu1 %4653  ;;  %v6268_v37 = vadd.f32 %v1469_v42, %v1275_v63  ;;  %v4638_v14 = vunpack.i.h.bf16 %v6199_v25  ;;  %v4637_v62 = vunpack.i.l.bf16 %v6199_v25  ;;  %v4662_v45 = vunpack.i.h.bf16 %v6197_v11  ;;  %v4229_v25 = vld [vmem:[%s7360_s4 + $0xd8] sm:$0xf0] }
  0xfa   : > { %v1526_v41 = vadd.f32 %v1462_v24, %v6183_v54  ;;  %v1527_v12 = vadd.f32 %v1463_v48, %v1269_v49  ;;  %v1528_v3 = vadd.f32 %v1464_v6, %v6176_v2  ;;  %v1529_v61 = vadd.f32 %v1465_v34, %v6179_v5 }
  0xfb   : > { %4827 = vset.pattern.permute.xlu1 %v7525_v53  ;;  %v4168_v7 = vor.u32 %v4361_v28, %v4165_v47  ;;  %v2102_v54 = vmax.f32 %v2038_v33, 0.0  ;;  %v2103_v49 = vmax.f32 %v2039_v1, 0.0  ;;  %v2104_v2 = vmax.f32 %v2040_v21, 0.0 }
  0xfc   : > { %4833 = vset.pattern.permute.xlu2 %v7526_v46  ;;  %4829 = vperm.xlu1 %4827, %v7540_v58   ;;  %v2105_v38 = vmax.f32 %v2041_v56, 0.0  ;;  %v4661_v5 = vunpack.i.l.bf16 %v6197_v11  ;;  %v1980_v57 = vmul.f32 %v4638_v14, %v5857_v52  ;;  %v1981_v10 = vmul.f32 %v4638_v14, %v5860_v20  ;;  %v4690_v14 = vpop.permute.xlu2 %4689 }
  0xfd   : > { %v1978_v27 = vmul.f32 %v4637_v62, %v5857_v52  ;;  %4835 = vperm.xlu2 %4833, %v7545_v29   ;;  %2696 = vmatpush.bf16.msrb.mxu2 %v4168_v7  ;;  %v1979_v42 = vmul.f32 %v4637_v62, %v5860_v20  ;;  %v2146_v58 = vpack.c.bf16 %v2103_v49, %v2102_v54  ;;  %v4673_v63 = vunpack.i.l.bf16 %v6254_v32 }
  0xfe   : > { %v2147_v4 = vpack.c.bf16 %v2105_v38, %v2104_v2  ;;  %v4232_v30 = vor.u32 %v4377_v43, %v4229_v25  ;;  %v1784_v11 = vadd.f32 %v6155_v18, %v1526_v41  ;;  %v1785_v24 = vadd.f32 %v6158_v60, %v1527_v12 }
  0xff   : > { %v1786_v48 = vadd.f32 %v6145_v13, %v1528_v3  ;;  %v1787_v6 = vadd.f32 %v6151_v0, %v1529_v61  ;;  %v2268_v34 = vunpack.c.l.b16 %v2146_v58  ;;  %v2269_v1 = vunpack.c.h.b16 %v2146_v58  ;;  %v4359_v58 = vld [vmem:[%s7360_s4 + $0x44] sm:$0xf] }
 0x100   : > { %v2270_v33 = vunpack.c.l.b16 %v2147_v4  ;;  %2785 = vmatpush.bf16.msrb.mxu3 %v4232_v30  ;;  %v4680_v56 = vunpack.i.h.bf16 %v6229_v16  ;;  %v2042_v28 = vadd.f32 %v1978_v27, %v1784_v11  ;;  %v2271_v62 = vunpack.c.h.b16 %v2147_v4  ;;  %v4157_v4 = vld [vmem:[%s7360_s4 + $0x48] sm:$0xf0] }
 0x101   : > { %v2044_v47 = vadd.f32 %v1980_v57, %v1786_v48  ;;  %v2043_v7 = vadd.f32 %v1979_v42, %v1785_v24  ;;  %v2045_v18 = vadd.f32 %v1981_v10, %v1787_v6  ;;  %v6304_v13 = vmul.f32 %v4662_v45, %v5857_v52  ;;  %v4738_v48 = vpop.permute.xlu0 %4737 }
 0x102   : > { %v6301_v41 = vpack.c.b16 %v2270_v33, %v2268_v34  ;;  %v6307_v0 = vmul.f32 %v4662_v45, %v5860_v20  ;;  %v4679_v60 = vunpack.i.l.bf16 %v6229_v16  ;;  %v6310_v12 = vpack.c.b16 %v2271_v62, %v2269_v1 }
 0x103   : > { %v6313_v3 = vmul.f32 %v4661_v5, %v5857_v52  ;;  %v6316_v61 = vmul.f32 %v4661_v5, %v5860_v20  ;;  %v4674_v43 = vunpack.i.h.bf16 %v6254_v32  ;;  %v1470_v25 = vmul.f32 %v4673_v63, %v5732_v35 }
 0x104   : > { %v6298_v21 = vpop.permute.xlu1 %4665  ;;  %7546 = vst [vmem:[#allocation14_spill] sm:$0xff] %v6301_v41  ;;  %2574 = vmatmul.bf16.gmra.mxu2 %v6301_v41  ;;  %4839 = vset.pattern.permute.xlu1 %v7437_v17  ;;  %v6323_v45 = vmul.f32 %v4680_v56, %v5958_v55  ;;  %v6326_v16 = vmul.f32 %v4680_v56, %v5961_v36  ;;  %v4692_v54 = vunpack.i.h.bf16 %v4690_v14  ;;  %v4691_v49 = vunpack.i.l.bf16 %v4690_v14  ;;  %v6359_v56 = vpop.permute.xlu2 %4701 }
 0x105   : > { %7547 = vst [vmem:[#allocation13_spill] sm:$0xff] %v6310_v12  ;;  %2663 = vmatmul.bf16.gmra.mxu3 %v6310_v12  ;;  %4841 = vperm.xlu1 %4839, %v7545_v29   ;;  %v2106_v2 = vmax.f32 %v2042_v28, 0.0  ;;  %v2107_v32 = vmax.f32 %v2043_v7, 0.0  ;;  %v2108_v38 = vmax.f32 %v2044_v47, 0.0  ;;  %v2109_v5 = vmax.f32 %v2045_v18, 0.0 }
 0x106   : > { %4845 = vset.pattern.permute.xlu2 %v7439_v31  ;;  %v6332_v57 = vmul.f32 %v4679_v60, %v5958_v55  ;;  %v6335_v10 = vmul.f32 %v4679_v60, %v5961_v36  ;;  %v1471_v27 = vmul.f32 %v4673_v63, %v5738_v22  ;;  %v4710_v42 = vunpack.i.h.bf16 %v6291_v51  ;;  %v4375_v60 = vld [vmem:[%s7360_s4 + $0xc4] sm:$0xf] }
 0x107   : > { %v6346_v30 = vmul.f32 %v4674_v43, %v5732_v35  ;;  %v6349_v11 = vmul.f32 %v4674_v43, %v5738_v22  ;;  %v6352_v24 = vadd.f32 %v1470_v25, %v6233_v9  ;;  %v4709_v63 = vunpack.i.l.bf16 %v6291_v51  ;;  %v4221_v43 = vld [vmem:[%s7360_s4 + $0xc8] sm:$0xf0]  ;;  %4847 = vperm.xlu2 %4845, %v7545_v29  }
 0x108   : > { %v1220_v6 = vmul.f32 %v4692_v54, %v5476_v59  ;;  %v1221_v34 = vmul.f32 %v4692_v54, %v5503_v40  ;;  %v1218_v33 = vmul.f32 %v4691_v49, %v5476_v59  ;;  %v4655_v1 = vunpack.i.l.bf16 %v6244_v44 }
 0x109   : > { %v2148_v28 = vpack.c.bf16 %v2107_v32, %v2106_v2  ;;  %v2149_v47 = vpack.c.bf16 %v2109_v5, %v2108_v38  ;;  %v4160_v14 = vor.u32 %v4359_v58, %v4157_v4  ;;  %v6364_v9 = vadd.f32 %v1471_v27, %v6236_v15  ;;  %v7549_v32 = vld [vmem:[#allocation25_spill] sm:$0xff]  ;;  %v7550_v27 = vld [vmem:[#allocation8_spill] sm:$0xff] }
 0x10a   : > { %v6367_v51 = vmul.f32 %v4710_v42, %v5857_v52  ;;  %v6370_v7 = vmul.f32 %v4710_v42, %v5860_v20  ;;  %v4740_v18 = vunpack.i.h.bf16 %v4738_v48  ;;  %v6379_v25 = vmul.f32 %v4709_v63, %v5857_v52 }
 0x10b   : > { %v6382_v15 = vmul.f32 %v4709_v63, %v5860_v20  ;;  %v1219_v54 = vmul.f32 %v4691_v49, %v5503_v40  ;;  %v4656_v2 = vunpack.i.h.bf16 %v6244_v44  ;;  %2697 = vmatpush.bf16.msrb.mxu2 %v4160_v14  ;;  %v6387_v38 = vadd.f32 %v1218_v33, %v7549_v32  ;;  %v7551_v63 = vld [vmem:[#allocation10_spill] sm:$0xff] }
 0x10c   : > { %7548 = vst [vmem:[#allocation7_spill] sm:$0xff] %v6370_v7  ;;  %v6390_v5 = vadd.f32 %v1220_v6, %v5953_v26  ;;  %v6393_v42 = vadd.f32 %v1221_v34, %v7550_v27  ;;  %v4739_v58 = vunpack.i.l.bf16 %v4738_v48  ;;  %v1724_v4 = vmul.f32 %v4655_v1, %v5958_v55  ;;  %v7552_v6 = vld [vmem:[#allocation12_spill] sm:$0xff] }
 0x10d   : > { %v6361_v62 = vpop.permute.xlu1 %4683  ;;  %4857 = vset.pattern.permute.xlu1 %v7526_v46  ;;  %v2272_v49 = vunpack.c.l.b16 %v2148_v28  ;;  %v2274_v12 = vunpack.c.l.b16 %v2149_v47  ;;  %v4224_v44 = vor.u32 %v4375_v60, %v4221_v43  ;;  %v1420_v14 = vmul.f32 %v4740_v18, %v5732_v35 }
 0x10e   : > { %4859 = vperm.xlu1 %4857, %v7551_v63   ;;  %v4667_v33 = vunpack.i.l.bf16 %v6298_v21  ;;  %v2273_v32 = vunpack.c.h.b16 %v2148_v28  ;;  %v2275_v26 = vunpack.c.h.b16 %v2149_v47  ;;  %v6401_v41 = vadd.f32 %v1219_v54, %v7552_v6 }
 0x10f   : > { %v1726_v48 = vmul.f32 %v4656_v2, %v5958_v55  ;;  %v1727_v46 = vmul.f32 %v4656_v2, %v5961_v36  ;;  %v1725_v34 = vmul.f32 %v4655_v1, %v5961_v36  ;;  %2786 = vmatpush.bf16.msrb.mxu3 %v4224_v44  ;;  %v1421_v27 = vmul.f32 %v4740_v18, %v5738_v22  ;;  %v6419_v18 = vpop.permute.xlu2 %4719 }
 0x110   : > { %v1418_v60 = vmul.f32 %v4739_v58, %v5732_v35  ;;  %v1419_v43 = vmul.f32 %v4739_v58, %v5738_v22  ;;  %v4704_v19 = vunpack.i.h.bf16 %v6359_v56  ;;  %v1788_v28 = vadd.f32 %v1724_v4, %v6247_v23  ;;  %4863 = vset.pattern.permute.xlu2 %v7437_v17 }
 0x111   : > { %v4703_v47 = vunpack.i.l.bf16 %v6359_v56  ;;  %v4668_v54 = vunpack.i.h.bf16 %v6298_v21  ;;  %v6413_v6 = vpack.c.b16 %v2274_v12, %v2272_v49  ;;  %v1214_v2 = vmul.f32 %v4667_v33, %v5476_v59  ;;  %v7556_v12 = vld [vmem:[#allocation56_spill] sm:$0xff]  ;;  %4865 = vperm.xlu2 %4863, %v7551_v63  }
 0x112   : > { %v1215_v1 = vmul.f32 %v4667_v33, %v5503_v40  ;;  %v6417_v44 = vpack.c.b16 %v2275_v26, %v2273_v32  ;;  %v6422_v58 = vadd.f32 %v1420_v14, %v7555_v39  ;;  %v1789_v7 = vadd.f32 %v1725_v34, %v6250_v8  ;;  %v7557_v49 = vld [vmem:[#allocation36_spill] sm:$0xff]  ;;  %v7559_v32 = vld [vmem:[#allocation35_spill] sm:$0xff] }
 0x113   : > { %7553 = vst [vmem:[#allocation19_spill] sm:$0xff] %v6413_v6  ;;  %v1790_v23 = vadd.f32 %v1726_v48, %v6266_v50  ;;  %v1791_v56 = vadd.f32 %v1727_v46, %v6268_v37  ;;  %v6431_v4 = vadd.f32 %v1418_v60, %v7556_v12  ;;  %v6434_v33 = vadd.f32 %v1419_v43, %v7557_v49  ;;  %v6451_v48 = vpop.permute.xlu0 %4765  ;;  %v4357_v46 = vld [vmem:[%s7360_s4 + $0x34] sm:$0xf]  ;;  %v7561_v43 = vld [vmem:[#allocation58_spill] sm:$0xff] }
 0x114   : > { %7554 = vst [vmem:[#allocation26_spill] sm:$0xff] %v6417_v44  ;;  %2579 = vmatmul.bf16.gmra.mxu2 %v6413_v6  ;;  %v6437_v26 = vadd.f32 %v1421_v27, %v7559_v32  ;;  %v6440_v39 = vmul.f32 %v4704_v19, %v5958_v55  ;;  %v6444_v8 = vmul.f32 %v4704_v19, %v5961_v36  ;;  %v4149_v19 = vld [vmem:[%s7360_s4 + $0x38] sm:$0xf0] }
 0x115   : > { %7558 = vst [vmem:[#allocation27_spill] sm:$0xff] %v6434_v33  ;;  %2668 = vmatmul.bf16.gmra.mxu3 %v6417_v44  ;;  %v6447_v50 = vmul.f32 %v4703_v47, %v5958_v55  ;;  %v1216_v37 = vmul.f32 %v4668_v54, %v5476_v59  ;;  %v1217_v14 = vmul.f32 %v4668_v54, %v5503_v40  ;;  %v7560_v27 = vld [vmem:[#allocation57_spill] sm:$0xff]  ;;  %v4768_v54 = vunpack.i.h.bf16 %v6451_v48 }
 0x116   : > { %v6428_v21 = vpop.permute.xlu1 %4695  ;;  %4869 = vset.pattern.permute.xlu1 %v7439_v31  ;;  %v2046_v34 = vadd.f32 %v6313_v3, %v1788_v28  ;;  %v1278_v60 = vadd.f32 %v1214_v2, %v7560_v27  ;;  %v1279_v12 = vadd.f32 %v1215_v1, %v7561_v43  ;;  %v2047_v49 = vadd.f32 %v6316_v61, %v1789_v7  ;;  %v7562_v2 = vld [vmem:[#allocation28_spill] sm:$0xff]  ;;  %v7563_v27 = vld [vmem:[#allocation29_spill] sm:$0xff] }
 0x117   : > { %4871 = vperm.xlu1 %4869, %v7551_v63   ;;  %v2048_v32 = vadd.f32 %v6304_v13, %v1790_v23  ;;  %v2049_v44 = vadd.f32 %v6307_v0, %v1791_v56  ;;  %v6469_v6 = vmul.f32 %v4703_v47, %v5961_v36  ;;  %v4767_v33 = vunpack.i.l.bf16 %v6451_v48  ;;  %v6486_v23 = vpop.permute.xlu2 %4731 }
 0x118   : > { %v4686_v3 = vunpack.i.h.bf16 %v6361_v62  ;;  %v4152_v28 = vor.u32 %v4357_v46, %v4149_v19  ;;  %v6474_v1 = vadd.f32 %v1216_v37, %v7562_v2  ;;  %v6477_v43 = vadd.f32 %v1217_v14, %v7563_v27 }
 0x119   : > { %v4722_v61 = vunpack.i.h.bf16 %v6419_v18  ;;  %v4685_v13 = vunpack.i.l.bf16 %v6361_v62  ;;  %v1536_v0 = vadd.f32 %v6346_v30, %v1278_v60  ;;  %v1537_v7 = vadd.f32 %v6349_v11, %v1279_v12  ;;  %4875 = vset.pattern.permute.xlu2 %v7525_v53 }
 0x11a   : > { %v6484_v47 = vmul.f32 %v4768_v54, %v5857_v52  ;;  %2698 = vmatpush.bf16.msrb.mxu2 %v4152_v28  ;;  %v2110_v56 = vmax.f32 %v2046_v34, 0.0  ;;  %v6490_v37 = vmul.f32 %v4768_v54, %v5860_v20  ;;  %v2111_v14 = vmax.f32 %v2047_v49, 0.0  ;;  %v4213_v28 = vld [vmem:[%s7360_s4 + $0xb8] sm:$0xf0]  ;;  %4877 = vperm.xlu2 %4875, %v7551_v63   ;;  %v7572_v63 = vld [vmem:[#allocation31_spill] sm:$0xff] }
 0x11b   : > { %v2112_v48 = vmax.f32 %v2048_v32, 0.0  ;;  %v2113_v46 = vmax.f32 %v2049_v44, 0.0  ;;  %v6493_v62 = vmul.f32 %v4767_v33, %v5857_v52  ;;  %v1988_v30 = vmul.f32 %v4686_v3, %v5857_v52 }
 0x11c   : > { %7564 = vst [vmem:[#allocation11_spill] sm:$0xff] %v6490_v37  ;;  %v1989_v11 = vmul.f32 %v4686_v3, %v5860_v20  ;;  %v1986_v19 = vmul.f32 %v4685_v13, %v5857_v52  ;;  %v1987_v60 = vmul.f32 %v4685_v13, %v5860_v20  ;;  %v2150_v12 = vpack.c.bf16 %v2111_v14, %v2110_v56  ;;  %v4373_v3 = vld [vmem:[%s7360_s4 + $0xb4] sm:$0xf] }
 0x11d   : > { %v2151_v29 = vpack.c.bf16 %v2113_v46, %v2112_v48  ;;  %v4721_v54 = vunpack.i.l.bf16 %v6419_v18  ;;  %v1792_v44 = vadd.f32 %v6332_v57, %v6352_v24  ;;  %v1794_v49 = vadd.f32 %v6323_v45, %v1536_v0  ;;  %v7565_v24 = vld [vmem:[#allocation9_spill] sm:$0xff] }
 0x11e   : > { %v1795_v32 = vadd.f32 %v6326_v16, %v1537_v7  ;;  %v1793_v18 = vadd.f32 %v6335_v10, %v6364_v9  ;;  %v2276_v2 = vunpack.c.l.b16 %v2150_v12  ;;  %v2277_v57 = vunpack.c.h.b16 %v2150_v12  ;;  %v6521_v10 = vpop.permute.xlu0 %4793 }
 0x11f   : > { %4887 = vset.pattern.permute.xlu1 %v7437_v17  ;;  %v2278_v27 = vunpack.c.l.b16 %v2151_v29  ;;  %v2052_v45 = vadd.f32 %v1988_v30, %v1794_v49  ;;  %v4698_v13 = vunpack.i.h.bf16 %v6428_v21  ;;  %v2279_v0 = vunpack.c.h.b16 %v2151_v29 }
 0x120   : > { %v6499_v34 = vpop.permute.xlu1 %4713  ;;  %4889 = vperm.xlu1 %4887, %v7565_v24   ;;  %v2053_v16 = vadd.f32 %v1989_v11, %v1795_v32  ;;  %v2050_v7 = vadd.f32 %v1986_v19, %v1792_v44  ;;  %v2051_v56 = vadd.f32 %v1987_v60, %v1793_v18  ;;  %v4216_v48 = vor.u32 %v4373_v3, %v4213_v28 }
 0x121   : > { %v6517_v14 = vpack.c.b16 %v2278_v27, %v2276_v2  ;;  %v1478_v46 = vmul.f32 %v4721_v54, %v5732_v35  ;;  %v1479_v37 = vmul.f32 %v4721_v54, %v5738_v22  ;;  %v6523_v9 = vpack.c.b16 %v2279_v0, %v2277_v57  ;;  %v4141_v2 = vld [vmem:[%s7360_s4 + $0x28] sm:$0xf0]  ;;  %v4371_v27 = vld [vmem:[%s7360_s4 + $0xa4] sm:$0xf] }
 0x122   : > { %v6527_v30 = vmul.f32 %v4767_v33, %v5860_v20  ;;  %v6530_v11 = vmul.f32 %v4722_v61, %v5732_v35  ;;  %v4795_v19 = vunpack.i.l.bf16 %v6521_v10  ;;  %v4697_v60 = vunpack.i.l.bf16 %v6428_v21  ;;  %2787 = vmatpush.bf16.msrb.mxu3 %v4216_v48  ;;  %v4748_v33 = vpop.permute.xlu2 %4747  ;;  %v4355_v21 = vld [vmem:[%s7360_s4 + $0x24] sm:$0xf]  ;;  %4893 = vset.pattern.permute.xlu2 %v7439_v31 }
 0x123   : > { %7566 = vst [vmem:[#allocation2_spill] sm:$0xff] %v6517_v14  ;;  %v6536_v12 = vmul.f32 %v4722_v61, %v5738_v22  ;;  %v1476_v29 = vmul.f32 %v4698_v13, %v5732_v35  ;;  %v1477_v17 = vmul.f32 %v4698_v13, %v5738_v22  ;;  %v2114_v54 = vmax.f32 %v2050_v7, 0.0  ;;  %4895 = vperm.xlu2 %4893, %v7565_v24  }
 0x124   : > { %7567 = vst [vmem:[#allocation24_spill] sm:$0xff] %v6523_v9  ;;  %2584 = vmatmul.bf16.gmra.mxu2 %v6517_v14  ;;  %v2115_v44 = vmax.f32 %v2051_v56, 0.0  ;;  %v2116_v49 = vmax.f32 %v2052_v45, 0.0  ;;  %v2117_v32 = vmax.f32 %v2053_v16, 0.0  ;;  %v6546_v61 = vadd.f32 %v1478_v46, %v6390_v5  ;;  %v4205_v5 = vld [vmem:[%s7360_s4 + $0xa8] sm:$0xf0] }
 0x125   : > { %2673 = vmatmul.bf16.gmra.mxu3 %v6523_v9  ;;  %v6549_v3 = vadd.f32 %v1479_v37, %v6393_v42  ;;  %v4734_v28 = vunpack.i.h.bf16 %v6486_v23  ;;  %v4733_v18 = vunpack.i.l.bf16 %v6486_v23  ;;  %v6563_v57 = vmul.f32 %v4795_v19, %v5732_v35 }
 0x126   : > { %v1474_v42 = vmul.f32 %v4697_v60, %v5732_v35  ;;  %v1475_v37 = vmul.f32 %v4697_v60, %v5738_v22  ;;  %v6571_v45 = vmul.f32 %v4795_v19, %v5738_v22  ;;  %v1540_v16 = vadd.f32 %v1476_v29, %v6387_v38 }
 0x127   : > { %7568 = vst [vmem:[#allocation3_spill] sm:$0xff] %v6563_v57  ;;  %v1541_v13 = vadd.f32 %v1477_v17, %v6401_v41  ;;  %v4716_v0 = vunpack.i.h.bf16 %v6499_v34  ;;  %v2152_v7 = vpack.c.bf16 %v2115_v44, %v2114_v54  ;;  %v2153_v56 = vpack.c.bf16 %v2117_v32, %v2116_v49 }
 0x128   : > { %4899 = vset.pattern.permute.xlu1 %v7525_v53  ;;  %7569 = vst [vmem:[#allocation59_spill] sm:$0xff] %v6571_v45  ;;  %v4144_v48 = vor.u32 %v4355_v21, %v4141_v2  ;;  %v4208_v46 = vor.u32 %v4371_v27, %v4205_v5  ;;  %v6578_v60 = vmul.f32 %v4734_v28, %v5857_v52  ;;  %v4715_v38 = vunpack.i.l.bf16 %v6499_v34 }
 0x129   : > { %v6568_v23 = vpop.permute.xlu1 %4725  ;;  %4901 = vperm.xlu1 %4899, %v7565_v24   ;;  %v6581_v9 = vmul.f32 %v4734_v28, %v5860_v20  ;;  %v6584_v19 = vmul.f32 %v4733_v18, %v5857_v52  ;;  %v6589_v29 = vmul.f32 %v4733_v18, %v5860_v20  ;;  %v1538_v17 = vadd.f32 %v1474_v42, %v6474_v1 }
 0x12a   : > { %v1539_v54 = vadd.f32 %v1475_v37, %v6477_v43  ;;  %2699 = vmatpush.bf16.msrb.mxu2 %v4144_v48  ;;  %2788 = vmatpush.bf16.msrb.mxu3 %v4208_v46  ;;  %v1798_v44 = vadd.f32 %v6440_v39, %v1540_v16  ;;  %v1799_v49 = vadd.f32 %v6444_v8, %v1541_v13  ;;  %v4750_v32 = vunpack.i.h.bf16 %v4748_v33  ;;  %v6599_v27 = vpop.permute.xlu2 %4759  ;;  %v7571_v46 = vld [vmem:[#allocation30_spill] sm:$0xff] }
 0x12b   : > { %v4749_v21 = vunpack.i.l.bf16 %v4748_v33  ;;  %v1170_v34 = vmul.f32 %v4716_v0, %v5476_v59  ;;  %v2280_v28 = vunpack.c.l.b16 %v2152_v7  ;;  %v2282_v2 = vunpack.c.l.b16 %v2153_v56 }
 0x12c   : > { %v1171_v18 = vmul.f32 %v4716_v0, %v5503_v40  ;;  %v1222_v1 = vmul.f32 %v4715_v38, %v5476_v59  ;;  %v2281_v43 = vunpack.c.h.b16 %v2152_v7  ;;  %v2283_v5 = vunpack.c.h.b16 %v2153_v56 }
 0x12d   : > { %v1796_v39 = vadd.f32 %v6447_v50, %v1538_v17  ;;  %v1223_v8 = vmul.f32 %v4715_v38, %v5503_v40  ;;  %v4762_v33 = vunpack.i.h.bf16 %v6599_v27  ;;  %v1797_v42 = vadd.f32 %v6469_v6, %v1539_v54  ;;  %v7573_v6 = vld [vmem:[#allocation33_spill] sm:$0xff] }
 0x12e   : > { %v1936_v37 = vmul.f32 %v4750_v32, %v5857_v52  ;;  %v1937_v16 = vmul.f32 %v4750_v32, %v5860_v20  ;;  %v1934_v13 = vmul.f32 %v4749_v21, %v5857_v52  ;;  %v1935_v7 = vmul.f32 %v4749_v21, %v5860_v20  ;;  %v7575_v32 = vld [vmem:[#allocation63_spill] sm:$0xff] }
 0x12f   : > { %v6611_v50 = vpack.c.b16 %v2282_v2, %v2280_v28  ;;  %v4728_v56 = vunpack.i.h.bf16 %v6568_v23  ;;  %v6615_v38 = vadd.f32 %v1170_v34, %v7571_v46  ;;  %v6618_v17 = vadd.f32 %v1171_v18, %v7572_v63 }
 0x130   : > { %v1286_v54 = vadd.f32 %v1222_v1, %v7573_v6  ;;  %v6621_v41 = vpack.c.b16 %v2283_v5, %v2281_v43  ;;  %v1287_v53 = vadd.f32 %v1223_v8, %v7575_v32  ;;  %v6625_v14 = vmul.f32 %v4762_v33, %v5958_v55 }
 0x131   : > { %7570 = vst [vmem:[#allocation60_spill] sm:$0xff] %v6611_v50  ;;  %v6628_v21 = vmul.f32 %v4762_v33, %v5961_v36  ;;  %v7576_v28 = vunpack.i.l.bf16 %v6599_v27  ;;  %v1738_v43 = vmul.f32 %v4728_v56, %v5958_v55  ;;  %v4727_v5 = vunpack.i.l.bf16 %v6568_v23  ;;  %v4133_v23 = vld [vmem:[%s7360_s4 + $0x18] sm:$0xf0] }
 0x132   : > { %7574 = vst [vmem:[#allocation61_spill] sm:$0xff] %v6621_v41  ;;  %v2054_v8 = vadd.f32 %v6379_v25, %v1796_v39  ;;  %v2055_v33 = vadd.f32 %v6382_v15, %v1797_v42  ;;  %v2056_v25 = vadd.f32 %v6367_v51, %v1798_v44  ;;  %v7577_v15 = vld [vmem:[#allocation7_spill] sm:$0xff]  ;;  %v1544_v45 = vadd.f32 %v6530_v11, %v1286_v54 }
 0x133   : > { %v4743_v0 = vpop.permute.xlu1 %4742  ;;  %v6633_v34 = vmul.f32 %v7576_v28, %v5958_v55  ;;  %v2057_v39 = vadd.f32 %v7577_v15, %v1799_v49  ;;  %v1739_v28 = vmul.f32 %v4728_v56, %v5961_v36  ;;  %v1545_v57 = vadd.f32 %v6536_v12, %v1287_v53 }
 0x134   : > { %v4745_v48 = vunpack.i.h.bf16 %v4743_v0  ;;  %2589 = vmatmul.bf16.gmra.mxu2 %v6611_v50  ;;  %v4744_v1 = vunpack.i.l.bf16 %v4743_v0  ;;  %v4353_v0 = vld [vmem:[%s7360_s4 + $0x14] sm:$0xf]  ;;  %v2118_v42 = vmax.f32 %v2054_v8, 0.0  ;;  %v2120_v51 = vmax.f32 %v2056_v25, 0.0 }
 0x135   : > { %2678 = vmatmul.bf16.gmra.mxu3 %v6621_v41  ;;  %v2121_v44 = vmax.f32 %v2057_v39, 0.0  ;;  %v4136_v8 = vor.u32 %v4353_v0, %v4133_v23  ;;  %v1736_v56 = vmul.f32 %v4727_v5, %v5958_v55  ;;  %v1737_v24 = vmul.f32 %v4727_v5, %v5961_v36 }
 0x136   : > { %v1678_v2 = vmul.f32 %v4745_v48, %v5958_v55  ;;  %v1679_v18 = vmul.f32 %v4745_v48, %v5961_v36  ;;  %v1676_v46 = vmul.f32 %v4744_v1, %v5958_v55  ;;  %v1677_v63 = vmul.f32 %v4744_v1, %v5961_v36 }
 0x137   : > { %v2119_v48 = vmax.f32 %v2055_v33, 0.0  ;;  %2700 = vmatpush.bf16.msrb.mxu2 %v4136_v8  ;;  %v7579_v23 = vunpack.i.l.bf16 %v6599_v27  ;;  %v1800_v5 = vadd.f32 %v1736_v56, %v6546_v61  ;;  %v1802_v39 = vadd.f32 %v1738_v43, %v1544_v45 }
 0x138   : > { %v1742_v6 = vadd.f32 %v1678_v2, %v6422_v58  ;;  %v1743_v32 = vadd.f32 %v1679_v18, %v6437_v26  ;;  %v4369_v58 = vld [vmem:[%s7360_s4 + $0x94] sm:$0xf]  ;;  %v4197_v26 = vld [vmem:[%s7360_s4 + $0x98] sm:$0xf0]  ;;  %v1740_v2 = vadd.f32 %v1676_v46, %v6431_v4  ;;  %v7578_v18 = vld [vmem:[#allocation27_spill] sm:$0xff]  ;;  %v6669_v4 = vpop.permute.xlu2 %4775  ;;  %v2155_v46 = vpack.c.bf16 %v2121_v44, %v2120_v51 }
 0x139   : > { %v1741_v31 = vadd.f32 %v1677_v63, %v7578_v18  ;;  %v2154_v49 = vpack.c.bf16 %v2119_v48, %v2118_v42  ;;  %v4200_v50 = vor.u32 %v4369_v58, %v4197_v26  ;;  %v1681_v25 = vmul.f32 %v7579_v23, %v5961_v36  ;;  %v4125_v48 = vld [vmem:[%s7360_s4 + $0x8] sm:$0xf0] }
 0x13a   : > { %v2000_v1 = vadd.f32 %v1936_v37, %v1742_v6  ;;  %v1998_v33 = vadd.f32 %v1934_v13, %v1740_v2  ;;  %v2001_v41 = vadd.f32 %v1937_v16, %v1743_v32  ;;  %v4778_v37 = vunpack.i.h.bf16 %v6669_v4 }
 0x13b   : > { %v1999_v15 = vadd.f32 %v1935_v7, %v1741_v31  ;;  %v2284_v63 = vunpack.c.l.b16 %v2154_v49  ;;  %2789 = vmatpush.bf16.msrb.mxu3 %v4200_v50  ;;  %v2286_v16 = vunpack.c.l.b16 %v2155_v46  ;;  %v2285_v6 = vunpack.c.h.b16 %v2154_v49  ;;  %v4351_v50 = vld [vmem:[%s7360_s4 + $0x4] sm:$0xf] }
 0x13c   : > { %v2064_v7 = vmax.f32 %v2000_v1, 0.0  ;;  %v2287_v54 = vunpack.c.h.b16 %v2155_v46  ;;  %v2062_v12 = vmax.f32 %v1998_v33, 0.0  ;;  %v2065_v0 = vmax.f32 %v2001_v41, 0.0  ;;  %v7581_v49 = vld [vmem:[#allocation50_spill] sm:$0xff] }
 0x13d   : > { %v2063_v53 = vmax.f32 %v1999_v15, 0.0  ;;  %v4777_v42 = vunpack.i.l.bf16 %v6669_v4  ;;  %v1801_v58 = vadd.f32 %v1737_v24, %v6549_v3  ;;  %v1803_v41 = vadd.f32 %v1739_v28, %v1545_v57  ;;  %v7580_v28 = vld [vmem:[#allocation49_spill] sm:$0xff] }
 0x13e   : > { %v4754_v13 = vpop.permute.xlu1 %4753  ;;  %v6686_v26 = vmul.f32 %v4778_v37, %v5958_v55  ;;  %v6688_v27 = vpack.c.b16 %v2286_v16, %v2284_v63  ;;  %v6694_v18 = vpack.c.b16 %v2287_v54, %v2285_v6  ;;  %v2127_v1 = vpack.c.bf16 %v2065_v0, %v2064_v7  ;;  %v7583_v7 = vld [vmem:[#allocation52_spill] sm:$0xff] }
 0x13f   : > { %v4756_v32 = vunpack.i.h.bf16 %v4754_v13  ;;  %v4755_v11 = vunpack.i.l.bf16 %v4754_v13  ;;  %v2126_v31 = vpack.c.bf16 %v2063_v53, %v2062_v12  ;;  %v4128_v51 = vor.u32 %v4351_v50, %v4125_v48  ;;  %v4367_v12 = vld [vmem:[%s7360_s4 + $0x84] sm:$0xf] }
 0x140   : > { %v2058_v3 = vadd.f32 %v6584_v19, %v1800_v5  ;;  %v2060_v57 = vadd.f32 %v6578_v60, %v1802_v39  ;;  %v2230_v56 = vunpack.c.l.b16 %v2127_v1  ;;  %v2231_v46 = vunpack.c.h.b16 %v2127_v1  ;;  %v4788_v63 = vpop.permute.xlu2 %4787  ;;  %v7582_v60 = vld [vmem:[#allocation51_spill] sm:$0xff] }
 0x141   : > { %v1424_v61 = vmul.f32 %v4756_v32, %v5732_v35  ;;  %v1425_v45 = vmul.f32 %v4756_v32, %v5738_v22  ;;  %v1422_v43 = vmul.f32 %v4755_v11, %v5732_v35  ;;  %v1423_v2 = vmul.f32 %v4755_v11, %v5738_v22  ;;  %2701 = vmatpush.bf16.msrb.mxu2 %v4128_v51 }
 0x142   : > { %v2228_v15 = vunpack.c.l.b16 %v2126_v31  ;;  %v2229_v4 = vunpack.c.h.b16 %v2126_v31  ;;  %v2059_v24 = vadd.f32 %v6589_v29, %v1801_v58  ;;  %v2061_v19 = vadd.f32 %v6581_v9, %v1803_v41  ;;  %v4189_v29 = vld [vmem:[%s7360_s4 + $0x88] sm:$0xf0] }
 0x143   : > { %v1486_v44 = vadd.f32 %v1422_v43, %v7580_v28  ;;  %v1487_v8 = vadd.f32 %v1423_v2, %v7581_v49  ;;  %v1488_v13 = vadd.f32 %v1424_v61, %v7582_v60  ;;  %v1489_v16 = vadd.f32 %v1425_v45, %v7583_v7  ;;  %v7584_v28 = vld [vmem:[#allocation5_spill] sm:$0xff]  ;;  %v7585_v49 = vld [vmem:[#allocation32_spill] sm:$0xff] }
 0x144   : > { %2594 = vmatmul.bf16.gmra.mxu2 %v6688_v27  ;;  %v6706_v11 = vpack.c.b16 %v2230_v56, %v2228_v15  ;;  %v6708_v54 = vpack.c.b16 %v2231_v46, %v2229_v4  ;;  %v1687_v9 = vmul.f32 %v4778_v37, %v5961_v36  ;;  %v2122_v23 = vmax.f32 %v2058_v3, 0.0 }
 0x145   : > { %2683 = vmatmul.bf16.gmra.mxu3 %v6694_v18  ;;  %v1744_v53 = vadd.f32 %v6633_v34, %v1486_v44  ;;  %v1745_v0 = vadd.f32 %v1681_v25, %v1487_v8  ;;  %v4790_v5 = vunpack.i.h.bf16 %v4788_v63  ;;  %v2123_v58 = vmax.f32 %v2059_v24, 0.0 }
 0x146   : > { %v4771_v33 = vpop.permute.xlu1 %4770  ;;  %2524 = vmatmul.bf16.vlgmr.msra.gmra.mxu0 %v6706_v11  ;;  %2613 = vmatmul.bf16.vlgmr.msra.gmra.mxu1 %v6708_v54  ;;  %v2124_v41 = vmax.f32 %v2060_v57, 0.0  ;;  %v2125_v61 = vmax.f32 %v2061_v19, 0.0  ;;  %v4192_v45 = vor.u32 %v4367_v12, %v4189_v29  ;;  %v1684_v37 = vmul.f32 %v4777_v42, %v5958_v55 }
 0x147   : > { %v4773_v6 = vunpack.i.h.bf16 %v4771_v33  ;;  %v4772_v32 = vunpack.i.l.bf16 %v4771_v33  ;;  %v1746_v34 = vadd.f32 %v6625_v14, %v1488_v13  ;;  %v1747_v25 = vadd.f32 %v6628_v21, %v1489_v16 }
 0x148   : > { %v2156_v2 = vpack.c.bf16 %v2123_v58, %v2122_v23  ;;  %v2157_v31 = vpack.c.bf16 %v2125_v61, %v2124_v41  ;;  %2790 = vmatpush.bf16.msrb.mxu3 %v4192_v45  ;;  %v2002_v1 = vadd.f32 %v6493_v62, %v1744_v53  ;;  %v2003_v51 = vadd.f32 %v6527_v30, %v1745_v0  ;;  %v7586_v62 = vld [vmem:[#allocation11_spill] sm:$0xff]  ;;  %v4806_v23 = vpop.permute.xlu2 %4805 }
 0x149   : > { %v1428_v39 = vmul.f32 %v4773_v6, %v5732_v35  ;;  %v1426_v50 = vmul.f32 %v4772_v32, %v5732_v35  ;;  %v1427_v48 = vmul.f32 %v4772_v32, %v5738_v22  ;;  %v1429_v43 = vmul.f32 %v4773_v6, %v5738_v22 }
 0x14a   : > { %v1685_v3 = vmul.f32 %v4777_v42, %v5961_v36  ;;  %v4789_v57 = vunpack.i.l.bf16 %v4788_v63  ;;  %v1174_v14 = vmul.f32 %v4790_v5, %v5476_v59  ;;  %v2288_v33 = vunpack.c.l.b16 %v2156_v2 }
 0x14b   : > { %v1490_v44 = vadd.f32 %v1426_v50, %v7584_v28  ;;  %v1491_v8 = vadd.f32 %v1427_v48, %v7585_v49  ;;  %v1492_v21 = vadd.f32 %v1428_v39, %v6615_v38  ;;  %v2290_v15 = vunpack.c.l.b16 %v2157_v31 }
 0x14c   : > { %v2289_v56 = vunpack.c.h.b16 %v2156_v2  ;;  %v2291_v4 = vunpack.c.h.b16 %v2157_v31  ;;  %v2004_v46 = vadd.f32 %v6484_v47, %v1746_v34  ;;  %v2005_v24 = vadd.f32 %v7586_v62, %v1747_v25 }
 0x14d   : > { %v1175_v30 = vmul.f32 %v4790_v5, %v5503_v40  ;;  %v1493_v42 = vadd.f32 %v1429_v43, %v6618_v17  ;;  %v2066_v19 = vmax.f32 %v2002_v1, 0.0  ;;  %v2067_v63 = vmax.f32 %v2003_v51, 0.0 }
 0x14e   : > { %v1172_v60 = vmul.f32 %v4789_v57, %v5476_v59  ;;  %v1173_v13 = vmul.f32 %v4789_v57, %v5503_v40  ;;  %v1748_v7 = vadd.f32 %v1684_v37, %v1490_v44  ;;  %v1749_v38 = vadd.f32 %v1685_v3, %v1491_v8  ;;  %v7587_v37 = vld [vmem:[#allocation39_spill] sm:$0xff]  ;;  %v7588_v3 = vld [vmem:[#allocation40_spill] sm:$0xff] }
 0x14f   : > { %v6740_v16 = vpack.c.b16 %v2290_v15, %v2288_v33  ;;  %v2068_v32 = vmax.f32 %v2004_v46, 0.0  ;;  %v2069_v12 = vmax.f32 %v2005_v24, 0.0  ;;  %v2128_v47 = vpack.c.bf16 %v2067_v63, %v2066_v19  ;;  %v7591_v24 = vld [vmem:[#allocation37_spill] sm:$0xff]  ;;  %v7592_v19 = vld [vmem:[#allocation38_spill] sm:$0xff] }
 0x150   : > { %v6742_v29 = vpack.c.b16 %v2291_v4, %v2289_v56  ;;  %v1750_v17 = vadd.f32 %v6686_v26, %v1492_v21  ;;  %v1751_v5 = vadd.f32 %v1687_v9, %v1493_v42  ;;  %v1236_v34 = vadd.f32 %v1172_v60, %v7587_v37  ;;  %v4390_v9 = vld [vmem:[%s7362_s6 + $0x38] sm:$0xff] }
 0x151   : > { %v2129_v39 = vpack.c.bf16 %v2069_v12, %v2068_v32  ;;  %v2232_v50 = vunpack.c.l.b16 %v2128_v47  ;;  %v2233_v48 = vunpack.c.h.b16 %v2128_v47  ;;  %v4808_v26 = vunpack.i.h.bf16 %v4806_v23  ;;  %3100 = vmatpush.bf16.msrb.mxu0 %v4390_v9  ;;  %v4398_v60 = vld [vmem:[%s7362_s6 + $0x78] sm:$0xff]  ;;  %v7594_v47 = vld [vmem:[#allocation59_spill] sm:$0xff] }
 0x152   : > { %v4782_v6 = vpop.permute.xlu1 %4781  ;;  %v1237_v57 = vadd.f32 %v1173_v13, %v7588_v3  ;;  %v4807_v28 = vunpack.i.l.bf16 %v4806_v23  ;;  %v7589_v56 = vunpack.i.h.bf16 %v6521_v10  ;;  %v1238_v42 = vadd.f32 %v1174_v14, %v7591_v24  ;;  %3189 = vmatpush.bf16.msrb.mxu1 %v4398_v60  ;;  %v6782_v23 = vld [vmem:[%s7361_s5] sm:$0x3] }
 0x153   : > { %v4784_v53 = vunpack.i.h.bf16 %v4782_v6  ;;  %v4783_v0 = vunpack.i.l.bf16 %v4782_v6  ;;  %v2234_v25 = vunpack.c.l.b16 %v2129_v39  ;;  %v2235_v43 = vunpack.c.h.b16 %v2129_v39 }
 0x154   : > { %2599 = vmatmul.bf16.gmra.mxu2 %v6740_v16  ;;  %v1432_v4 = vmul.f32 %v7589_v56, %v5732_v35  ;;  %v7590_v46 = vmov %v7589_v56  ;;  %v1239_v63 = vadd.f32 %v1175_v30, %v7592_v19  ;;  %v1948_v13 = vmul.f32 %v4808_v26, %v5857_v52  ;;  %v7593_v30 = vld [vmem:[#allocation3_spill] sm:$0xff] }
 0x155   : > { %2688 = vmatmul.bf16.gmra.mxu3 %v6742_v29  ;;  %v1944_v58 = vmul.f32 %v4784_v53, %v5857_v52  ;;  %v1945_v41 = vmul.f32 %v4784_v53, %v5860_v20  ;;  %v1942_v61 = vmul.f32 %v4783_v0, %v5857_v52  ;;  %v1943_v45 = vmul.f32 %v4783_v0, %v5860_v20 }
 0x156   : > { %v6756_v44 = vpack.c.b16 %v2234_v25, %v2232_v50  ;;  %v6758_v49 = vpack.c.b16 %v2235_v43, %v2233_v48  ;;  %v1433_v62 = vmul.f32 %v7590_v46, %v5738_v22  ;;  %v1946_v32 = vmul.f32 %v4807_v28, %v5857_v52  ;;  %v4818_v50 = vpop.permute.xlu2 %4817 }
 0x157   : > { %v2006_v2 = vadd.f32 %v1942_v61, %v1748_v7  ;;  %v2007_v31 = vadd.f32 %v1943_v45, %v1749_v38  ;;  %v2008_v1 = vadd.f32 %v1944_v58, %v1750_v17  ;;  %v2009_v51 = vadd.f32 %v1945_v41, %v1751_v5  ;;  %v6784_v45 = vpop.permute.xlu0 %4823 }
 0x158   : > { %2529 = vmatmul.bf16.gmra.mxu0 %v6756_v44  ;;  %v1949_v7 = vmul.f32 %v4808_v26, %v5860_v20  ;;  %2618 = vmatmul.bf16.gmra.mxu1 %v6758_v49  ;;  %v1947_v14 = vmul.f32 %v4807_v28, %v5860_v20  ;;  %v1494_v12 = vadd.f32 %v7593_v30, %v1236_v34  ;;  %v4826_v43 = vunpack.i.h.bf16 %v6784_v45 }
 0x159   : > { %v2070_v8 = vmax.f32 %v2006_v2, 0.0  ;;  %v2071_v21 = vmax.f32 %v2007_v31, 0.0  ;;  %v2072_v33 = vmax.f32 %v2008_v1, 0.0  ;;  %v2073_v15 = vmax.f32 %v2009_v51, 0.0 }
 0x15a   : > { %v1495_v53 = vadd.f32 %v7594_v47, %v1237_v57  ;;  %v1496_v48 = vadd.f32 %v1432_v4, %v1238_v42  ;;  %v1497_v58 = vadd.f32 %v1433_v62, %v1239_v63  ;;  %v6792_v9 = vperm.slane %v6782_v23, 0 }
 0x15b   : > { %v4800_v38 = vpop.permute.xlu1 %4799  ;;  %v2130_v6 = vpack.c.bf16 %v2071_v21, %v2070_v8  ;;  %v2131_v10 = vpack.c.bf16 %v2073_v15, %v2072_v33  ;;  %v4820_v28 = vunpack.i.h.bf16 %v4818_v50  ;;  %v4819_v8 = vunpack.i.l.bf16 %v4818_v50 }
 0x15c   : > { %v4802_v0 = vunpack.i.h.bf16 %v4800_v38  ;;  %v4801_v17 = vunpack.i.l.bf16 %v4800_v38  ;;  %v6799_v4 = vmul.f32 %v4826_v43, %v5958_v55  ;;  %v4825_v46 = vunpack.i.l.bf16 %v6784_v45 }
 0x15d   : > { %v2236_v5 = vunpack.c.l.b16 %v2130_v6  ;;  %v2238_v39 = vunpack.c.l.b16 %v2131_v10  ;;  %v2237_v41 = vunpack.c.h.b16 %v2130_v6  ;;  %v2239_v61 = vunpack.c.h.b16 %v2131_v10 }
 0x15e   : > { %v1690_v37 = vmul.f32 %v4802_v0, %v5958_v55  ;;  %v1691_v34 = vmul.f32 %v4802_v0, %v5961_v36  ;;  %v1688_v26 = vmul.f32 %v4801_v17, %v5958_v55  ;;  %v1689_v25 = vmul.f32 %v4801_v17, %v5961_v36 }
 0x15f   : > { %v6794_v2 = vpack.c.b16 %v2238_v39, %v2236_v5  ;;  %v6796_v31 = vpack.c.b16 %v2239_v61, %v2237_v41  ;;  %v1435_v5 = vmul.f32 %v4819_v8, %v5738_v22  ;;  %v7596_v61 = vld [vmem:[#allocation16_spill] sm:$0xff] }
 0x160   : > { %v1752_v1 = vadd.f32 %v1688_v26, %v1494_v12  ;;  %v1753_v51 = vadd.f32 %v1689_v25, %v1495_v53  ;;  %v1754_v3 = vadd.f32 %v1690_v37, %v1496_v48  ;;  %v1755_v57 = vadd.f32 %v1691_v34, %v1497_v58  ;;  %v4836_v12 = vpop.permute.xlu2 %4835  ;;  %v7595_v58 = vld [vmem:[#allocation15_spill] sm:$0xff]  ;;  %v7597_v37 = vld [vmem:[#allocation17_spill] sm:$0xff]  ;;  %v7598_v26 = vld [vmem:[#allocation18_spill] sm:$0xff] }
 0x162   : > { %v2010_v21 = vadd.f32 %v1946_v32, %v1752_v1  ;;  %v2011_v33 = vadd.f32 %v1947_v14, %v1753_v51  ;;  %v2012_v15 = vadd.f32 %v1948_v13, %v1754_v3  ;;  %v2013_v56 = vadd.f32 %v1949_v7, %v1755_v57  ;;  %v4389_v13 = vld [vmem:[%s7362_s6 + $0x30] sm:$0xff] }
 0x163   : > { %v1436_v7 = vmul.f32 %v4820_v28, %v5732_v35  ;;  %v1434_v14 = vmul.f32 %v4819_v8, %v5732_v35  ;;  %3101 = vmatpush.bf16.msrb.mxu0 %v4389_v13  ;;  %v1695_v1 = vmul.f32 %v4826_v43, %v5961_v36  ;;  %v4838_v51 = vunpack.i.h.bf16 %v4836_v12 }
 0x164   : > { %2702 = vmatmul.bf16.vlgmr.msrb.gmra.mxu2 %v6706_v11  ;;  %v2074_v63 = vmax.f32 %v2010_v21, 0.0  ;;  %v2075_v60 = vmax.f32 %v2011_v33, 0.0  ;;  %v2076_v38 = vmax.f32 %v2012_v15, 0.0  ;;  %v2077_v32 = vmax.f32 %v2013_v56, 0.0 }
 0x165   : > { %v2565_v62 = vpop.f32.mrf.mxu2  ;;  %v2654_v24 = vpop.f32.mrf.mxu3  ;;  %2791 = vmatmul.bf16.vlgmr.msrb.gmra.mxu3 %v6708_v54  ;;  %v1437_v11 = vmul.f32 %v4820_v28, %v5738_v22  ;;  %v1692_v28 = vmul.f32 %v4825_v46, %v5958_v55  ;;  %v4837_v13 = vunpack.i.l.bf16 %v4836_v12 }
 0x166   : > { %v2566_v42 = vadd.f32 %v2565_v62, %v6792_v9  ;;  %v4812_v19 = vpop.permute.xlu1 %4811  ;;  %v2132_v30 = vpack.c.bf16 %v2075_v60, %v2074_v63  ;;  %v2133_v39 = vpack.c.bf16 %v2077_v32, %v2076_v38  ;;  %v4397_v62 = vld [vmem:[%s7362_s6 + $0x70] sm:$0xff] }
 0x167   : > { %v4814_v6 = vunpack.i.h.bf16 %v4812_v19  ;;  %v4813_v10 = vunpack.i.l.bf16 %v4812_v19  ;;  %3190 = vmatpush.bf16.msrb.mxu1 %v4397_v62 }
 0x168   : > { %v2655_v54 = vadd.f32 %v2654_v24, %v2566_v42  ;;  %v2240_v50 = vunpack.c.l.b16 %v2132_v30  ;;  %v2241_v48 = vunpack.c.h.b16 %v2132_v30  ;;  %2534 = vmatmul.bf16.gmra.mxu0 %v6794_v2  ;;  %2623 = vmatmul.bf16.gmra.mxu1 %v6796_v31  ;;  %v2242_v3 = vunpack.c.l.b16 %v2133_v39  ;;  %v6828_v42 = vpop.permute.xlu0 %4853  ;;  %v4848_v62 = vpop.permute.xlu2 %4847 }
 0x169   : > { %v1178_v47 = vmul.f32 %v4814_v6, %v5476_v59  ;;  %v1179_v53 = vmul.f32 %v4814_v6, %v5503_v40  ;;  %v1176_v0 = vmul.f32 %v4813_v10, %v5476_v59  ;;  %v1177_v17 = vmul.f32 %v4813_v10, %v5503_v40 }
 0x16a   : > { %v2243_v57 = vunpack.c.h.b16 %v2133_v39  ;;  %v1693_v24 = vmul.f32 %v4825_v46, %v5961_v36  ;;  %v6831_v19 = vpack.c.b16 %v2242_v3, %v2240_v50  ;;  %v4856_v60 = vunpack.i.h.bf16 %v6828_v42 }
 0x16b   : > { %v1242_v41 = vadd.f32 %v1178_v47, %v7595_v58  ;;  %v1243_v45 = vadd.f32 %v1179_v53, %v7596_v61  ;;  %v1240_v34 = vadd.f32 %v1176_v0, %v7597_v37  ;;  %v1241_v25 = vadd.f32 %v1177_v17, %v7598_v26 }
 0x16c   : > { %v6833_v63 = vpack.c.b16 %v2243_v57, %v2241_v48  ;;  %v4855_v38 = vunpack.i.l.bf16 %v6828_v42  ;;  %v1182_v10 = vmul.f32 %v4838_v51, %v5476_v59  ;;  %v1180_v50 = vmul.f32 %v4837_v13, %v5476_v59 }
 0x16d   : > { %v1500_v8 = vadd.f32 %v1436_v7, %v1242_v41  ;;  %v1501_v21 = vadd.f32 %v1437_v11, %v1243_v45  ;;  %v1498_v33 = vadd.f32 %v1434_v14, %v1240_v34  ;;  %v2567_v15 = vpop.f32.mrf.mxu2  ;;  %v2656_v56 = vpop.f32.mrf.mxu3  ;;  %v1499_v7 = vadd.f32 %v1435_v5, %v1241_v25 }
 0x16e   : > { %v2568_v43 = vadd.f32 %v2567_v15, %v6792_v9  ;;  %v4830_v6 = vpop.permute.xlu1 %4829  ;;  %v2904_v14 = vmax.f32 %v2655_v54, 0.0  ;;  %v1183_v5 = vmul.f32 %v4838_v51, %v5503_v40  ;;  %v1954_v37 = vmul.f32 %v4855_v38, %v5857_v52 }
 0x16f   : > { %v4832_v46 = vunpack.i.h.bf16 %v4830_v6  ;;  %v4831_v11 = vunpack.i.l.bf16 %v4830_v6  ;;  %v1756_v30 = vadd.f32 %v1692_v28, %v1498_v33  ;;  %v1758_v47 = vadd.f32 %v6799_v4, %v1500_v8  ;;  %v4388_v28 = vld [vmem:[%s7362_s6 + $0x28] sm:$0xff]  ;;  %v7599_v8 = vld [vmem:[#allocation20_spill] sm:$0xff]  ;;  %v7600_v33 = vld [vmem:[#allocation21_spill] sm:$0xff] }
 0x170   : > { %v2657_v32 = vadd.f32 %v2656_v56, %v2568_v43  ;;  %v1759_v53 = vadd.f32 %v1695_v1, %v1501_v21  ;;  %v1757_v48 = vadd.f32 %v1693_v24, %v1499_v7  ;;  %v6850_v4 = vmul.f32 %v4856_v60, %v5857_v52  ;;  %v7601_v24 = vld [vmem:[#allocation22_spill] sm:$0xff]  ;;  %3102 = vmatpush.bf16.msrb.mxu0 %v4388_v28 }
 0x171   : > { %v1952_v17 = vmul.f32 %v4832_v46, %v5857_v52  ;;  %v1953_v39 = vmul.f32 %v4832_v46, %v5860_v20  ;;  %v1950_v12 = vmul.f32 %v4831_v11, %v5857_v52  ;;  %v1951_v58 = vmul.f32 %v4831_v11, %v5860_v20 }
 0x172   : > { %v2906_v0 = vmax.f32 %v2657_v32, 0.0  ;;  %v1181_v26 = vmul.f32 %v4837_v13, %v5503_v40  ;;  %v1246_v21 = vadd.f32 %v1182_v10, %v7599_v8  ;;  %v1247_v15 = vadd.f32 %v1183_v5, %v7600_v33 }
 0x173   : > { %v2014_v41 = vadd.f32 %v1950_v12, %v1756_v30  ;;  %v2016_v54 = vadd.f32 %v1952_v17, %v1758_v47  ;;  %v2017_v61 = vadd.f32 %v1953_v39, %v1759_v53  ;;  %v2015_v34 = vadd.f32 %v1951_v58, %v1757_v48  ;;  %v7602_v30 = vld [vmem:[#allocation23_spill] sm:$0xff] }
 0x174   : > { %v6845_v45 = vpack.c.bf16 %v2906_v0, %v2904_v14  ;;  %2707 = vmatmul.bf16.gmra.mxu2 %v6756_v44  ;;  %v1244_v43 = vadd.f32 %v1180_v50, %v7601_v24  ;;  %v4850_v7 = vunpack.i.h.bf16 %v4848_v62  ;;  %v4849_v6 = vunpack.i.l.bf16 %v4848_v62 }
 0x175   : > { %v2078_v25 = vmax.f32 %v2014_v41, 0.0  ;;  %v2080_v1 = vmax.f32 %v2016_v54, 0.0  ;;  %v2081_v51 = vmax.f32 %v2017_v61, 0.0  ;;  %2796 = vmatmul.bf16.gmra.mxu3 %v6758_v49  ;;  %v2570_v3 = vpop.f32.mrf.mxu2  ;;  %v2659_v57 = vpop.f32.mrf.mxu3  ;;  %v2079_v56 = vmax.f32 %v2015_v34, 0.0 }
 0x176   : > { %v2571_v44 = vadd.f32 %v2570_v3, %v6792_v9  ;;  %v1245_v10 = vadd.f32 %v1181_v26, %v7602_v30  ;;  %v1698_v47 = vmul.f32 %v4850_v7, %v5958_v55  ;;  %v1699_v53 = vmul.f32 %v4850_v7, %v5961_v36  ;;  %v6878_v54 = vpop.permute.xlu0 %4883 }
 0x177   : > { %v4842_v13 = vpop.permute.xlu1 %4841  ;;  %v2135_v49 = vpack.c.bf16 %v2081_v51, %v2080_v1  ;;  %v2134_v14 = vpack.c.bf16 %v2079_v56, %v2078_v25  ;;  %v1696_v0 = vmul.f32 %v4849_v6, %v5958_v55  ;;  %v1697_v5 = vmul.f32 %v4849_v6, %v5961_v36  ;;  %v4396_v1 = vld [vmem:[%s7362_s6 + $0x68] sm:$0xff] }
 0x178   : > { %v6865_v32 = vadd.f32 %v2659_v57, %v2571_v44  ;;  %v4844_v46 = vunpack.i.h.bf16 %v4842_v13  ;;  %v4843_v11 = vunpack.i.l.bf16 %v4842_v13  ;;  %2539 = vmatmul.bf16.gmra.mxu0 %v6831_v19  ;;  %2628 = vmatmul.bf16.gmra.mxu1 %v6833_v63  ;;  %v1957_v51 = vmul.f32 %v4856_v60, %v5860_v20 }
 0x179   : > { %v2244_v48 = vunpack.c.l.b16 %v2134_v14  ;;  %v2246_v58 = vunpack.c.l.b16 %v2135_v49  ;;  %v2245_v41 = vunpack.c.h.b16 %v2134_v14  ;;  %v2247_v25 = vunpack.c.h.b16 %v2135_v49  ;;  %3191 = vmatpush.bf16.msrb.mxu1 %v4396_v1 }
 0x17a   : > { %v1440_v17 = vmul.f32 %v4844_v46, %v5732_v35  ;;  %v1441_v39 = vmul.f32 %v4844_v46, %v5738_v22  ;;  %v1438_v12 = vmul.f32 %v4843_v11, %v5732_v35  ;;  %v1439_v50 = vmul.f32 %v4843_v11, %v5738_v22 }
 0x17b   : > { %v1955_v3 = vmul.f32 %v4855_v38, %v5860_v20  ;;  %v6889_v8 = vpack.c.b16 %v2246_v58, %v2244_v48  ;;  %v4886_v62 = vunpack.i.h.bf16 %v6878_v54  ;;  %v6893_v60 = vpack.c.b16 %v2247_v25, %v2245_v41  ;;  %v7604_v58 = vld [vmem:[#allocation48_spill] sm:$0xff]  ;;  %v7606_v25 = vld [vmem:[#allocation46_spill] sm:$0xff] }
 0x17c   : > { %v1504_v61 = vadd.f32 %v1440_v17, %v1246_v21  ;;  %v1505_v34 = vadd.f32 %v1441_v39, %v1247_v15  ;;  %v1502_v26 = vadd.f32 %v1438_v12, %v1244_v43  ;;  %v1503_v57 = vadd.f32 %v1439_v50, %v1245_v10  ;;  %v4866_v43 = vpop.permute.xlu2 %4865  ;;  %v7603_v50 = vld [vmem:[#allocation47_spill] sm:$0xff] }
 0x17d   : > { %v2572_v28 = vpop.f32.mrf.mxu2  ;;  %v2661_v44 = vpop.f32.mrf.mxu3  ;;  %v2908_v42 = vmax.f32 %v6865_v32, 0.0  ;;  %v4868_v14 = vunpack.i.h.bf16 %v4866_v43 }
 0x17e   : > { %v1760_v21 = vadd.f32 %v1696_v0, %v1502_v26  ;;  %v1762_v33 = vadd.f32 %v1698_v47, %v1504_v61  ;;  %v1763_v15 = vadd.f32 %v1699_v53, %v1505_v34  ;;  %v2573_v56 = vadd.f32 %v2572_v28, %v6792_v9  ;;  %v7605_v61 = vld [vmem:[#allocation45_spill] sm:$0xff] }
 0x17f   : > { %v1761_v24 = vadd.f32 %v1697_v5, %v1503_v57  ;;  %v4867_v47 = vunpack.i.l.bf16 %v4866_v43  ;;  %v1445_v32 = vmul.f32 %v4868_v14, %v5738_v22 }
 0x180   : > { %v2018_v38 = vadd.f32 %v1954_v37, %v1760_v21  ;;  %v2020_v13 = vadd.f32 %v6850_v4, %v1762_v33  ;;  %v2662_v7 = vadd.f32 %v2661_v44, %v2573_v56  ;;  %v4860_v6 = vpop.permute.xlu1 %4859  ;;  %v2021_v49 = vadd.f32 %v1957_v51, %v1763_v15 }
 0x181   : > { %v4862_v46 = vunpack.i.h.bf16 %v4860_v6  ;;  %v4861_v11 = vunpack.i.l.bf16 %v4860_v6  ;;  %v2019_v30 = vadd.f32 %v1955_v3, %v1761_v24  ;;  %v1444_v4 = vmul.f32 %v4868_v14, %v5732_v35 }
 0x182   : > { %v2910_v10 = vmax.f32 %v2662_v7, 0.0  ;;  %v2082_v53 = vmax.f32 %v2018_v38, 0.0  ;;  %v1442_v12 = vmul.f32 %v4867_v47, %v5732_v35  ;;  %v2084_v5 = vmax.f32 %v2020_v13, 0.0 }
 0x183   : > { %v1186_v0 = vmul.f32 %v4862_v46, %v5476_v59  ;;  %v1187_v17 = vmul.f32 %v4862_v46, %v5503_v40  ;;  %v1184_v39 = vmul.f32 %v4861_v11, %v5476_v59  ;;  %v1185_v37 = vmul.f32 %v4861_v11, %v5503_v40 }
 0x184   : > { %2712 = vmatmul.bf16.gmra.mxu2 %v6794_v2  ;;  %v1443_v26 = vmul.f32 %v4867_v47, %v5738_v22  ;;  %v4387_v2 = vld [vmem:[%s7362_s6 + $0x20] sm:$0xff]  ;;  %v2083_v51 = vmax.f32 %v2019_v30, 0.0  ;;  %v2085_v3 = vmax.f32 %v2021_v49, 0.0  ;;  %v6914_v57 = vpack.c.bf16 %v2910_v10, %v2908_v42  ;;  %v4878_v46 = vpop.permute.xlu2 %4877 }
 0x185   : > { %2801 = vmatmul.bf16.gmra.mxu3 %v6796_v31  ;;  %v1248_v48 = vadd.f32 %v1184_v39, %v7603_v50  ;;  %v1249_v41 = vadd.f32 %v1185_v37, %v7604_v58  ;;  %v1250_v34 = vadd.f32 %v1186_v0, %v7605_v61  ;;  %v1251_v1 = vadd.f32 %v1187_v17, %v7606_v25  ;;  %v4395_v39 = vld [vmem:[%s7362_s6 + $0x60] sm:$0xff] }
 0x186   : > { %3103 = vmatpush.bf16.msrb.mxu0 %v4387_v2  ;;  %v4885_v31 = vunpack.i.l.bf16 %v6878_v54  ;;  %v2136_v15 = vpack.c.bf16 %v2083_v51, %v2082_v53  ;;  %v2137_v56 = vpack.c.bf16 %v2085_v3, %v2084_v5  ;;  %v1190_v44 = vmul.f32 %v4886_v62, %v5476_v59  ;;  %3192 = vmatpush.bf16.msrb.mxu1 %v4395_v39  ;;  %v7607_v54 = vld [vmem:[#allocation41_spill] sm:$0xff] }
 0x187   : > { %v2575_v28 = vpop.f32.mrf.mxu2  ;;  %v1506_v24 = vadd.f32 %v1442_v12, %v1248_v48  ;;  %v1507_v43 = vadd.f32 %v1443_v26, %v1249_v41  ;;  %v1508_v38 = vadd.f32 %v1444_v4, %v1250_v34  ;;  %v1509_v7 = vadd.f32 %v1445_v32, %v1251_v1 }
 0x188   : > { %v2576_v21 = vadd.f32 %v2575_v28, %v6792_v9  ;;  %v2664_v33 = vpop.f32.mrf.mxu3  ;;  %2544 = vmatmul.bf16.gmra.mxu0 %v6889_v8  ;;  %2633 = vmatmul.bf16.gmra.mxu1 %v6893_v60  ;;  %v4880_v11 = vunpack.i.h.bf16 %v4878_v46  ;;  %v4879_v14 = vunpack.i.l.bf16 %v4878_v46  ;;  %v2248_v30 = vunpack.c.l.b16 %v2136_v15 }
 0x189   : > { %v4872_v13 = vpop.permute.xlu1 %4871  ;;  %v2250_v10 = vunpack.c.l.b16 %v2137_v56  ;;  %v2249_v17 = vunpack.c.h.b16 %v2136_v15  ;;  %v1191_v41 = vmul.f32 %v4886_v62, %v5503_v40  ;;  %v2251_v2 = vunpack.c.h.b16 %v2137_v56  ;;  %v7608_v56 = vld [vmem:[#allocation42_spill] sm:$0xff] }
 0x18a   : > { %v6921_v42 = vadd.f32 %v2664_v33, %v2576_v21  ;;  %v4874_v6 = vunpack.i.h.bf16 %v4872_v13  ;;  %v4873_v49 = vunpack.i.l.bf16 %v4872_v13  ;;  %v1960_v4 = vmul.f32 %v4880_v11, %v5857_v52 }
 0x18b   : > { %v1961_v32 = vmul.f32 %v4880_v11, %v5860_v20  ;;  %v1958_v12 = vmul.f32 %v4879_v14, %v5857_v52  ;;  %v1959_v58 = vmul.f32 %v4879_v14, %v5860_v20  ;;  %v6939_v26 = vpack.c.b16 %v2250_v10, %v2248_v30 }
 0x18c   : > { %v1702_v47 = vmul.f32 %v4874_v6, %v5958_v55  ;;  %v1703_v53 = vmul.f32 %v4874_v6, %v5961_v36  ;;  %v1700_v0 = vmul.f32 %v4873_v49, %v5958_v55  ;;  %v1701_v37 = vmul.f32 %v4873_v49, %v5961_v36  ;;  %v4896_v14 = vpop.permute.xlu2 %4895 }
 0x18d   : > { %v1188_v21 = vmul.f32 %v4885_v31, %v5476_v59  ;;  %v1189_v33 = vmul.f32 %v4885_v31, %v5503_v40  ;;  %v1254_v62 = vadd.f32 %v1190_v44, %v7607_v54  ;;  %v1255_v6 = vadd.f32 %v1191_v41, %v7608_v56 }
 0x18e   : > { %v1764_v5 = vadd.f32 %v1700_v0, %v1506_v24  ;;  %v1766_v50 = vadd.f32 %v1702_v47, %v1508_v38  ;;  %v1767_v48 = vadd.f32 %v1703_v53, %v1509_v7  ;;  %v1765_v61 = vadd.f32 %v1701_v37, %v1507_v43  ;;  %v4386_v0 = vld [vmem:[%s7362_s6 + $0x18] sm:$0xff] }
 0x18f   : > { %v2577_v34 = vpop.f32.mrf.mxu2  ;;  %v6944_v24 = vpack.c.b16 %v2251_v2, %v2249_v17  ;;  %v4898_v59 = vunpack.i.h.bf16 %v4896_v14  ;;  %v4897_v40 = vunpack.i.l.bf16 %v4896_v14  ;;  %v7609_v17 = vld [vmem:[#allocation43_spill] sm:$0xff]  ;;  %3104 = vmatpush.bf16.msrb.mxu0 %v4386_v0 }
 0x190   : > { %v2578_v25 = vadd.f32 %v2577_v34, %v6792_v9  ;;  %v2666_v1 = vpop.f32.mrf.mxu3  ;;  %v2022_v51 = vadd.f32 %v1958_v12, %v1764_v5  ;;  %v2024_v3 = vadd.f32 %v1960_v4, %v1766_v50  ;;  %v2025_v28 = vadd.f32 %v1961_v32, %v1767_v48 }
 0x191   : > { %v2023_v15 = vadd.f32 %v1959_v58, %v1765_v61  ;;  %v1252_v39 = vadd.f32 %v1188_v21, %v7609_v17  ;;  %v2912_v4 = vmax.f32 %v6921_v42, 0.0  ;;  %v1706_v12 = vmul.f32 %v4898_v59, %v5958_v55 }
 0x192   : > { %v2667_v43 = vadd.f32 %v2666_v1, %v2578_v25  ;;  %v2088_v38 = vmax.f32 %v2024_v3, 0.0  ;;  %v2089_v13 = vmax.f32 %v2025_v28, 0.0  ;;  %v4890_v7 = vpop.permute.xlu1 %4889  ;;  %v2086_v49 = vmax.f32 %v2022_v51, 0.0 }
 0x193   : > { %v4892_v46 = vunpack.i.h.bf16 %v4890_v7  ;;  %v4891_v11 = vunpack.i.l.bf16 %v4890_v7  ;;  %v2087_v30 = vmax.f32 %v2023_v15, 0.0  ;;  %v1707_v5 = vmul.f32 %v4898_v59, %v5961_v36 }
 0x194   : > { %2717 = vmatmul.bf16.gmra.mxu2 %v6831_v19  ;;  %v2139_v31 = vpack.c.bf16 %v2089_v13, %v2088_v38  ;;  %v7610_v19 = vld [vmem:[#allocation44_spill] sm:$0xff]  ;;  %v2914_v32 = vmax.f32 %v2667_v43, 0.0 }
 0x195   : > { %2806 = vmatmul.bf16.gmra.mxu3 %v6833_v63  ;;  %v1448_v44 = vmul.f32 %v4892_v46, %v5732_v35  ;;  %v1449_v10 = vmul.f32 %v4892_v46, %v5738_v22  ;;  %v1446_v47 = vmul.f32 %v4891_v11, %v5732_v35  ;;  %v1447_v53 = vmul.f32 %v4891_v11, %v5738_v22 }
 0x196   : > { %v1253_v37 = vadd.f32 %v1189_v33, %v7610_v19  ;;  %v1704_v35 = vmul.f32 %v4897_v40, %v5958_v55  ;;  %v1705_v22 = vmul.f32 %v4897_v40, %v5961_v36  ;;  %v2138_v58 = vpack.c.bf16 %v2087_v30, %v2086_v49  ;;  %v4394_v33 = vld [vmem:[%s7362_s6 + $0x58] sm:$0xff]  ;;  %v4385_v19 = vld [vmem:[%s7362_s6 + $0x10] sm:$0xff] }
 0x197   : > { %v2580_v63 = vpop.f32.mrf.mxu2  ;;  %v2254_v41 = vunpack.c.l.b16 %v2139_v31  ;;  %v2255_v61 = vunpack.c.h.b16 %v2139_v31  ;;  %v1510_v34 = vadd.f32 %v1446_v47, %v1252_v39  ;;  %v1512_v42 = vadd.f32 %v1448_v44, %v1254_v62  ;;  %3193 = vmatpush.bf16.msrb.mxu1 %v4394_v33  ;;  %3105 = vmatpush.bf16.msrb.mxu0 %v4385_v19 }
 0x198   : > { %v2581_v50 = vadd.f32 %v2580_v63, %v6792_v9  ;;  %v2669_v48 = vpop.f32.mrf.mxu3  ;;  %v1511_v2 = vadd.f32 %v1447_v53, %v1253_v37  ;;  %v1513_v25 = vadd.f32 %v1449_v10, %v1255_v6  ;;  %2549 = vmatmul.bf16.gmra.mxu0 %v6939_v26  ;;  %v2252_v51 = vunpack.c.l.b16 %v2138_v58  ;;  %2638 = vmatmul.bf16.gmra.mxu1 %v6944_v24 }
 0x199   : > { %v2253_v3 = vunpack.c.h.b16 %v2138_v58  ;;  %v6966_v28 = vpack.c.bf16 %v2914_v32, %v2912_v4  ;;  %v1768_v62 = vadd.f32 %v1704_v35, %v1510_v34  ;;  %v1770_v38 = vadd.f32 %v1706_v12, %v1512_v42 }
 0x19a   : > { %v2670_v1 = vadd.f32 %v2669_v48, %v2581_v50  ;;  %v6969_v36 = vpack.c.b16 %v2254_v41, %v2252_v51  ;;  %v1769_v43 = vadd.f32 %v1705_v22, %v1511_v2  ;;  %v1771_v13 = vadd.f32 %v1707_v5, %v1513_v25  ;;  %v4393_v48 = vld [vmem:[%s7362_s6 + $0x50] sm:$0xff]  ;;  %v4384_v25 = vld [vmem:[%s7362_s6 + $0x8] sm:$0xff] }
 0x19b   : > { %v4902_v55 = vpop.permute.xlu1 %4901  ;;  %v6971_v21 = vpack.c.b16 %v2255_v61, %v2253_v3  ;;  %3194 = vmatpush.bf16.msrb.mxu1 %v4393_v48  ;;  %3106 = vmatpush.bf16.msrb.mxu0 %v4384_v25 }
 0x19c   : > { %v4904_v15 = vunpack.i.h.bf16 %v4902_v55  ;;  %v4903_v54 = vunpack.i.l.bf16 %v4902_v55  ;;  %v2916_v17 = vmax.f32 %v2670_v1, 0.0 }
 0x19e   : > { %v1964_v56 = vmul.f32 %v4904_v15, %v5857_v52  ;;  %v1965_v6 = vmul.f32 %v4904_v15, %v5860_v20  ;;  %v1962_v49 = vmul.f32 %v4903_v54, %v5857_v52  ;;  %v1963_v46 = vmul.f32 %v4903_v54, %v5860_v20 }
 0x19f   : > { %v2582_v7 = vpop.f32.mrf.mxu2 }
 0x1a0   : > { %v2583_v11 = vadd.f32 %v2582_v7, %v6792_v9  ;;  %v2671_v14 = vpop.f32.mrf.mxu3  ;;  %v2026_v30 = vadd.f32 %v1962_v49, %v1768_v62  ;;  %v2027_v59 = vadd.f32 %v1963_v46, %v1769_v43  ;;  %v2028_v40 = vadd.f32 %v1964_v56, %v1770_v38 }
 0x1a1   : > { %v2029_v31 = vadd.f32 %v1965_v6, %v1771_v13 }
 0x1a2   : > { %v2672_v44 = vadd.f32 %v2671_v14, %v2583_v11  ;;  %v2090_v10 = vmax.f32 %v2026_v30, 0.0  ;;  %v2091_v47 = vmax.f32 %v2027_v59, 0.0  ;;  %v2092_v53 = vmax.f32 %v2028_v40, 0.0  ;;  %v4391_v59 = vld [vmem:[%s7362_s6 + $0x40] sm:$0xff] }
 0x1a3   : > { %v2093_v0 = vmax.f32 %v2029_v31, 0.0 }
 0x1a4   : > { %v2918_v39 = vmax.f32 %v2672_v44, 0.0  ;;  %2722 = vmatmul.bf16.gmra.mxu2 %v6889_v8  ;;  %v2140_v52 = vpack.c.bf16 %v2091_v47, %v2090_v10 }
 0x1a5   : > { %2811 = vmatmul.bf16.gmra.mxu3 %v6893_v60  ;;  %v2141_v20 = vpack.c.bf16 %v2093_v0, %v2092_v53 }
 0x1a6   : > { %v6986_v37 = vpack.c.bf16 %v2918_v39, %v2916_v17  ;;  %v2256_v32 = vunpack.c.l.b16 %v2140_v52  ;;  %v2257_v12 = vunpack.c.h.b16 %v2140_v52 }
 0x1a7   : > { %v2585_v4 = vpop.f32.mrf.mxu2  ;;  %v2258_v63 = vunpack.c.l.b16 %v2141_v20  ;;  %v2259_v5 = vunpack.c.h.b16 %v2141_v20 }
 0x1a8   : > { %v2586_v35 = vadd.f32 %v2585_v4, %v6792_v9  ;;  %v2674_v22 = vpop.f32.mrf.mxu3  ;;  %2554 = vmatmul.bf16.gmra.mxu0 %v6969_v36  ;;  %2643 = vmatmul.bf16.gmra.mxu1 %v6971_v21 }
 0x1a9   : > { %v2306_v8 = vpack.c.b16 %v2258_v63, %v2256_v32  ;;  %v2307_v50 = vpack.c.b16 %v2259_v5, %v2257_v12 }
 0x1aa   : > { %v2675_v60 = vadd.f32 %v2674_v22, %v2586_v35 }
 0x1ac   : > { %v2920_v2 = vmax.f32 %v2675_v60, 0.0 }
 0x1af   : > { %v2587_v58 = vpop.f32.mrf.mxu2 }
 0x1b0   : > { %v2588_v41 = vadd.f32 %v2587_v58, %v6792_v9  ;;  %v2676_v61 = vpop.f32.mrf.mxu3 }
 0x1b2   : > { %v2677_v34 = vadd.f32 %v2676_v61, %v2588_v41 }
 0x1b4   : > { %v2922_v42 = vmax.f32 %v2677_v34, 0.0  ;;  %2727 = vmatmul.bf16.gmra.mxu2 %v6939_v26  ;;  %v4392_v26 = vld [vmem:[%s7362_s6 + $0x48] sm:$0xff] }
 0x1b5   : > { %2816 = vmatmul.bf16.gmra.mxu3 %v6944_v24  ;;  %v4383_v24 = vld [vmem:[%s7362_s6] sm:$0xff]  ;;  %3195 = vmatpush.bf16.msrb.mxu1 %v4392_v26  ;;  %v7612_v26 = vld [vmem:[#allocation55_spill] sm:$0xff] }
 0x1b6   : > { %v7000_v1 = vpack.c.bf16 %v2922_v42, %v2920_v2  ;;  %3107 = vmatpush.bf16.msrb.mxu0 %v4383_v24 }
 0x1b7   : > { %v2590_v51 = vpop.f32.mrf.mxu2 }
 0x1b8   : > { %v2591_v3 = vadd.f32 %v2590_v51, %v6792_v9  ;;  %v2679_v55 = vpop.f32.mrf.mxu3  ;;  %2559 = vmatmul.bf16.gmra.mxu0 %v2306_v8  ;;  %2648 = vmatmul.bf16.gmra.mxu1 %v2307_v50 }
 0x1b9   : > { %3196 = vmatpush.bf16.msrb.mxu1 %v4391_v59 }
 0x1ba   : > { %v2680_v33 = vadd.f32 %v2679_v55, %v2591_v3 }
 0x1bc   : > { %v2924_v38 = vmax.f32 %v2680_v33, 0.0  ;;  %v7611_v33 = vld [vmem:[#allocation4_spill] sm:$0xff] }
 0x1bf   : > { %v2592_v15 = vpop.f32.mrf.mxu2 }
 0x1c0   : > { %v2593_v54 = vadd.f32 %v2592_v15, %v6792_v9  ;;  %v2681_v62 = vpop.f32.mrf.mxu3 }
 0x1c2   : > { %v2682_v43 = vadd.f32 %v2681_v62, %v2593_v54 }
 0x1c3   : > { %v2525_v7 = vpop.f32.mrf.mxu0  ;;  %v2614_v49 = vpop.f32.mrf.mxu1 }
 0x1c4   : > { %v2926_v13 = vmax.f32 %v2682_v43, 0.0  ;;  %2732 = vmatmul.bf16.gmra.mxu2 %v6969_v36  ;;  %v2526_v30 = vadd.f32 %v2525_v7, %v6792_v9  ;;  %v7032_v43 = vperm.slane %v6782_v23, 1 }
 0x1c5   : > { %2821 = vmatmul.bf16.gmra.mxu3 %v6971_v21 }
 0x1c6   : > { %v7012_v56 = vpack.c.bf16 %v2926_v13, %v2924_v38  ;;  %v2615_v36 = vadd.f32 %v2614_v49, %v2526_v30 }
 0x1c7   : > { %v2595_v6 = vpop.f32.mrf.mxu2 }
 0x1c8   : > { %v2596_v46 = vadd.f32 %v2595_v6, %v6792_v9  ;;  %v2684_v11 = vpop.f32.mrf.mxu3  ;;  %v2872_v17 = vmax.f32 %v2615_v36, 0.0 }
 0x1ca   : > { %v2685_v14 = vadd.f32 %v2684_v11, %v2596_v46 }
 0x1cb   : > { %v2527_v40 = vpop.f32.mrf.mxu0  ;;  %v2616_v44 = vpop.f32.mrf.mxu1 }
 0x1cc   : > { %v2528_v21 = vadd.f32 %v2527_v40, %v6792_v9  ;;  %v2928_v52 = vmax.f32 %v2685_v14, 0.0 }
 0x1ce   : > { %v2617_v53 = vadd.f32 %v2616_v44, %v2528_v21 }
 0x1cf   : > { %v2597_v31 = vpop.f32.mrf.mxu2 }
 0x1d0   : > { %v2598_v10 = vadd.f32 %v2597_v31, %v6792_v9  ;;  %v2686_v47 = vpop.f32.mrf.mxu3  ;;  %v2874_v39 = vmax.f32 %v2617_v53, 0.0  ;;  %v7613_v53 = vld [vmem:[#allocation53_spill] sm:$0xff] }
 0x1d2   : > { %v2687_v0 = vadd.f32 %v2686_v47, %v2598_v10  ;;  %v2936_v19 = vpack.c.bf16 %v2874_v39, %v2872_v17 }
 0x1d4   : > { %v2930_v20 = vmax.f32 %v2687_v0, 0.0  ;;  %2737 = vmatmul.bf16.gmra.mxu2 %v2306_v8  ;;  %3108 = vmatmul.bf16.vlgmr.msrb.gmra.mxu0 %v2936_v19  ;;  %v7614_v0 = vld [vmem:[#allocation54_spill] sm:$0xff] }
 0x1d5   : > { %2826 = vmatmul.bf16.gmra.mxu3 %v2307_v50  ;;  %v2530_v63 = vpop.f32.mrf.mxu0  ;;  %v2619_v35 = vpop.f32.mrf.mxu1 }
 0x1d6   : > { %v7021_v4 = vpack.c.bf16 %v2930_v20, %v2928_v52  ;;  %v2531_v60 = vadd.f32 %v2530_v63, %v6792_v9 }
 0x1d7   : > { %v2600_v32 = vpop.f32.mrf.mxu2 }
 0x1d8   : > { %v2601_v12 = vadd.f32 %v2600_v32, %v6792_v9  ;;  %v2689_v5 = vpop.f32.mrf.mxu3  ;;  %v2620_v41 = vadd.f32 %v2619_v35, %v2531_v60 }
 0x1da   : > { %v2690_v22 = vadd.f32 %v2689_v5, %v2601_v12  ;;  %v2876_v51 = vmax.f32 %v2620_v41, 0.0 }
 0x1dc   : > { %v2932_v25 = vmax.f32 %v2690_v22, 0.0 }
 0x1dd   : > { %v2532_v58 = vpop.f32.mrf.mxu0  ;;  %v2621_v34 = vpop.f32.mrf.mxu1 }
 0x1de   : > { %v2533_v50 = vadd.f32 %v2532_v58, %v6792_v9 }
 0x1df   : > { %v2602_v48 = vpop.f32.mrf.mxu2 }
 0x1e0   : > { %v2603_v61 = vadd.f32 %v2602_v48, %v6792_v9  ;;  %v2691_v8 = vpop.f32.mrf.mxu3  ;;  %v2622_v42 = vadd.f32 %v2621_v34, %v2533_v50 }
 0x1e2   : > { %v2692_v2 = vadd.f32 %v2691_v8, %v2603_v61  ;;  %v2878_v55 = vmax.f32 %v2622_v42, 0.0 }
 0x1e4   : > { %v2934_v3 = vmax.f32 %v2692_v2, 0.0  ;;  %2742 = vmatmul.bf16.gmra.mxu2 %v7611_v33  ;;  %v2938_v24 = vpack.c.bf16 %v2878_v55, %v2876_v51  ;;  %v7615_v51 = vld [vmem:[#allocation14_spill] sm:$0xff] }
 0x1e5   : > { %2831 = vmatmul.bf16.gmra.mxu3 %v7612_v26  ;;  %v2535_v62 = vpop.f32.mrf.mxu0  ;;  %v2624_v13 = vpop.f32.mrf.mxu1 }
 0x1e6   : > { %v7029_v15 = vpack.c.bf16 %v2934_v3, %v2932_v25  ;;  %3113 = vmatmul.bf16.gmra.mxu0 %v2938_v24  ;;  %v2536_v6 = vadd.f32 %v2535_v62, %v6792_v9  ;;  %v7616_v3 = vld [vmem:[#allocation13_spill] sm:$0xff] }
 0x1e7   : > { %v2703_v54 = vpop.f32.mrf.mxu2 }
 0x1e8   : > { %v2792_v38 = vpop.f32.mrf.mxu3  ;;  %v2704_v7 = vadd.f32 %v2703_v54, %v7032_v43  ;;  %v2625_v14 = vadd.f32 %v2624_v13, %v2536_v6 }
 0x1ea   : > { %v2793_v11 = vadd.f32 %v2792_v38, %v2704_v7  ;;  %v2880_v44 = vmax.f32 %v2625_v14, 0.0 }
 0x1ec   : > { %v2873_v21 = vmax.f32 %v2793_v11, 0.0 }
 0x1ed   : > { %v2537_v46 = vpop.f32.mrf.mxu0  ;;  %v2626_v36 = vpop.f32.mrf.mxu1 }
 0x1ee   : > { %v2538_v40 = vadd.f32 %v2537_v46, %v6792_v9 }
 0x1ef   : > { %v2705_v49 = vpop.f32.mrf.mxu2 }
 0x1f0   : > { %v2706_v30 = vadd.f32 %v2705_v49, %v7032_v43  ;;  %v2794_v59 = vpop.f32.mrf.mxu3  ;;  %v2627_v23 = vadd.f32 %v2626_v36, %v2538_v40 }
 0x1f2   : > { %v2795_v31 = vadd.f32 %v2794_v59, %v2706_v30  ;;  %v2882_v47 = vmax.f32 %v2627_v23, 0.0 }
 0x1f4   : > { %v2875_v10 = vmax.f32 %v2795_v31, 0.0  ;;  %2747 = vmatmul.bf16.gmra.mxu2 %v7613_v53  ;;  %v2940_v39 = vpack.c.bf16 %v2882_v47, %v2880_v44  ;;  %v7618_v47 = vld [vmem:[#allocation26_spill] sm:$0xff] }
 0x1f5   : > { %2836 = vmatmul.bf16.gmra.mxu3 %v7614_v0  ;;  %v2540_v20 = vpop.f32.mrf.mxu0  ;;  %v2629_v32 = vpop.f32.mrf.mxu1 }
 0x1f6   : > { %v2937_v17 = vpack.c.bf16 %v2875_v10, %v2873_v21  ;;  %3118 = vmatmul.bf16.gmra.mxu0 %v2940_v39  ;;  %v2541_v12 = vadd.f32 %v2540_v20, %v6792_v9  ;;  %v7617_v10 = vld [vmem:[#allocation19_spill] sm:$0xff] }
 0x1f7   : > { %v2708_v52 = vpop.f32.mrf.mxu2 }
 0x1f8   : > { %v2797_v19 = vpop.f32.mrf.mxu3  ;;  %3197 = vmatmul.bf16.vlgmr.msrb.gmra.mxu1 %v2937_v17  ;;  %v2709_v63 = vadd.f32 %v2708_v52, %v7032_v43  ;;  %v2630_v60 = vadd.f32 %v2629_v32, %v2541_v12 }
 0x1fa   : > { %v2798_v22 = vadd.f32 %v2797_v19, %v2709_v63  ;;  %v2884_v2 = vmax.f32 %v2630_v60, 0.0 }
 0x1fc   : > { %v2877_v34 = vmax.f32 %v2798_v22, 0.0 }
 0x1fd   : > { %v2542_v35 = vpop.f32.mrf.mxu0  ;;  %v2631_v61 = vpop.f32.mrf.mxu1 }
 0x1fe   : > { %v2543_v41 = vadd.f32 %v2542_v35, %v6792_v9 }
 0x1ff   : > { %v2710_v5 = vpop.f32.mrf.mxu2 }
 0x200   : > { %v2711_v48 = vadd.f32 %v2710_v5, %v7032_v43  ;;  %v2799_v58 = vpop.f32.mrf.mxu3  ;;  %v2632_v50 = vadd.f32 %v2631_v61, %v2543_v41 }
 0x202   : > { %v2800_v8 = vadd.f32 %v2799_v58, %v2711_v48  ;;  %v2886_v25 = vmax.f32 %v2632_v50, 0.0 }
 0x204   : > { %v2879_v42 = vmax.f32 %v2800_v8, 0.0  ;;  %2752 = vmatmul.bf16.gmra.mxu2 %v7615_v51  ;;  %v2942_v33 = vpack.c.bf16 %v2886_v25, %v2884_v2  ;;  %v7620_v25 = vld [vmem:[#allocation24_spill] sm:$0xff] }
 0x205   : > { %2841 = vmatmul.bf16.gmra.mxu3 %v7616_v3  ;;  %v2545_v24 = vpop.f32.mrf.mxu0  ;;  %v2634_v62 = vpop.f32.mrf.mxu1 }
 0x206   : > { %v2939_v55 = vpack.c.bf16 %v2879_v42, %v2877_v34  ;;  %3123 = vmatmul.bf16.gmra.mxu0 %v2942_v33  ;;  %v2546_v13 = vadd.f32 %v2545_v24, %v6792_v9  ;;  %v7619_v42 = vld [vmem:[#allocation2_spill] sm:$0xff] }
 0x207   : > { %v2713_v26 = vpop.f32.mrf.mxu2 }
 0x208   : > { %v2802_v54 = vpop.f32.mrf.mxu3  ;;  %3202 = vmatmul.bf16.gmra.mxu1 %v2939_v55  ;;  %v2714_v38 = vadd.f32 %v2713_v26, %v7032_v43  ;;  %v2635_v46 = vadd.f32 %v2634_v62, %v2546_v13 }
 0x20a   : > { %v2803_v49 = vadd.f32 %v2802_v54, %v2714_v38  ;;  %v2888_v23 = vmax.f32 %v2635_v46, 0.0 }
 0x20c   : > { %v2881_v31 = vmax.f32 %v2803_v49, 0.0 }
 0x20d   : > { %v2547_v6 = vpop.f32.mrf.mxu0  ;;  %v2636_v59 = vpop.f32.mrf.mxu1 }
 0x20e   : > { %v2548_v30 = vadd.f32 %v2547_v6, %v6792_v9 }
 0x20f   : > { %v2715_v7 = vpop.f32.mrf.mxu2 }
 0x210   : > { %v2716_v11 = vadd.f32 %v2715_v7, %v7032_v43  ;;  %v2804_v14 = vpop.f32.mrf.mxu3  ;;  %v2637_v36 = vadd.f32 %v2636_v59, %v2548_v30 }
 0x212   : > { %v2805_v40 = vadd.f32 %v2804_v14, %v2716_v11  ;;  %v2890_v44 = vmax.f32 %v2637_v36, 0.0 }
 0x214   : > { %v2883_v21 = vmax.f32 %v2805_v40, 0.0  ;;  %2757 = vmatmul.bf16.gmra.mxu2 %v7617_v10  ;;  %v2944_v0 = vpack.c.bf16 %v2890_v44, %v2888_v23  ;;  %v7622_v44 = vld [vmem:[#allocation61_spill] sm:$0xff] }
 0x215   : > { %2846 = vmatmul.bf16.gmra.mxu3 %v7618_v47  ;;  %v2550_v39 = vpop.f32.mrf.mxu0  ;;  %v2639_v20 = vpop.f32.mrf.mxu1 }
 0x216   : > { %v2941_v53 = vpack.c.bf16 %v2883_v21, %v2881_v31  ;;  %3128 = vmatmul.bf16.gmra.mxu0 %v2944_v0  ;;  %v2551_v32 = vadd.f32 %v2550_v39, %v6792_v9  ;;  %v7621_v21 = vld [vmem:[#allocation60_spill] sm:$0xff] }
 0x217   : > { %v2718_v17 = vpop.f32.mrf.mxu2 }
 0x218   : > { %v2807_v52 = vpop.f32.mrf.mxu3  ;;  %3207 = vmatmul.bf16.gmra.mxu1 %v2941_v53  ;;  %v2719_v19 = vadd.f32 %v2718_v17, %v7032_v43  ;;  %v2640_v35 = vadd.f32 %v2639_v20, %v2551_v32 }
 0x21a   : > { %v2808_v5 = vadd.f32 %v2807_v52, %v2719_v19  ;;  %v2892_v50 = vmax.f32 %v2640_v35, 0.0 }
 0x21c   : > { %v2885_v8 = vmax.f32 %v2808_v5, 0.0 }
 0x21d   : > { %v2552_v12 = vpop.f32.mrf.mxu0  ;;  %v2641_v58 = vpop.f32.mrf.mxu1 }
 0x21e   : > { %v2553_v48 = vadd.f32 %v2552_v12, %v6792_v9 }
 0x21f   : > { %v2720_v63 = vpop.f32.mrf.mxu2 }
 0x220   : > { %v2721_v22 = vadd.f32 %v2720_v63, %v7032_v43  ;;  %v2809_v60 = vpop.f32.mrf.mxu3  ;;  %v2642_v61 = vadd.f32 %v2641_v58, %v2553_v48 }
 0x222   : > { %v2810_v41 = vadd.f32 %v2809_v60, %v2721_v22  ;;  %v2894_v2 = vmax.f32 %v2642_v61, 0.0 }
 0x224   : > { %v2887_v34 = vmax.f32 %v2810_v41, 0.0  ;;  %2762 = vmatmul.bf16.gmra.mxu2 %v7619_v42  ;;  %v2946_v3 = vpack.c.bf16 %v2894_v2, %v2892_v50 }
 0x225   : > { %2851 = vmatmul.bf16.gmra.mxu3 %v7620_v25  ;;  %v2555_v33 = vpop.f32.mrf.mxu0  ;;  %v2644_v24 = vpop.f32.mrf.mxu1 }
 0x226   : > { %v2943_v51 = vpack.c.bf16 %v2887_v34, %v2885_v8  ;;  %3133 = vmatmul.bf16.gmra.mxu0 %v2946_v3  ;;  %v2556_v62 = vadd.f32 %v2555_v33, %v6792_v9 }
 0x227   : > { %v2723_v55 = vpop.f32.mrf.mxu2 }
 0x228   : > { %v2812_v26 = vpop.f32.mrf.mxu3  ;;  %3212 = vmatmul.bf16.gmra.mxu1 %v2943_v51  ;;  %v2724_v54 = vadd.f32 %v2723_v55, %v7032_v43  ;;  %v2645_v6 = vadd.f32 %v2644_v24, %v2556_v62 }
 0x22a   : > { %v2813_v7 = vadd.f32 %v2812_v26, %v2724_v54  ;;  %v2896_v36 = vmax.f32 %v2645_v6, 0.0 }
 0x22c   : > { %v2889_v40 = vmax.f32 %v2813_v7, 0.0 }
 0x22d   : > { %v2557_v13 = vpop.f32.mrf.mxu0  ;;  %v2646_v14 = vpop.f32.mrf.mxu1 }
 0x22e   : > { %v2558_v11 = vadd.f32 %v2557_v13, %v6792_v9 }
 0x22f   : > { %v2725_v38 = vpop.f32.mrf.mxu2 }
 0x230   : > { %v2726_v49 = vadd.f32 %v2725_v38, %v7032_v43  ;;  %v2814_v46 = vpop.f32.mrf.mxu3  ;;  %v2647_v59 = vadd.f32 %v2646_v14, %v2558_v11 }
 0x232   : > { %v2815_v30 = vadd.f32 %v2814_v46, %v2726_v49  ;;  %v2898_v23 = vmax.f32 %v2647_v59, 0.0 }
 0x234   : > { %v2891_v31 = vmax.f32 %v2815_v30, 0.0  ;;  %2767 = vmatmul.bf16.gmra.mxu2 %v7621_v21  ;;  %v2948_v47 = vpack.c.bf16 %v2898_v23, %v2896_v36  ;;  %v7082_v21 = vld [vmem:[%s7363_s7] ss:$0 sm:$0xff] }
 0x235   : > { %2856 = vmatmul.bf16.gmra.mxu3 %v7622_v44  ;;  %v2560_v0 = vpop.f32.mrf.mxu0  ;;  %v2649_v39 = vpop.f32.mrf.mxu1 }
 0x236   : > { %v2945_v10 = vpack.c.bf16 %v2891_v31, %v2889_v40  ;;  %3138 = vmatmul.bf16.gmra.mxu0 %v2948_v47  ;;  %v2561_v20 = vadd.f32 %v2560_v0, %v6792_v9 }
 0x237   : > { %v2728_v53 = vpop.f32.mrf.mxu2 }
 0x238   : > { %v2817_v17 = vpop.f32.mrf.mxu3  ;;  %3217 = vmatmul.bf16.gmra.mxu1 %v2945_v10  ;;  %v2729_v52 = vadd.f32 %v2728_v53, %v7032_v43  ;;  %v2650_v12 = vadd.f32 %v2649_v39, %v2561_v20 }
 0x23a   : > { %v2818_v63 = vadd.f32 %v2817_v17, %v2729_v52  ;;  %v2900_v61 = vmax.f32 %v2650_v12, 0.0 }
 0x23c   : > { %v2893_v41 = vmax.f32 %v2818_v63, 0.0 }
 0x23d   : > { %v2562_v32 = vpop.f32.mrf.mxu0  ;;  %v2651_v60 = vpop.f32.mrf.mxu1 }
 0x23e   : > { %v2563_v22 = vadd.f32 %v2562_v32, %v6792_v9 }
 0x23f   : > { %v2730_v19 = vpop.f32.mrf.mxu2 }
 0x240   : > { %v2731_v5 = vadd.f32 %v2730_v19, %v7032_v43  ;;  %v2819_v35 = vpop.f32.mrf.mxu3  ;;  %v2652_v58 = vadd.f32 %v2651_v60, %v2563_v22 }
 0x242   : > { %v2820_v48 = vadd.f32 %v2819_v35, %v2731_v5  ;;  %v2902_v50 = vmax.f32 %v2652_v58, 0.0 }
 0x244   : > { %v2895_v8 = vmax.f32 %v2820_v48, 0.0  ;;  %2772 = vmatmul.bf16.gmra.mxu2 %v6688_v27  ;;  %v2950_v2 = vpack.c.bf16 %v2902_v50, %v2900_v61 }
 0x245   : > { %2861 = vmatmul.bf16.gmra.mxu3 %v6694_v18 }
 0x246   : > { %v2947_v34 = vpack.c.bf16 %v2895_v8, %v2893_v41  ;;  %3143 = vmatmul.bf16.gmra.mxu0 %v2950_v2 }
 0x247   : > { %v2733_v42 = vpop.f32.mrf.mxu2 }
 0x248   : > { %v2822_v25 = vpop.f32.mrf.mxu3  ;;  %3222 = vmatmul.bf16.gmra.mxu1 %v2947_v34  ;;  %v2734_v51 = vadd.f32 %v2733_v42, %v7032_v43 }
 0x24a   : > { %v2823_v3 = vadd.f32 %v2822_v25, %v2734_v51 }
 0x24c   : > { %v2897_v24 = vmax.f32 %v2823_v3, 0.0 }
 0x24f   : > { %v2735_v9 = vpop.f32.mrf.mxu2 }
 0x250   : > { %v2736_v55 = vadd.f32 %v2735_v9, %v7032_v43  ;;  %v2824_v33 = vpop.f32.mrf.mxu3 }
 0x251   : > { %v3109_v27 = vpop.f32.mrf.mxu0 }
 0x252   : > { %v2825_v26 = vadd.f32 %v2824_v33, %v2736_v55  ;;  %v3110_v0 = vadd.f32 %v7082_v21, %v3109_v27 }
 0x254   : > { %v2899_v54 = vmax.f32 %v2825_v26, 0.0  ;;  %2777 = vmatmul.bf16.gmra.mxu2 %v6740_v16 }
 0x255   : > { %2866 = vmatmul.bf16.gmra.mxu3 %v6742_v29 }
 0x256   : > { %v2949_v18 = vpack.c.bf16 %v2899_v54, %v2897_v24  ;;  %3148 = vmatmul.bf16.gmra.mxu0 %v6845_v45 }
 0x257   : > { %v2738_v62 = vpop.f32.mrf.mxu2 }
 0x258   : > { %v2827_v38 = vpop.f32.mrf.mxu3  ;;  %3227 = vmatmul.bf16.gmra.mxu1 %v2949_v18  ;;  %v2739_v13 = vadd.f32 %v2738_v62, %v7032_v43 }
 0x259   : > { %v3111_v7 = vpop.f32.mrf.mxu0 }
 0x25a   : > { %v2828_v49 = vadd.f32 %v2827_v38, %v2739_v13  ;;  %v3112_v35 = vadd.f32 %v7082_v21, %v3111_v7 }
 0x25c   : > { %v2901_v30 = vmax.f32 %v2828_v49, 0.0 }
 0x25f   : > { %v2740_v6 = vpop.f32.mrf.mxu2 }
 0x260   : > { %v2741_v46 = vadd.f32 %v2740_v6, %v7032_v43  ;;  %v2829_v11 = vpop.f32.mrf.mxu3 }
 0x262   : > { %v2830_v14 = vadd.f32 %v2829_v11, %v2741_v46 }
 0x263   : > { %v3114_v59 = vpop.f32.mrf.mxu0 }
 0x264   : > { %v2903_v16 = vmax.f32 %v2830_v14, 0.0  ;;  %v3115_v51 = vadd.f32 %v7082_v21, %v3114_v59 }
 0x266   : > { %v2951_v40 = vpack.c.bf16 %v2903_v16, %v2901_v30  ;;  %3153 = vmatmul.bf16.gmra.mxu0 %v6914_v57 }
 0x267   : > { %v2743_v29 = vpop.f32.mrf.mxu2 }
 0x268   : > { %v2832_v36 = vpop.f32.mrf.mxu3  ;;  %3232 = vmatmul.bf16.gmra.mxu1 %v2951_v40  ;;  %v2744_v45 = vadd.f32 %v2743_v29, %v7032_v43 }
 0x26a   : > { %v2833_v44 = vadd.f32 %v2832_v36, %v2744_v45 }
 0x26b   : > { %v3116_v31 = vpop.f32.mrf.mxu0 }
 0x26c   : > { %v2905_v17 = vmax.f32 %v2833_v44, 0.0  ;;  %v3117_v6 = vadd.f32 %v7082_v21, %v3116_v31 }
 0x26f   : > { %v2745_v23 = vpop.f32.mrf.mxu2 }
 0x270   : > { %v2746_v10 = vadd.f32 %v2745_v23, %v7032_v43  ;;  %v2834_v47 = vpop.f32.mrf.mxu3 }
 0x272   : > { %v2835_v53 = vadd.f32 %v2834_v47, %v2746_v10 }
 0x273   : > { %v7086_v57 = vpop.f32.mrf.mxu0 }
 0x274   : > { %v2907_v39 = vmax.f32 %v2835_v53, 0.0 }
 0x275   : > { %v3198_v52 = vpop.f32.mrf.mxu1 }
 0x276   : > { %v2953_v20 = vpack.c.bf16 %v2907_v39, %v2905_v17  ;;  %v3199_v19 = vadd.f32 %v3198_v52, %v3110_v0  ;;  %3158 = vmatmul.bf16.gmra.mxu0 %v6966_v28  ;;  %v3120_v39 = vadd.f32 %v7082_v21, %v7086_v57 }
 0x277   : > { %v2748_v32 = vpop.f32.mrf.mxu2 }
 0x278   : > { %v4313_v63 = vmul.f32 -5.0, %v3199_v19  ;;  %v2837_v12 = vpop.f32.mrf.mxu3  ;;  %3237 = vmatmul.bf16.gmra.mxu1 %v2953_v20  ;;  %v2749_v22 = vadd.f32 %v2748_v32, %v7032_v43 }
 0x27a   : > { %v3342_v5 = vmul.f32 1.442695, %v4313_v63  ;;  %v2838_v61 = vadd.f32 %v2837_v12, %v2749_v22 }
 0x27b   : > { %v7091_v48 = vpop.f32.mrf.mxu0 }
 0x27c   : > { %4907 = vpow2.f32 %v3342_v5  ;;  %v2909_v9 = vmax.f32 %v2838_v61, 0.0 }
 0x27d   : > { %v3200_v60 = vpop.f32.mrf.mxu1 }
 0x27e   : > { %v3201_v58 = vadd.f32 %v3200_v60, %v3112_v35 }
 0x27f   : > { %v2750_v41 = vpop.f32.mrf.mxu2 }
 0x280   : > { %v4314_v8 = vmul.f32 -5.0, %v3201_v58  ;;  %v2751_v50 = vadd.f32 %v2750_v41, %v7032_v43  ;;  %v2839_v34 = vpop.f32.mrf.mxu3 }
 0x282   : > { %v4908_v2 = vpop.eup %4907  ;;  %v3344_v42 = vmul.f32 1.442695, %v4314_v8  ;;  %v2840_v25 = vadd.f32 %v2839_v34, %v2751_v50 }
 0x283   : > { %v3406_v28 = vadd.f32 1.0, %v4908_v2  ;;  %v7095_v33 = vpop.f32.mrf.mxu0 }
 0x284   : > { %4909 = vpow2.f32 %v3344_v42  ;;  %v2911_v3 = vmax.f32 %v2840_v25, 0.0 }
 0x285   : > { %4911 = vrcp.f32 %v3406_v28  ;;  %v3203_v55 = vpop.f32.mrf.mxu1  ;;  %v3449_v59 = vand.u32 2147483648, %v3406_v28  ;;  %vm3443_vm9 = vweird.f32 %v3406_v28 }
 0x286   : > { %v2955_v26 = vpack.c.bf16 %v2911_v3, %v2909_v9  ;;  %v3204_v24 = vadd.f32 %v3203_v55, %v3115_v51  ;;  %3163 = vmatmul.bf16.gmra.mxu0 %v6986_v37  ;;  %v3447_v37 = vand.u32 2147483647, %v3406_v28  ;;  %v3122_v9 = vadd.f32 %v7082_v21, %v7091_v48 }
 0x287   : > { %v2753_v54 = vpop.f32.mrf.mxu2  ;;  %v3450_v17 = vor.u32 1.1754944e-38, %v3449_v59 }
 0x288   : > { %v4315_v27 = vmul.f32 -5.0, %v3204_v24  ;;  %v2842_v18 = vpop.f32.mrf.mxu3  ;;  %3242 = vmatmul.bf16.gmra.mxu1 %v2955_v26  ;;  %v2754_v30 = vadd.f32 %v2753_v54, %v7032_v43  ;;  %vm3448_vm12 = vcmp.eq.f32.partialorder %v3447_v37, 8.507059e+37 }
 0x28a   : > { %v4910_v62 = vpop.eup %4909  ;;  %v3346_v38 = vmul.f32 1.442695, %v4315_v27  ;;  %v2843_v10 = vadd.f32 %v2842_v18, %v2754_v30 }
 0x28b   : > { %v4912_v13 = vpop.eup %4911  ;;  %v7098_v7 = vadd.f32 1.0, %v4910_v62  ;;  %v7102_v11 = vpop.f32.mrf.mxu0 }
 0x28c   : > { %v3439_v49 = vmul.f32 %v4912_v13, %v3406_v28  ;;  %4913 = vpow2.f32 %v3346_v38  ;;  %vm3444_vm8 = vweird.f32 %v4912_v13  ;;  %v2913_v35 = vmax.f32 %v2843_v10, 0.0 }
 0x28d   : > { %4915 = vrcp.f32 %v7098_v7  ;;  %v3205_v46 = vpop.f32.mrf.mxu1  ;;  %vm3445_vm10 = vmor %vm3443_vm9, %vm3444_vm8  ;;  %v3462_v57 = vand.u32 2147483647, %v7098_v7  ;;  %v3464_v58 = vand.u32 2147483648, %v7098_v7  ;;  %vm3458_vm14 = vweird.f32 %v7098_v7 }
 0x28e   : > { %v3440_v14 = vsub.f32 1.0, %v3439_v49  ;;  %v3206_v16 = vadd.f32 %v3205_v46, %v3117_v6 }
 0x28f   : > { %v2755_v40 = vpop.f32.mrf.mxu2  ;;  %v3465_v51 = vor.u32 1.1754944e-38, %v3464_v58  ;;  %vm3463_vm0 = vcmp.eq.f32.partialorder %v3462_v57, 8.507059e+37 }
 0x290   : > { %v3441_v29 = vmul.f32 %v4912_v13, %v3440_v14  ;;  %v4316_v36 = vmul.f32 -5.0, %v3206_v16  ;;  %v2756_v45 = vadd.f32 %v2755_v40, %v7032_v43  ;;  %v2844_v31 = vpop.f32.mrf.mxu3 }
 0x292   : > { %v4914_v23 = vpop.eup %4913  ;;  %v3442_v44 = vadd.f32 %v4912_v13, %v3441_v29  ;;  %v3348_v47 = vmul.f32 1.442695, %v4316_v36  ;;  %v2845_v53 = vadd.f32 %v2844_v31, %v2756_v45  ;;  %v3125_v36 = vadd.f32 %v7082_v21, %v7095_v33 }
 0x293   : > { %v4916_v0 = vpop.eup %4915  ;;  %v7115_v52 = vadd.f32 1.0, %v4914_v23  ;;  %v7119_v12 = vpop.f32.mrf.mxu0 }
 0x294   : > { %v3446_v20 = vsel %vm3445_vm10, %v4912_v13, %v3442_v44  ;;  %v3454_v19 = vmul.f32 %v4916_v0, %v7098_v7  ;;  %4917 = vpow2.f32 %v3348_v47  ;;  %v2915_v22 = vmax.f32 %v2845_v53, 0.0 }
 0x295   : > { %v3451_v32 = vsel %vm3448_vm12, %v3450_v17, %v3446_v20  ;;  %4919 = vrcp.f32 %v7115_v52  ;;  %v3208_v63 = vpop.f32.mrf.mxu1  ;;  %vm3459_vm13 = vweird.f32 %v4916_v0  ;;  %v3477_v48 = vand.u32 2147483647, %v7115_v52 }
 0x296   : > { %3919 = vst.msk [vmem:[%s7111_s20] sm:$0xff] %vm3918_vm11, %v3451_v32  ;;  %v3455_v5 = vsub.f32 1.0, %v3454_v19  ;;  %v3209_v60 = vadd.f32 %v3208_v63, %v3120_v39  ;;  %v2957_v8 = vpack.c.bf16 %v2915_v22, %v2913_v35  ;;  %3168 = vmatmul.bf16.gmra.mxu0 %v7000_v1  ;;  %vm3460_vm15 = vmor %vm3458_vm14, %vm3459_vm13  ;;  %v3479_v38 = vand.u32 2147483648, %v7115_v52 }
 0x297   : > { %v2758_v41 = vpop.f32.mrf.mxu2  ;;  %vm3473_vm2 = vweird.f32 %v7115_v52  ;;  %vm3478_vm4 = vcmp.eq.f32.partialorder %v3477_v48, 8.507059e+37 }
 0x298   : > { %v3456_v61 = vmul.f32 %v4916_v0, %v3455_v5  ;;  %v4317_v50 = vmul.f32 -5.0, %v3209_v60  ;;  %v2847_v34 = vpop.f32.mrf.mxu3  ;;  %3247 = vmatmul.bf16.gmra.mxu1 %v2957_v8  ;;  %v2759_v18 = vadd.f32 %v2758_v41, %v7032_v43  ;;  %v3480_v29 = vor.u32 1.1754944e-38, %v3479_v38 }
 0x299   : > { %v3127_v41 = vadd.f32 %v7082_v21, %v7102_v11 }
 0x29a   : > { %v4918_v2 = vpop.eup %4917  ;;  %v3457_v42 = vadd.f32 %v4916_v0, %v3456_v61  ;;  %v3350_v25 = vmul.f32 1.442695, %v4317_v50  ;;  %v2848_v16 = vadd.f32 %v2847_v34, %v2759_v18 }
 0x29b   : > { %v4920_v28 = vpop.eup %4919  ;;  %v7129_v3 = vadd.f32 1.0, %v4918_v2  ;;  %v7133_v54 = vpop.f32.mrf.mxu0 }
 0x29c   : > { %v3461_v55 = vsel %vm3460_vm15, %v4916_v0, %v3457_v42  ;;  %v3469_v26 = vmul.f32 %v4920_v28, %v7115_v52  ;;  %4921 = vpow2.f32 %v3350_v25  ;;  %vm3474_vm1 = vweird.f32 %v4920_v28 }
 0x29d   : > { %v3466_v1 = vsel %vm3463_vm0, %v3465_v51, %v3461_v55  ;;  %4923 = vrcp.f32 %v7129_v3  ;;  %v3210_v24 = vpop.f32.mrf.mxu1  ;;  %vm3475_vm3 = vmor %vm3473_vm2, %vm3474_vm1  ;;  %v2917_v0 = vmax.f32 %v2848_v16, 0.0  ;;  %v3492_v33 = vand.u32 2147483647, %v7129_v3 }
 0x29e   : > { %3920 = vst.msk [vmem:[%s7111_s20 + $0x8] sm:$0xff] %vm3918_vm11, %v3466_v1  ;;  %v3470_v27 = vsub.f32 1.0, %v3469_v26  ;;  %v3211_v62 = vadd.f32 %v3210_v24, %v3122_v9  ;;  %v3494_v52 = vand.u32 2147483648, %v7129_v3  ;;  %vm3488_vm6 = vweird.f32 %v7129_v3 }
 0x29f   : > { %v2760_v13 = vpop.f32.mrf.mxu2  ;;  %vm3493_vm8 = vcmp.eq.f32.partialorder %v3492_v33, 8.507059e+37 }
 0x2a0   : > { %v3471_v7 = vmul.f32 %v4920_v28, %v3470_v27  ;;  %v4318_v6 = vmul.f32 -5.0, %v3211_v62  ;;  %v2761_v49 = vadd.f32 %v2760_v13, %v7032_v43  ;;  %v2849_v46 = vpop.f32.mrf.mxu3  ;;  %v3495_v58 = vor.u32 1.1754944e-38, %v3494_v52 }
 0x2a1   : > { %v3132_v52 = vadd.f32 %v7082_v21, %v7133_v54 }
 0x2a2   : > { %v4922_v14 = vpop.eup %4921  ;;  %v3472_v30 = vadd.f32 %v4920_v28, %v3471_v7  ;;  %v3352_v37 = vmul.f32 1.442695, %v4318_v6  ;;  %v2850_v59 = vadd.f32 %v2849_v46, %v2761_v49  ;;  %v3130_v7 = vadd.f32 %v7082_v21, %v7119_v12 }
 0x2a3   : > { %v4924_v40 = vpop.eup %4923  ;;  %v7144_v45 = vadd.f32 1.0, %v4922_v14  ;;  %v7148_v47 = vpop.f32.mrf.mxu0 }
 0x2a4   : > { %v3476_v31 = vsel %vm3475_vm3, %v4920_v28, %v3472_v30  ;;  %v3484_v23 = vmul.f32 %v4924_v40, %v7129_v3  ;;  %4925 = vpow2.f32 %v3352_v37  ;;  %v2919_v17 = vmax.f32 %v2850_v59, 0.0 }
 0x2a5   : > { %v3481_v44 = vsel %vm3478_vm4, %v3480_v29, %v3476_v31  ;;  %4927 = vrcp.f32 %v7144_v45  ;;  %v3213_v10 = vpop.f32.mrf.mxu1  ;;  %vm3489_vm5 = vweird.f32 %v4924_v40  ;;  %v3507_v11 = vand.u32 2147483647, %v7144_v45 }
 0x2a6   : > { %3921 = vst.msk [vmem:[%s7111_s20 + $0x10] sm:$0xff] %vm3918_vm11, %v3481_v44  ;;  %v3485_v53 = vsub.f32 1.0, %v3484_v23  ;;  %v3214_v39 = vadd.f32 %v3213_v10, %v3125_v36  ;;  %v2959_v32 = vpack.c.bf16 %v2919_v17, %v2917_v0  ;;  %3173 = vmatmul.bf16.gmra.mxu0 %v7012_v56  ;;  %vm3490_vm7 = vmor %vm3488_vm6, %vm3489_vm5  ;;  %v3509_v51 = vand.u32 2147483648, %v7144_v45 }
 0x2a7   : > { %v2763_v20 = vpop.f32.mrf.mxu2  ;;  %vm3503_vm10 = vweird.f32 %v7144_v45  ;;  %vm3508_vm13 = vcmp.eq.f32.partialorder %v3507_v11, 8.507059e+37 }
 0x2a8   : > { %v3486_v19 = vmul.f32 %v4924_v40, %v3485_v53  ;;  %v4319_v63 = vmul.f32 -5.0, %v3214_v39  ;;  %v2852_v5 = vpop.f32.mrf.mxu3  ;;  %3252 = vmatmul.bf16.gmra.mxu1 %v2959_v32  ;;  %v2764_v25 = vadd.f32 %v2763_v20, %v7032_v43  ;;  %v3510_v13 = vor.u32 1.1754944e-38, %v3509_v51 }
 0x2aa   : > { %v4926_v35 = vpop.eup %4925  ;;  %v3487_v22 = vadd.f32 %v4924_v40, %v3486_v19  ;;  %v3354_v60 = vmul.f32 1.442695, %v4319_v63  ;;  %v2853_v18 = vadd.f32 %v2852_v5, %v2764_v25 }
 0x2ab   : > { %v4928_v57 = vpop.eup %4927  ;;  %v7158_v61 = vadd.f32 1.0, %v4926_v35  ;;  %v7162_v2 = vpop.f32.mrf.mxu0 }
 0x2ac   : > { %v3491_v8 = vsel %vm3490_vm7, %v4924_v40, %v3487_v22  ;;  %v3499_v50 = vmul.f32 %v4928_v57, %v7144_v45  ;;  %4929 = vpow2.f32 %v3354_v60  ;;  %vm3504_vm9 = vweird.f32 %v4928_v57 }
 0x2ad   : > { %v3496_v56 = vsel %vm3493_vm8, %v3495_v58, %v3491_v8  ;;  %4931 = vrcp.f32 %v7158_v61  ;;  %v3215_v34 = vpop.f32.mrf.mxu1  ;;  %vm3505_vm12 = vmor %vm3503_vm10, %vm3504_vm9  ;;  %v2921_v59 = vmax.f32 %v2853_v18, 0.0  ;;  %v3522_v12 = vand.u32 2147483647, %v7158_v61 }
 0x2ae   : > { %3922 = vst.msk [vmem:[%s7111_s20 + $0x18] sm:$0xff] %vm3918_vm11, %v3496_v56  ;;  %v3500_v42 = vsub.f32 1.0, %v3499_v50  ;;  %v3216_v28 = vadd.f32 %v3215_v34, %v3127_v41  ;;  %v3524_v36 = vand.u32 2147483648, %v7158_v61  ;;  %vm3518_vm15 = vweird.f32 %v7158_v61 }
 0x2af   : > { %v2765_v9 = vpop.f32.mrf.mxu2  ;;  %vm3523_vm1 = vcmp.eq.f32.partialorder %v3522_v12, 8.507059e+37  ;;  %v3137_v12 = vadd.f32 %v7082_v21, %v7162_v2 }
 0x2b0   : > { %v3501_v3 = vmul.f32 %v4928_v57, %v3500_v42  ;;  %v4320_v55 = vmul.f32 -5.0, %v3216_v28  ;;  %v2766_v26 = vadd.f32 %v2765_v9, %v7032_v43  ;;  %v2854_v1 = vpop.f32.mrf.mxu3  ;;  %v3525_v33 = vor.u32 1.1754944e-38, %v3524_v36 }
 0x2b1   : > { %v3135_v9 = vadd.f32 %v7082_v21, %v7148_v47 }
 0x2b2   : > { %v4930_v24 = vpop.eup %4929  ;;  %v3502_v27 = vadd.f32 %v4928_v57, %v3501_v3  ;;  %v3356_v62 = vmul.f32 1.442695, %v4320_v55  ;;  %v2855_v48 = vadd.f32 %v2854_v1, %v2766_v26 }
 0x2b3   : > { %v4932_v38 = vpop.eup %4931  ;;  %v7173_v6 = vadd.f32 1.0, %v4930_v24  ;;  %v7177_v16 = vpop.f32.mrf.mxu0 }
 0x2b4   : > { %v3506_v49 = vsel %vm3505_vm12, %v4928_v57, %v3502_v27  ;;  %v3514_v46 = vmul.f32 %v4932_v38, %v7158_v61  ;;  %4933 = vpow2.f32 %v3356_v62  ;;  %v2923_v40 = vmax.f32 %v2855_v48, 0.0 }
 0x2b5   : > { %v3511_v14 = vsel %vm3508_vm13, %v3510_v13, %v3506_v49  ;;  %4935 = vrcp.f32 %v7173_v6  ;;  %v3218_v30 = vpop.f32.mrf.mxu1  ;;  %vm3519_vm14 = vweird.f32 %v4932_v38  ;;  %v3537_v54 = vand.u32 2147483647, %v7173_v6 }
 0x2b6   : > { %3923 = vst.msk [vmem:[%s7111_s20 + $0x20] sm:$0xff] %vm3918_vm11, %v3511_v14  ;;  %v3515_v37 = vsub.f32 1.0, %v3514_v46  ;;  %v3219_v29 = vadd.f32 %v3218_v30, %v3130_v7  ;;  %v2961_v23 = vpack.c.bf16 %v2923_v40, %v2921_v59  ;;  %3178 = vmatmul.bf16.gmra.mxu0 %v7021_v4  ;;  %vm3520_vm0 = vmor %vm3518_vm15, %vm3519_vm14  ;;  %v3539_v57 = vand.u32 2147483648, %v7173_v6 }
 0x2b7   : > { %v2768_v45 = vpop.f32.mrf.mxu2  ;;  %vm3533_vm3 = vweird.f32 %v7173_v6  ;;  %vm3538_vm5 = vcmp.eq.f32.partialorder %v3537_v54, 8.507059e+37 }
 0x2b8   : > { %v3516_v31 = vmul.f32 %v4932_v38, %v3515_v37  ;;  %v4321_v44 = vmul.f32 -5.0, %v3219_v29  ;;  %v2857_v10 = vpop.f32.mrf.mxu3  ;;  %3257 = vmatmul.bf16.gmra.mxu1 %v2961_v23  ;;  %v2769_v22 = vadd.f32 %v2768_v45, %v7032_v43  ;;  %v3540_v51 = vor.u32 1.1754944e-38, %v3539_v57 }
 0x2b9   : > { %v3140_v57 = vadd.f32 %v7082_v21, %v7177_v16 }
 0x2ba   : > { %v4934_v53 = vpop.eup %4933  ;;  %v3517_v0 = vadd.f32 %v4932_v38, %v3516_v31  ;;  %v3358_v17 = vmul.f32 1.442695, %v4321_v44  ;;  %v2858_v42 = vadd.f32 %v2857_v10, %v2769_v22 }
 0x2bb   : > { %v4936_v39 = vpop.eup %4935  ;;  %v7187_v20 = vadd.f32 1.0, %v4934_v53  ;;  %v7191_v5 = vpop.f32.mrf.mxu0 }
 0x2bc   : > { %v3521_v19 = vsel %vm3520_vm0, %v4932_v38, %v3517_v0  ;;  %v3529_v32 = vmul.f32 %v4936_v39, %v7173_v6  ;;  %4937 = vpow2.f32 %v3358_v17  ;;  %vm3534_vm2 = vweird.f32 %v4936_v39 }
 0x2bd   : > { %v3526_v4 = vsel %vm3523_vm1, %v3525_v33, %v3521_v19  ;;  %4939 = vrcp.f32 %v7187_v20  ;;  %v3220_v63 = vpop.f32.mrf.mxu1  ;;  %vm3535_vm4 = vmor %vm3533_vm3, %vm3534_vm2  ;;  %v2925_v62 = vmax.f32 %v2858_v42, 0.0  ;;  %v3552_v47 = vand.u32 2147483647, %v7187_v20 }
 0x2be   : > { %3924 = vst.msk [vmem:[%s7111_s20 + $0x28] sm:$0xff] %vm3918_vm11, %v3526_v4  ;;  %v3530_v35 = vsub.f32 1.0, %v3529_v32  ;;  %v3221_v60 = vadd.f32 %v3220_v63, %v3132_v52  ;;  %v3554_v13 = vand.u32 2147483648, %v7187_v20  ;;  %vm3548_vm7 = vweird.f32 %v7187_v20 }
 0x2bf   : > { %v2770_v58 = vpop.f32.mrf.mxu2  ;;  %vm3553_vm9 = vcmp.eq.f32.partialorder %v3552_v47, 8.507059e+37 }
 0x2c0   : > { %v3531_v41 = vmul.f32 %v4936_v39, %v3530_v35  ;;  %v4322_v61 = vmul.f32 -5.0, %v3221_v60  ;;  %v2771_v8 = vadd.f32 %v2770_v58, %v7032_v43  ;;  %v2859_v50 = vpop.f32.mrf.mxu3  ;;  %v3555_v29 = vor.u32 1.1754944e-38, %v3554_v13 }
 0x2c2   : > { %v4938_v56 = vpop.eup %4937  ;;  %v3532_v34 = vadd.f32 %v4936_v39, %v3531_v41  ;;  %v3360_v25 = vmul.f32 1.442695, %v4322_v61  ;;  %v2860_v28 = vadd.f32 %v2859_v50, %v2771_v8 }
 0x2c3   : > { %v4940_v11 = vpop.eup %4939  ;;  %v7202_v3 = vadd.f32 1.0, %v4938_v56  ;;  %v7206_v27 = vpop.f32.mrf.mxu0 }
 0x2c4   : > { %v3536_v55 = vsel %vm3535_vm4, %v4936_v39, %v3532_v34  ;;  %v3544_v26 = vmul.f32 %v4940_v11, %v7187_v20  ;;  %4941 = vpow2.f32 %v3360_v25  ;;  %v2927_v48 = vmax.f32 %v2860_v28, 0.0 }
 0x2c5   : > { %v3541_v1 = vsel %vm3538_vm5, %v3540_v51, %v3536_v55  ;;  %4943 = vrcp.f32 %v7202_v3  ;;  %v3223_v24 = vpop.f32.mrf.mxu1  ;;  %vm3549_vm6 = vweird.f32 %v4940_v11  ;;  %v3567_v2 = vand.u32 2147483647, %v7202_v3 }
 0x2c6   : > { %3925 = vst.msk [vmem:[%s7111_s20 + $0x30] sm:$0xff] %vm3918_vm11, %v3541_v1  ;;  %v3545_v18 = vsub.f32 1.0, %v3544_v26  ;;  %v3224_v38 = vadd.f32 %v3223_v24, %v3135_v9  ;;  %v2963_v49 = vpack.c.bf16 %v2927_v48, %v2925_v62  ;;  %3183 = vmatmul.bf16.gmra.mxu0 %v7029_v15  ;;  %vm3550_vm8 = vmor %vm3548_vm7, %vm3549_vm6  ;;  %v3569_v17 = vand.u32 2147483648, %v7202_v3 }
 0x2c7   : > { %v2773_v7 = vpop.f32.mrf.mxu2  ;;  %vm3563_vm12 = vweird.f32 %v7202_v3  ;;  %vm3568_vm14 = vcmp.eq.f32.partialorder %v3567_v2, 8.507059e+37 }
 0x2c8   : > { %v3546_v6 = vmul.f32 %v4940_v11, %v3545_v18  ;;  %v4323_v46 = vmul.f32 -5.0, %v3224_v38  ;;  %v2862_v14 = vpop.f32.mrf.mxu3  ;;  %3262 = vmatmul.bf16.gmra.mxu1 %v2963_v49  ;;  %v2774_v53 = vadd.f32 %v2773_v7, %v7032_v43  ;;  %v3570_v54 = vor.u32 1.1754944e-38, %v3569_v17 }
 0x2c9   : > { %v3142_v38 = vadd.f32 %v7082_v21, %v7191_v5  ;;  %v3145_v17 = vadd.f32 %v7082_v21, %v7206_v27 }
 0x2ca   : > { %v4942_v30 = vpop.eup %4941  ;;  %v3547_v37 = vadd.f32 %v4940_v11, %v3546_v6  ;;  %v3362_v59 = vmul.f32 1.442695, %v4323_v46  ;;  %v2863_v63 = vadd.f32 %v2862_v14, %v2774_v53 }
 0x2cb   : > { %v4944_v40 = vpop.eup %4943  ;;  %v7216_v36 = vadd.f32 1.0, %v4942_v30  ;;  %v7220_v44 = vpop.f32.mrf.mxu0 }
 0x2cc   : > { %v3551_v45 = vsel %vm3550_vm8, %v4940_v11, %v3547_v37  ;;  %v3559_v31 = vmul.f32 %v4944_v40, %v7202_v3  ;;  %4945 = vpow2.f32 %v3362_v59  ;;  %vm3564_vm10 = vweird.f32 %v4944_v40 }
 0x2cd   : > { %v3556_v15 = vsel %vm3553_vm9, %v3555_v29, %v3551_v45  ;;  %4947 = vrcp.f32 %v7216_v36  ;;  %v3225_v23 = vpop.f32.mrf.mxu1  ;;  %vm3565_vm13 = vmor %vm3563_vm12, %vm3564_vm10  ;;  %v2929_v42 = vmax.f32 %v2863_v63, 0.0  ;;  %v3582_v16 = vand.u32 2147483647, %v7216_v36 }
 0x2ce   : > { %3926 = vst.msk [vmem:[%s7111_s20 + $0x38] sm:$0xff] %vm3918_vm11, %v3556_v15  ;;  %v3560_v10 = vsub.f32 1.0, %v3559_v31  ;;  %v3226_v0 = vadd.f32 %v3225_v23, %v3137_v12  ;;  %v3584_v11 = vand.u32 2147483648, %v7216_v36  ;;  %vm3578_vm0 = vweird.f32 %v7216_v36 }
 0x2cf   : > { %v2775_v39 = vpop.f32.mrf.mxu2  ;;  %vm3583_vm2 = vcmp.eq.f32.partialorder %v3582_v16, 8.507059e+37 }
 0x2d0   : > { %v3561_v33 = vmul.f32 %v4944_v40, %v3560_v10  ;;  %v4324_v52 = vmul.f32 -5.0, %v3226_v0  ;;  %v2776_v20 = vadd.f32 %v2775_v39, %v7032_v43  ;;  %v2864_v19 = vpop.f32.mrf.mxu3  ;;  %v3585_v48 = vor.u32 1.1754944e-38, %v3584_v11 }
 0x2d2   : > { %v4946_v32 = vpop.eup %4945  ;;  %v3562_v4 = vadd.f32 %v4944_v40, %v3561_v33  ;;  %v3364_v35 = vmul.f32 1.442695, %v4324_v52  ;;  %v2865_v22 = vadd.f32 %v2864_v19, %v2776_v20 }
 0x2d3   : > { %v4948_v60 = vpop.eup %4947  ;;  %v7231_v58 = vadd.f32 1.0, %v4946_v32  ;;  %v7235_v56 = vpop.f32.mrf.mxu0 }
 0x2d4   : > { %v3566_v41 = vsel %vm3565_vm13, %v4944_v40, %v3562_v4  ;;  %v3574_v61 = vmul.f32 %v4948_v60, %v7216_v36  ;;  %4949 = vpow2.f32 %v3364_v35  ;;  %v2931_v25 = vmax.f32 %v2865_v22, 0.0 }
 0x2d5   : > { %v3571_v8 = vsel %vm3568_vm14, %v3570_v54, %v3566_v41  ;;  %4951 = vrcp.f32 %v7231_v58  ;;  %v3228_v50 = vpop.f32.mrf.mxu1  ;;  %vm3579_vm15 = vweird.f32 %v4948_v60  ;;  %v3597_v5 = vand.u32 2147483647, %v7231_v58 }
 0x2d6   : > { %3927 = vst.msk [vmem:[%s7111_s20 + $0x40] sm:$0xff] %vm3918_vm11, %v3571_v8  ;;  %v3575_v34 = vsub.f32 1.0, %v3574_v61  ;;  %v3229_v28 = vadd.f32 %v3228_v50, %v3140_v57  ;;  %v2965_v3 = vpack.c.bf16 %v2931_v25, %v2929_v42  ;;  %vm3580_vm1 = vmor %vm3578_vm0, %vm3579_vm15  ;;  %v3599_v59 = vand.u32 2147483648, %v7231_v58 }
 0x2d7   : > { %v2778_v51 = vpop.f32.mrf.mxu2  ;;  %vm3593_vm4 = vweird.f32 %v7231_v58  ;;  %vm3598_vm6 = vcmp.eq.f32.partialorder %v3597_v5, 8.507059e+37 }
 0x2d8   : > { %v3576_v9 = vmul.f32 %v4948_v60, %v3575_v34  ;;  %v4325_v55 = vmul.f32 -5.0, %v3229_v28  ;;  %v2867_v26 = vpop.f32.mrf.mxu3  ;;  %3267 = vmatmul.bf16.gmra.mxu1 %v2965_v3  ;;  %v2779_v14 = vadd.f32 %v2778_v51, %v7032_v43  ;;  %v3600_v2 = vor.u32 1.1754944e-38, %v3599_v59 }
 0x2d9   : > { %v3147_v34 = vadd.f32 %v7082_v21, %v7220_v44 }
 0x2da   : > { %v4950_v1 = vpop.eup %4949  ;;  %v3577_v24 = vadd.f32 %v4948_v60, %v3576_v9  ;;  %v3366_v18 = vmul.f32 1.442695, %v4325_v55  ;;  %v2868_v23 = vadd.f32 %v2867_v26, %v2779_v14 }
 0x2db   : > { %v4952_v62 = vpop.eup %4951  ;;  %v7244_v47 = vadd.f32 1.0, %v4950_v1  ;;  %v7251_v37 = vpop.f32.mrf.mxu0 }
 0x2dc   : > { %v3581_v13 = vsel %vm3580_vm1, %v4948_v60, %v3577_v24  ;;  %v3589_v7 = vmul.f32 %v4952_v62, %v7231_v58  ;;  %4953 = vpow2.f32 %v3366_v18  ;;  %vm3594_vm3 = vweird.f32 %v4952_v62 }
 0x2dd   : > { %v3586_v6 = vsel %vm3583_vm2, %v3585_v48, %v3581_v13  ;;  %4955 = vrcp.f32 %v7244_v47  ;;  %v3230_v49 = vpop.f32.mrf.mxu1  ;;  %vm3595_vm5 = vmor %vm3593_vm4, %vm3594_vm3  ;;  %v2933_v32 = vmax.f32 %v2868_v23, 0.0  ;;  %v3612_v35 = vand.u32 2147483647, %v7244_v47 }
 0x2de   : > { %3928 = vst.msk [vmem:[%s7111_s20 + $0x48] sm:$0xff] %vm3918_vm11, %v3586_v6  ;;  %v3590_v46 = vsub.f32 1.0, %v3589_v7  ;;  %v3231_v30 = vadd.f32 %v3230_v49, %v3142_v38  ;;  %v3614_v22 = vand.u32 2147483648, %v7244_v47  ;;  %vm3608_vm8 = vweird.f32 %v7244_v47 }
 0x2df   : > { %v2780_v40 = vpop.f32.mrf.mxu2  ;;  %vm3613_vm10 = vcmp.eq.f32.partialorder %v3612_v35, 8.507059e+37 }
 0x2e0   : > { %v3591_v29 = vmul.f32 %v4952_v62, %v3590_v46  ;;  %v4326_v12 = vmul.f32 -5.0, %v3231_v30  ;;  %v2781_v36 = vadd.f32 %v2780_v40, %v7032_v43  ;;  %v2869_v45 = vpop.f32.mrf.mxu3  ;;  %v3615_v50 = vor.u32 1.1754944e-38, %v3614_v22 }
 0x2e2   : > { %v4954_v31 = vpop.eup %4953  ;;  %v3592_v15 = vadd.f32 %v4952_v62, %v3591_v29  ;;  %v3368_v10 = vmul.f32 1.442695, %v4326_v12  ;;  %v2870_v53 = vadd.f32 %v2869_v45, %v2781_v36 }
 0x2e3   : > { %v4956_v0 = vpop.eup %4955  ;;  %v3418_v39 = vadd.f32 1.0, %v4954_v31  ;;  %v7264_v57 = vpop.f32.mrf.mxu0 }
 0x2e4   : > { %v3596_v33 = vsel %vm3595_vm5, %v4952_v62, %v3592_v15  ;;  %v3604_v43 = vmul.f32 %v4956_v0, %v7244_v47  ;;  %4957 = vpow2.f32 %v3368_v10  ;;  %v2935_v4 = vmax.f32 %v2870_v53, 0.0 }
 0x2e5   : > { %v3601_v52 = vsel %vm3598_vm6, %v3600_v2, %v3596_v33  ;;  %4959 = vrcp.f32 %v3418_v39  ;;  %v3233_v20 = vpop.f32.mrf.mxu1  ;;  %vm3609_vm7 = vweird.f32 %v4956_v0  ;;  %v3629_v3 = vand.u32 2147483648, %v3418_v39 }
 0x2e6   : > { %3929 = vst.msk [vmem:[%s7111_s20 + $0x50] sm:$0xff] %vm3918_vm11, %v3601_v52  ;;  %v3605_v19 = vsub.f32 1.0, %v3604_v43  ;;  %v3234_v63 = vadd.f32 %v3233_v20, %v3145_v17  ;;  %v2967_v60 = vpack.c.bf16 %v2935_v4, %v2933_v32  ;;  %vm3610_vm9 = vmor %vm3608_vm8, %vm3609_vm7  ;;  %v3627_v26 = vand.u32 2147483647, %v3418_v39 }
 0x2e7   : > { %vm3623_vm13 = vweird.f32 %v3418_v39  ;;  %v3630_v38 = vor.u32 1.1754944e-38, %v3629_v3  ;;  %v3150_v47 = vadd.f32 %v7082_v21, %v7235_v56  ;;  %v3152_v15 = vadd.f32 %v7082_v21, %v7251_v37 }
 0x2e8   : > { %v3606_v27 = vmul.f32 %v4956_v0, %v3605_v19  ;;  %v4327_v54 = vmul.f32 -5.0, %v3234_v63  ;;  %3272 = vmatmul.bf16.gmra.mxu1 %v2967_v60  ;;  %vm3628_vm15 = vcmp.eq.f32.partialorder %v3627_v26, 8.507059e+37  ;;  %v3155_v22 = vadd.f32 %v7082_v21, %v7264_v57 }
 0x2ea   : > { %v4958_v58 = vpop.eup %4957  ;;  %v3607_v41 = vadd.f32 %v4956_v0, %v3606_v27  ;;  %v3370_v61 = vmul.f32 1.442695, %v4327_v54 }
 0x2eb   : > { %v4960_v8 = vpop.eup %4959  ;;  %v3419_v42 = vadd.f32 1.0, %v4958_v58  ;;  %v7271_v62 = vpop.f32.mrf.mxu0 }
 0x2ec   : > { %v3611_v25 = vsel %vm3610_vm9, %v4956_v0, %v3607_v41  ;;  %v3619_v28 = vmul.f32 %v4960_v8, %v3418_v39  ;;  %4961 = vpow2.f32 %v3370_v61  ;;  %vm3624_vm12 = vweird.f32 %v4960_v8 }
 0x2ed   : > { %v3616_v16 = vsel %vm3613_vm10, %v3615_v50, %v3611_v25  ;;  %4963 = vrcp.f32 %v3419_v42  ;;  %v3235_v11 = vpop.f32.mrf.mxu1  ;;  %vm3625_vm14 = vmor %vm3623_vm13, %vm3624_vm12  ;;  %v3644_v5 = vand.u32 2147483648, %v3419_v42  ;;  %v3642_v40 = vand.u32 2147483647, %v3419_v42 }
 0x2ee   : > { %3930 = vst.msk [vmem:[%s7111_s20 + $0x58] sm:$0xff] %vm3918_vm11, %v3616_v16  ;;  %v3620_v51 = vsub.f32 1.0, %v3619_v28  ;;  %v3236_v9 = vadd.f32 %v3235_v11, %v3147_v34  ;;  %vm3638_vm1 = vweird.f32 %v3419_v42 }
 0x2ef   : > { %v3645_v31 = vor.u32 1.1754944e-38, %v3644_v5  ;;  %vm3643_vm3 = vcmp.eq.f32.partialorder %v3642_v40, 8.507059e+37 }
 0x2f0   : > { %v3621_v55 = vmul.f32 %v4960_v8, %v3620_v51  ;;  %v4328_v1 = vmul.f32 -5.0, %v3236_v9  ;;  %v7292_v9 = vld [vmem:[%s7363_s7] ss:$0 sm:$0xff] }
 0x2f1   : > { %v3157_v3 = vadd.f32 %v7292_v9, %v7271_v62 }
 0x2f2   : > { %v4962_v24 = vpop.eup %4961  ;;  %v3622_v18 = vadd.f32 %v4960_v8, %v3621_v55  ;;  %v3372_v44 = vmul.f32 1.442695, %v4328_v1 }
 0x2f3   : > { %v4964_v48 = vpop.eup %4963  ;;  %v3420_v13 = vadd.f32 1.0, %v4962_v24  ;;  %v7279_v0 = vpop.f32.mrf.mxu0 }
 0x2f4   : > { %v3626_v7 = vsel %vm3625_vm14, %v4960_v8, %v3622_v18  ;;  %v3634_v6 = vmul.f32 %v4964_v48, %v3419_v42  ;;  %4965 = vpow2.f32 %v3372_v44  ;;  %vm3639_vm0 = vweird.f32 %v4964_v48 }
 0x2f5   : > { %v3631_v49 = vsel %vm3628_vm15, %v3630_v38, %v3626_v7  ;;  %4967 = vrcp.f32 %v3420_v13  ;;  %v3238_v46 = vpop.f32.mrf.mxu1  ;;  %vm3640_vm2 = vmor %vm3638_vm1, %vm3639_vm0  ;;  %v3659_v43 = vand.u32 2147483648, %v3420_v13  ;;  %v3657_v20 = vand.u32 2147483647, %v3420_v13 }
 0x2f6   : > { %3931 = vst.msk [vmem:[%s7111_s20 + $0x60] sm:$0xff] %vm3918_vm11, %v3631_v49  ;;  %v3635_v14 = vsub.f32 1.0, %v3634_v6  ;;  %v3239_v30 = vadd.f32 %v3238_v46, %v3150_v47  ;;  %vm3653_vm5 = vweird.f32 %v3420_v13 }
 0x2f7   : > { %v3660_v35 = vor.u32 1.1754944e-38, %v3659_v43  ;;  %vm3658_vm7 = vcmp.eq.f32.partialorder %v3657_v20, 8.507059e+37 }
 0x2f8   : > { %v3636_v59 = vmul.f32 %v4964_v48, %v3635_v14  ;;  %v4329_v29 = vmul.f32 -5.0, %v3239_v30 }
 0x2fa   : > { %v4966_v12 = vpop.eup %4965  ;;  %v3637_v36 = vadd.f32 %v4964_v48, %v3636_v59  ;;  %v3374_v56 = vmul.f32 1.442695, %v4329_v29 }
 0x2fb   : > { %v4968_v45 = vpop.eup %4967  ;;  %v3421_v23 = vadd.f32 1.0, %v4966_v12  ;;  %v7287_v8 = vpop.f32.mrf.mxu0  ;;  %v3160_v12 = vadd.f32 %v7292_v9, %v7279_v0 }
 0x2fc   : > { %v3641_v10 = vsel %vm3640_vm2, %v4964_v48, %v3637_v36  ;;  %v3649_v53 = vmul.f32 %v4968_v45, %v3420_v13  ;;  %4969 = vpow2.f32 %v3374_v56  ;;  %vm3654_vm4 = vweird.f32 %v4968_v45 }
 0x2fd   : > { %v3646_v2 = vsel %vm3643_vm3, %v3645_v31, %v3641_v10  ;;  %4971 = vrcp.f32 %v3421_v23  ;;  %v3240_v17 = vpop.f32.mrf.mxu1  ;;  %vm3655_vm6 = vmor %vm3653_vm5, %vm3654_vm4  ;;  %v3674_v34 = vand.u32 2147483648, %v3421_v23  ;;  %v3672_v25 = vand.u32 2147483647, %v3421_v23 }
 0x2fe   : > { %3932 = vst.msk [vmem:[%s7111_s20 + $0x68] sm:$0xff] %vm3918_vm11, %v3646_v2  ;;  %v3650_v39 = vsub.f32 1.0, %v3649_v53  ;;  %v3241_v33 = vadd.f32 %v3240_v17, %v3152_v15  ;;  %vm3668_vm9 = vweird.f32 %v3421_v23 }
 0x2ff   : > { %v3675_v51 = vor.u32 1.1754944e-38, %v3674_v34  ;;  %vm3673_vm12 = vcmp.eq.f32.partialorder %v3672_v25, 8.507059e+37 }
 0x300   : > { %v3651_v52 = vmul.f32 %v4968_v45, %v3650_v39  ;;  %v4330_v19 = vmul.f32 -5.0, %v3241_v33 }
 0x302   : > { %v4970_v37 = vpop.eup %4969  ;;  %v3652_v32 = vadd.f32 %v4968_v45, %v3651_v52  ;;  %v3376_v4 = vmul.f32 1.442695, %v4330_v19 }
 0x303   : > { %v4972_v63 = vpop.eup %4971  ;;  %v3422_v27 = vadd.f32 1.0, %v4970_v37  ;;  %v7298_v7 = vpop.f32.mrf.mxu0  ;;  %v3162_v37 = vadd.f32 %v7292_v9, %v7287_v8 }
 0x304   : > { %v3656_v60 = vsel %vm3655_vm6, %v4968_v45, %v3652_v32  ;;  %v3664_v54 = vmul.f32 %v4972_v63, %v3421_v23  ;;  %4973 = vpow2.f32 %v3376_v4  ;;  %vm3669_vm8 = vweird.f32 %v4972_v63 }
 0x305   : > { %v3661_v58 = vsel %vm3658_vm7, %v3660_v35, %v3656_v60  ;;  %4975 = vrcp.f32 %v3422_v27  ;;  %v3243_v41 = vpop.f32.mrf.mxu1  ;;  %vm3670_vm10 = vmor %vm3668_vm9, %vm3669_vm8  ;;  %v3689_v38 = vand.u32 2147483648, %v3422_v27  ;;  %v3687_v13 = vand.u32 2147483647, %v3422_v27 }
 0x306   : > { %3933 = vst.msk [vmem:[%s7111_s20 + $0x70] sm:$0xff] %vm3918_vm11, %v3661_v58  ;;  %v3665_v61 = vsub.f32 1.0, %v3664_v54  ;;  %v3244_v50 = vadd.f32 %v3243_v41, %v3155_v22  ;;  %vm3683_vm14 = vweird.f32 %v3422_v27 }
 0x307   : > { %v3690_v30 = vor.u32 1.1754944e-38, %v3689_v38  ;;  %vm3688_vm0 = vcmp.eq.f32.partialorder %v3687_v13, 8.507059e+37 }
 0x308   : > { %v3666_v42 = vmul.f32 %v4972_v63, %v3665_v61  ;;  %v4331_v28 = vmul.f32 -5.0, %v3244_v50 }
 0x30a   : > { %v4974_v21 = vpop.eup %4973  ;;  %v3667_v57 = vadd.f32 %v4972_v63, %v3666_v42  ;;  %v3378_v16 = vmul.f32 1.442695, %v4331_v28 }
 0x30b   : > { %v4976_v11 = vpop.eup %4975  ;;  %v3423_v55 = vadd.f32 1.0, %v4974_v21  ;;  %v3166_v2 = vpop.f32.mrf.mxu0  ;;  %v3165_v21 = vadd.f32 %v7292_v9, %v7298_v7 }
 0x30c   : > { %v3671_v26 = vsel %vm3670_vm10, %v4972_v63, %v3667_v57  ;;  %v3679_v1 = vmul.f32 %v4976_v11, %v3422_v27  ;;  %4977 = vpow2.f32 %v3378_v16  ;;  %vm3684_vm13 = vweird.f32 %v4976_v11 }
 0x30d   : > { %v3676_v24 = vsel %vm3673_vm12, %v3675_v51, %v3671_v26  ;;  %4979 = vrcp.f32 %v3423_v55  ;;  %v3245_v18 = vpop.f32.mrf.mxu1  ;;  %vm3685_vm15 = vmor %vm3683_vm14, %vm3684_vm13  ;;  %v3704_v56 = vand.u32 2147483648, %v3423_v55  ;;  %v3702_v15 = vand.u32 2147483647, %v3423_v55 }
 0x30e   : > { %3934 = vst.msk [vmem:[%s7111_s20 + $0x78] sm:$0xff] %vm3918_vm11, %v3676_v24  ;;  %v3680_v44 = vsub.f32 1.0, %v3679_v1  ;;  %v3246_v48 = vadd.f32 %v3245_v18, %v3157_v3  ;;  %vm3698_vm2 = vweird.f32 %v3423_v55  ;;  %v3167_v7 = vadd.f32 %v7292_v9, %v3166_v2 }
 0x30f   : > { %v3705_v33 = vor.u32 1.1754944e-38, %v3704_v56  ;;  %vm3703_vm4 = vcmp.eq.f32.partialorder %v3702_v15, 8.507059e+37 }
 0x310   : > { %v3681_v47 = vmul.f32 %v4976_v11, %v3680_v44  ;;  %v4332_v62 = vmul.f32 -5.0, %v3246_v48 }
 0x312   : > { %v4978_v6 = vpop.eup %4977  ;;  %v3682_v49 = vadd.f32 %v4976_v11, %v3681_v47  ;;  %v3380_v46 = vmul.f32 1.442695, %v4332_v62 }
 0x313   : > { %v4980_v14 = vpop.eup %4979  ;;  %v3424_v5 = vadd.f32 1.0, %v4978_v6  ;;  %v3169_v8 = vpop.f32.mrf.mxu0 }
 0x314   : > { %v3686_v59 = vsel %vm3685_vm15, %v4976_v11, %v3682_v49  ;;  %v3694_v40 = vmul.f32 %v4980_v14, %v3423_v55  ;;  %4981 = vpow2.f32 %v3380_v46  ;;  %vm3699_vm1 = vweird.f32 %v4980_v14 }
 0x315   : > { %v3691_v29 = vsel %vm3688_vm0, %v3690_v30, %v3686_v59  ;;  %4983 = vrcp.f32 %v3424_v5  ;;  %v3248_v45 = vpop.f32.mrf.mxu1  ;;  %vm3700_vm3 = vmor %vm3698_vm2, %vm3699_vm1  ;;  %v3719_v4 = vand.u32 2147483648, %v3424_v5  ;;  %v3717_v22 = vand.u32 2147483647, %v3424_v5 }
 0x316   : > { %3935 = vst.msk [vmem:[%s7111_s20 + $0x80] sm:$0xff] %vm3918_vm11, %v3691_v29  ;;  %v3695_v36 = vsub.f32 1.0, %v3694_v40  ;;  %v3249_v23 = vadd.f32 %v3248_v45, %v3160_v12  ;;  %vm3713_vm6 = vweird.f32 %v3424_v5 }
 0x317   : > { %v3720_v41 = vor.u32 1.1754944e-38, %v3719_v4  ;;  %vm3718_vm8 = vcmp.eq.f32.partialorder %v3717_v22, 8.507059e+37 }
 0x318   : > { %v3696_v31 = vmul.f32 %v4980_v14, %v3695_v36  ;;  %v4333_v17 = vmul.f32 -5.0, %v3249_v23 }
 0x31a   : > { %v4982_v10 = vpop.eup %4981  ;;  %v3697_v53 = vadd.f32 %v4980_v14, %v3696_v31  ;;  %v3382_v20 = vmul.f32 1.442695, %v4333_v17  ;;  %v3170_v31 = vadd.f32 %v7292_v9, %v3169_v8 }
 0x31b   : > { %v4984_v39 = vpop.eup %4983  ;;  %v3425_v43 = vadd.f32 1.0, %v4982_v10  ;;  %v3171_v6 = vpop.f32.mrf.mxu0 }
 0x31c   : > { %v3701_v52 = vsel %vm3700_vm3, %v4980_v14, %v3697_v53  ;;  %v3709_v0 = vmul.f32 %v4984_v39, %v3424_v5  ;;  %vm3714_vm5 = vweird.f32 %v4984_v39 }
 0x31d   : > { %v3706_v19 = vsel %vm3703_vm4, %v3705_v33, %v3701_v52  ;;  %4985 = vrcp.f32 %v3425_v43  ;;  %v3250_v63 = vpop.f32.mrf.mxu1  ;;  %vm3715_vm7 = vmor %vm3713_vm6, %vm3714_vm5  ;;  %v3734_v16 = vand.u32 2147483648, %v3425_v43  ;;  %v3732_v3 = vand.u32 2147483647, %v3425_v43 }
 0x31e   : > { %3936 = vst.msk [vmem:[%s7111_s20 + $0x88] sm:$0xff] %vm3918_vm11, %v3706_v19  ;;  %v3710_v32 = vsub.f32 1.0, %v3709_v0  ;;  %4987 = vpow2.f32 %v3382_v20  ;;  %v3251_v27 = vadd.f32 %v3250_v63, %v3162_v37  ;;  %vm3728_vm10 = vweird.f32 %v3425_v43 }
 0x31f   : > { %v3735_v24 = vor.u32 1.1754944e-38, %v3734_v16  ;;  %vm3733_vm13 = vcmp.eq.f32.partialorder %v3732_v3, 8.507059e+37 }
 0x320   : > { %v3711_v35 = vmul.f32 %v4984_v39, %v3710_v32  ;;  %v4334_v54 = vmul.f32 -5.0, %v3251_v27 }
 0x322   : > { %v3712_v60 = vadd.f32 %v4984_v39, %v3711_v35  ;;  %v3384_v42 = vmul.f32 1.442695, %v4334_v54  ;;  %v3172_v35 = vadd.f32 %v7292_v9, %v3171_v6 }
 0x323   : > { %v4986_v58 = vpop.eup %4985 }
 0x324   : > { %v4988_v61 = vpop.eup %4987  ;;  %v3716_v50 = vsel %vm3715_vm7, %v4984_v39, %v3712_v60  ;;  %v3724_v34 = vmul.f32 %v4986_v58, %v3425_v43  ;;  %4989 = vpow2.f32 %v3384_v42  ;;  %vm3729_vm9 = vweird.f32 %v4986_v58  ;;  %v3174_v39 = vpop.f32.mrf.mxu0 }
 0x325   : > { %v3721_v25 = vsel %vm3718_vm8, %v3720_v41, %v3716_v50  ;;  %v3426_v28 = vadd.f32 1.0, %v4988_v61  ;;  %v3253_v11 = vpop.f32.mrf.mxu1  ;;  %vm3730_vm12 = vmor %vm3728_vm10, %vm3729_vm9 }
 0x326   : > { %3937 = vst.msk [vmem:[%s7111_s20 + $0x90] sm:$0xff] %vm3918_vm11, %v3721_v25  ;;  %v3725_v57 = vsub.f32 1.0, %v3724_v34  ;;  %v3254_v55 = vadd.f32 %v3253_v11, %v3165_v21 }
 0x327   : > { %4991 = vrcp.f32 %v3426_v28  ;;  %v3749_v30 = vand.u32 2147483648, %v3426_v28  ;;  %v3747_v59 = vand.u32 2147483647, %v3426_v28  ;;  %vm3743_vm15 = vweird.f32 %v3426_v28 }
 0x328   : > { %v3726_v51 = vmul.f32 %v4986_v58, %v3725_v57  ;;  %v4335_v1 = vmul.f32 -5.0, %v3254_v55 }
 0x329   : > { %v3750_v45 = vor.u32 1.1754944e-38, %v3749_v30  ;;  %vm3748_vm1 = vcmp.eq.f32.partialorder %v3747_v59, 8.507059e+37 }
 0x32a   : > { %v3727_v26 = vadd.f32 %v4986_v58, %v3726_v51  ;;  %v4990_v18 = vpop.eup %4989  ;;  %v3386_v48 = vmul.f32 1.442695, %v4335_v1  ;;  %v3175_v51 = vadd.f32 %v7292_v9, %v3174_v39 }
 0x32b   : > { %v3427_v13 = vadd.f32 1.0, %v4990_v18 }
 0x32c   : > { %v3731_v44 = vsel %vm3730_vm12, %v4986_v58, %v3727_v26  ;;  %4993 = vpow2.f32 %v3386_v48  ;;  %v3176_v42 = vpop.f32.mrf.mxu0 }
 0x32d   : > { %v4992_v38 = vpop.eup %4991  ;;  %v3736_v47 = vsel %vm3733_vm13, %v3735_v24, %v3731_v44  ;;  %4995 = vrcp.f32 %v3427_v13  ;;  %v3255_v49 = vpop.f32.mrf.mxu1  ;;  %v3764_v43 = vand.u32 2147483648, %v3427_v13  ;;  %v3762_v0 = vand.u32 2147483647, %v3427_v13 }
 0x32e   : > { %3938 = vst.msk [vmem:[%s7111_s20 + $0x98] sm:$0xff] %vm3918_vm11, %v3736_v47  ;;  %v3739_v62 = vmul.f32 %v4992_v38, %v3426_v28  ;;  %v3256_v14 = vadd.f32 %v3255_v49, %v3167_v7  ;;  %vm3744_vm14 = vweird.f32 %v4992_v38  ;;  %vm3758_vm3 = vweird.f32 %v3427_v13 }
 0x32f   : > { %vm3745_vm0 = vmor %vm3743_vm15, %vm3744_vm14  ;;  %v3765_v63 = vor.u32 1.1754944e-38, %v3764_v43  ;;  %vm3763_vm5 = vcmp.eq.f32.partialorder %v3762_v0, 8.507059e+37  ;;  %v3177_v30 = vadd.f32 %v7292_v9, %v3176_v42 }
 0x330   : > { %v3740_v46 = vsub.f32 1.0, %v3739_v62  ;;  %v4336_v40 = vmul.f32 -5.0, %v3256_v14 }
 0x332   : > { %v3741_v5 = vmul.f32 %v4992_v38, %v3740_v46  ;;  %v4994_v29 = vpop.eup %4993  ;;  %v3388_v36 = vmul.f32 1.442695, %v4336_v40 }
 0x333   : > { %v4996_v56 = vpop.eup %4995  ;;  %v3428_v15 = vadd.f32 1.0, %v4994_v29 }
 0x334   : > { %v3742_v12 = vadd.f32 %v4992_v38, %v3741_v5  ;;  %v3754_v10 = vmul.f32 %v4996_v56, %v3427_v13  ;;  %4997 = vpow2.f32 %v3388_v36  ;;  %vm3759_vm2 = vweird.f32 %v4996_v56  ;;  %v3179_v6 = vpop.f32.mrf.mxu0 }
 0x335   : > { %4999 = vrcp.f32 %v3428_v15  ;;  %v3258_v2 = vpop.f32.mrf.mxu1  ;;  %vm3760_vm4 = vmor %vm3758_vm3, %vm3759_vm2  ;;  %v3779_v50 = vand.u32 2147483648, %v3428_v15  ;;  %v3777_v8 = vand.u32 2147483647, %v3428_v15  ;;  %vm3773_vm7 = vweird.f32 %v3428_v15 }
 0x336   : > { %v3746_v23 = vsel %vm3745_vm0, %v4992_v38, %v3742_v12  ;;  %v3755_v17 = vsub.f32 1.0, %v3754_v10  ;;  %v3259_v33 = vadd.f32 %v3258_v2, %v3170_v31 }
 0x337   : > { %v3751_v53 = vsel %vm3748_vm1, %v3750_v45, %v3746_v23  ;;  %v3780_v11 = vor.u32 1.1754944e-38, %v3779_v50  ;;  %vm3778_vm9 = vcmp.eq.f32.partialorder %v3777_v8, 8.507059e+37 }
 0x338   : > { %3939 = vst.msk [vmem:[%s7111_s20 + $0xa0] sm:$0xff] %vm3918_vm11, %v3751_v53  ;;  %v3756_v52 = vmul.f32 %v4996_v56, %v3755_v17  ;;  %v4337_v20 = vmul.f32 -5.0, %v3259_v33  ;;  %v3180_v33 = vadd.f32 %v7292_v9, %v3179_v6 }
 0x33a   : > { %v4998_v19 = vpop.eup %4997  ;;  %v3757_v37 = vadd.f32 %v4996_v56, %v3756_v52  ;;  %v3390_v32 = vmul.f32 1.442695, %v4337_v20 }
 0x33b   : > { %v5000_v4 = vpop.eup %4999  ;;  %v3429_v22 = vadd.f32 1.0, %v4998_v19 }
 0x33c   : > { %v3761_v27 = vsel %vm3760_vm4, %v4996_v56, %v3757_v37  ;;  %v3769_v60 = vmul.f32 %v5000_v4, %v3428_v15  ;;  %5001 = vpow2.f32 %v3390_v32  ;;  %vm3774_vm6 = vweird.f32 %v5000_v4  ;;  %v3181_v20 = vpop.f32.mrf.mxu0 }
 0x33d   : > { %v3766_v54 = vsel %vm3763_vm5, %v3765_v63, %v3761_v27  ;;  %5003 = vrcp.f32 %v3429_v22  ;;  %v3260_v58 = vpop.f32.mrf.mxu1  ;;  %vm3775_vm8 = vmor %vm3773_vm7, %vm3774_vm6  ;;  %v3794_v48 = vand.u32 2147483648, %v3429_v22  ;;  %v3792_v47 = vand.u32 2147483647, %v3429_v22 }
 0x33e   : > { %3940 = vst.msk [vmem:[%s7111_s20 + $0xa8] sm:$0xff] %vm3918_vm11, %v3766_v54  ;;  %v3770_v41 = vsub.f32 1.0, %v3769_v60  ;;  %v3261_v61 = vadd.f32 %v3260_v58, %v3172_v35  ;;  %vm3788_vm12 = vweird.f32 %v3429_v22  ;;  %v3182_v50 = vadd.f32 %v7292_v9, %v3181_v20 }
 0x33f   : > { %v3795_v14 = vor.u32 1.1754944e-38, %v3794_v48  ;;  %vm3793_vm14 = vcmp.eq.f32.partialorder %v3792_v47, 8.507059e+37 }
 0x340   : > { %v3771_v34 = vmul.f32 %v5000_v4, %v3770_v41  ;;  %v4338_v25 = vmul.f32 -5.0, %v3261_v61 }
 0x342   : > { %v5002_v28 = vpop.eup %5001  ;;  %v3772_v21 = vadd.f32 %v5000_v4, %v3771_v34  ;;  %v3392_v57 = vmul.f32 1.442695, %v4338_v25 }
 0x343   : > { %v5004_v16 = vpop.eup %5003  ;;  %v3430_v3 = vadd.f32 1.0, %v5002_v28 }
 0x344   : > { %v3776_v55 = vsel %vm3775_vm8, %v5000_v4, %v3772_v21  ;;  %v3784_v26 = vmul.f32 %v5004_v16, %v3429_v22  ;;  %5005 = vpow2.f32 %v3392_v57  ;;  %vm3789_vm10 = vweird.f32 %v5004_v16  ;;  %v3184_v57 = vpop.f32.mrf.mxu0 }
 0x345   : > { %v3781_v1 = vsel %vm3778_vm9, %v3780_v11, %v3776_v55  ;;  %5007 = vrcp.f32 %v3430_v3  ;;  %v3263_v24 = vpop.f32.mrf.mxu1  ;;  %vm3790_vm13 = vmor %vm3788_vm12, %vm3789_vm10  ;;  %v3809_v45 = vand.u32 2147483648, %v3430_v3  ;;  %v3807_v15 = vand.u32 2147483647, %v3430_v3 }
 0x346   : > { %3941 = vst.msk [vmem:[%s7111_s20 + $0xb0] sm:$0xff] %vm3918_vm11, %v3781_v1  ;;  %v3785_v18 = vsub.f32 1.0, %v3784_v26  ;;  %v3264_v44 = vadd.f32 %v3263_v24, %v3175_v51  ;;  %vm3803_vm0 = vweird.f32 %v3430_v3  ;;  %v3185_v48 = vadd.f32 %v7292_v9, %v3184_v57 }
 0x347   : > { %v3810_v39 = vor.u32 1.1754944e-38, %v3809_v45  ;;  %vm3808_vm2 = vcmp.eq.f32.partialorder %v3807_v15, 8.507059e+37 }
 0x348   : > { %v3786_v38 = vmul.f32 %v5004_v16, %v3785_v18  ;;  %v4339_v13 = vmul.f32 -5.0, %v3264_v44 }
 0x34a   : > { %v5006_v7 = vpop.eup %5005  ;;  %v3787_v62 = vadd.f32 %v5004_v16, %v3786_v38  ;;  %v3394_v49 = vmul.f32 1.442695, %v4339_v13 }
 0x34b   : > { %v5008_v46 = vpop.eup %5007  ;;  %v3431_v5 = vadd.f32 1.0, %v5006_v7 }
 0x34c   : > { %v3791_v59 = vsel %vm3790_vm13, %v5004_v16, %v3787_v62  ;;  %v3799_v40 = vmul.f32 %v5008_v46, %v3430_v3  ;;  %5009 = vpow2.f32 %v3394_v49  ;;  %vm3804_vm15 = vweird.f32 %v5008_v46 }
 0x34d   : > { %v3796_v29 = vsel %vm3793_vm14, %v3795_v14, %v3791_v59  ;;  %5011 = vrcp.f32 %v3431_v5  ;;  %v3265_v12 = vpop.f32.mrf.mxu1  ;;  %vm3805_vm1 = vmor %vm3803_vm0, %vm3804_vm15  ;;  %v3824_v63 = vand.u32 2147483648, %v3431_v5  ;;  %v3822_v22 = vand.u32 2147483647, %v3431_v5 }
 0x34e   : > { %3942 = vst.msk [vmem:[%s7111_s20 + $0xb8] sm:$0xff] %vm3918_vm11, %v3796_v29  ;;  %v3800_v36 = vsub.f32 1.0, %v3799_v40  ;;  %v3266_v56 = vadd.f32 %v3265_v12, %v3177_v30  ;;  %vm3818_vm4 = vweird.f32 %v3431_v5 }
 0x34f   : > { %v3825_v61 = vor.u32 1.1754944e-38, %v3824_v63  ;;  %vm3823_vm6 = vcmp.eq.f32.partialorder %v3822_v22, 8.507059e+37 }
 0x350   : > { %v3801_v31 = vmul.f32 %v5008_v46, %v3800_v36  ;;  %v4340_v23 = vmul.f32 -5.0, %v3266_v56 }
 0x352   : > { %v5010_v10 = vpop.eup %5009  ;;  %v3802_v53 = vadd.f32 %v5008_v46, %v3801_v31  ;;  %v3396_v2 = vmul.f32 1.442695, %v4340_v23 }
 0x353   : > { %v5012_v17 = vpop.eup %5011  ;;  %v3432_v43 = vadd.f32 1.0, %v5010_v10 }
 0x354   : > { %v3806_v52 = vsel %vm3805_vm1, %v5008_v46, %v3802_v53  ;;  %v3814_v0 = vmul.f32 %v5012_v17, %v3431_v5  ;;  %5013 = vpow2.f32 %v3396_v2  ;;  %vm3819_vm3 = vweird.f32 %v5012_v17  ;;  %v3186_v5 = vpop.f32.mrf.mxu0 }
 0x355   : > { %v3811_v19 = vsel %vm3808_vm2, %v3810_v39, %v3806_v52  ;;  %5015 = vrcp.f32 %v3432_v43  ;;  %v3268_v37 = vpop.f32.mrf.mxu1  ;;  %vm3820_vm5 = vmor %vm3818_vm4, %vm3819_vm3  ;;  %v3839_v11 = vand.u32 2147483648, %v3432_v43  ;;  %v3837_v3 = vand.u32 2147483647, %v3432_v43 }
 0x356   : > { %3943 = vst.msk [vmem:[%s7111_s20 + $0xc0] sm:$0xff] %vm3918_vm11, %v3811_v19  ;;  %v3815_v32 = vsub.f32 1.0, %v3814_v0  ;;  %v3269_v4 = vadd.f32 %v3268_v37, %v3180_v33  ;;  %vm3833_vm8 = vweird.f32 %v3432_v43  ;;  %v3187_v45 = vadd.f32 %v7292_v9, %v3186_v5 }
 0x357   : > { %v3840_v44 = vor.u32 1.1754944e-38, %v3839_v11  ;;  %vm3838_vm10 = vcmp.eq.f32.partialorder %v3837_v3, 8.507059e+37 }
 0x358   : > { %v3816_v35 = vmul.f32 %v5012_v17, %v3815_v32  ;;  %v4341_v27 = vmul.f32 -5.0, %v3269_v4 }
 0x35a   : > { %v5014_v60 = vpop.eup %5013  ;;  %v3817_v54 = vadd.f32 %v5012_v17, %v3816_v35  ;;  %v3398_v58 = vmul.f32 1.442695, %v4341_v27 }
 0x35b   : > { %v5016_v41 = vpop.eup %5015  ;;  %v3433_v34 = vadd.f32 1.0, %v5014_v60 }
 0x35c   : > { %v3821_v8 = vsel %vm3820_vm5, %v5012_v17, %v3817_v54  ;;  %v3829_v42 = vmul.f32 %v5016_v41, %v3432_v43  ;;  %5017 = vpow2.f32 %v3398_v58  ;;  %vm3834_vm7 = vweird.f32 %v5016_v41 }
 0x35d   : > { %v3826_v25 = vsel %vm3823_vm6, %v3825_v61, %v3821_v8  ;;  %5019 = vrcp.f32 %v3433_v34  ;;  %v3270_v28 = vpop.f32.mrf.mxu1  ;;  %vm3835_vm9 = vmor %vm3833_vm8, %vm3834_vm7  ;;  %v3854_v46 = vand.u32 2147483648, %v3433_v34  ;;  %v3852_v30 = vand.u32 2147483647, %v3433_v34 }
 0x35e   : > { %3944 = vst.msk [vmem:[%s7111_s20 + $0xc8] sm:$0xff] %vm3918_vm11, %v3826_v25  ;;  %v3830_v21 = vsub.f32 1.0, %v3829_v42  ;;  %v3271_v16 = vadd.f32 %v3270_v28, %v3182_v50  ;;  %vm3848_vm13 = vweird.f32 %v3433_v34 }
 0x35f   : > { %v3855_v56 = vor.u32 1.1754944e-38, %v3854_v46  ;;  %vm3853_vm15 = vcmp.eq.f32.partialorder %v3852_v30, 8.507059e+37 }
 0x360   : > { %v3831_v51 = vmul.f32 %v5016_v41, %v3830_v21  ;;  %v4342_v55 = vmul.f32 -5.0, %v3271_v16 }
 0x362   : > { %v5018_v26 = vpop.eup %5017  ;;  %v3832_v1 = vadd.f32 %v5016_v41, %v3831_v51  ;;  %v3400_v24 = vmul.f32 1.442695, %v4342_v55 }
 0x363   : > { %v5020_v18 = vpop.eup %5019  ;;  %v3434_v38 = vadd.f32 1.0, %v5018_v26 }
 0x364   : > { %v3836_v47 = vsel %vm3835_vm9, %v5016_v41, %v3832_v1  ;;  %v3844_v13 = vmul.f32 %v5020_v18, %v3433_v34  ;;  %5021 = vpow2.f32 %v3400_v24  ;;  %vm3849_vm12 = vweird.f32 %v5020_v18 }
 0x365   : > { %v3841_v7 = vsel %vm3838_vm10, %v3840_v44, %v3836_v47  ;;  %5023 = vrcp.f32 %v3434_v38  ;;  %v3273_v62 = vpop.f32.mrf.mxu1  ;;  %vm3850_vm14 = vmor %vm3848_vm13, %vm3849_vm12  ;;  %v3869_v39 = vand.u32 2147483648, %v3434_v38  ;;  %v3867_v43 = vand.u32 2147483647, %v3434_v38 }
 0x366   : > { %3945 = vst.msk [vmem:[%s7111_s20 + $0xd0] sm:$0xff] %vm3918_vm11, %v3841_v7  ;;  %v3845_v6 = vsub.f32 1.0, %v3844_v13  ;;  %v3274_v49 = vadd.f32 %v3273_v62, %v3185_v48  ;;  %vm3863_vm1 = vweird.f32 %v3434_v38 }
 0x367   : > { %v3870_v37 = vor.u32 1.1754944e-38, %v3869_v39  ;;  %vm3868_vm3 = vcmp.eq.f32.partialorder %v3867_v43, 8.507059e+37 }
 0x368   : > { %v3846_v14 = vmul.f32 %v5020_v18, %v3845_v6  ;;  %v4343_v59 = vmul.f32 -5.0, %v3274_v49 }
 0x36a   : > { %v5022_v40 = vpop.eup %5021  ;;  %v3847_v29 = vadd.f32 %v5020_v18, %v3846_v14  ;;  %v3402_v12 = vmul.f32 1.442695, %v4343_v59 }
 0x36b   : > { %v5024_v36 = vpop.eup %5023  ;;  %v3435_v31 = vadd.f32 1.0, %v5022_v40 }
 0x36c   : > { %v3851_v15 = vsel %vm3850_vm14, %v5020_v18, %v3847_v29  ;;  %v3859_v23 = vmul.f32 %v5024_v36, %v3434_v38  ;;  %5025 = vpow2.f32 %v3402_v12  ;;  %vm3864_vm0 = vweird.f32 %v5024_v36 }
 0x36d   : > { %v3856_v10 = vsel %vm3853_vm15, %v3855_v56, %v3851_v15  ;;  %5027 = vrcp.f32 %v3435_v31  ;;  %v3275_v53 = vpop.f32.mrf.mxu1  ;;  %vm3865_vm2 = vmor %vm3863_vm1, %vm3864_vm0  ;;  %v3884_v27 = vand.u32 2147483648, %v3435_v31  ;;  %v3882_v54 = vand.u32 2147483647, %v3435_v31 }
 0x36e   : > { %3946 = vst.msk [vmem:[%s7111_s20 + $0xd8] sm:$0xff] %vm3918_vm11, %v3856_v10  ;;  %v3860_v2 = vsub.f32 1.0, %v3859_v23  ;;  %v3276_v17 = vadd.f32 %v3275_v53, %v3187_v45  ;;  %vm3878_vm5 = vweird.f32 %v3435_v31 }
 0x36f   : > { %v3885_v50 = vor.u32 1.1754944e-38, %v3884_v27  ;;  %vm3883_vm7 = vcmp.eq.f32.partialorder %v3882_v54, 8.507059e+37 }
 0x370   : > { %v3861_v33 = vmul.f32 %v5024_v36, %v3860_v2  ;;  %v4344_v52 = vmul.f32 -5.0, %v3276_v17 }
 0x372   : > { %v5026_v0 = vpop.eup %5025  ;;  %v3862_v9 = vadd.f32 %v5024_v36, %v3861_v33  ;;  %v3404_v20 = vmul.f32 1.442695, %v4344_v52 }
 0x373   : > { %v5028_v19 = vpop.eup %5027  ;;  %v3436_v32 = vadd.f32 1.0, %v5026_v0 }
 0x374   : > { %v3866_v4 = vsel %vm3865_vm2, %v5024_v36, %v3862_v9  ;;  %v3874_v63 = vmul.f32 %v5028_v19, %v3435_v31  ;;  %5029 = vpow2.f32 %v3404_v20  ;;  %vm3879_vm4 = vweird.f32 %v5028_v19 }
 0x375   : > { %v3871_v35 = vsel %vm3868_vm3, %v3870_v37, %v3866_v4  ;;  %5031 = vrcp.f32 %v3436_v32  ;;  %vm3880_vm6 = vmor %vm3878_vm5, %vm3879_vm4  ;;  %v3899_v21 = vand.u32 2147483648, %v3436_v32  ;;  %v3897_v16 = vand.u32 2147483647, %v3436_v32 }
 0x376   : > { %3947 = vst.msk [vmem:[%s7111_s20 + $0xe0] sm:$0xff] %vm3918_vm11, %v3871_v35  ;;  %v3875_v22 = vsub.f32 1.0, %v3874_v63  ;;  %vm3893_vm9 = vweird.f32 %v3436_v32 }
 0x377   : > { %v3900_v3 = vor.u32 1.1754944e-38, %v3899_v21  ;;  %vm3898_vm12 = vcmp.eq.f32.partialorder %v3897_v16, 8.507059e+37 }
 0x378   : > { %v3876_v60 = vmul.f32 %v5028_v19, %v3875_v22 }
 0x37a   : > { %v5030_v58 = vpop.eup %5029  ;;  %v3877_v41 = vadd.f32 %v5028_v19, %v3876_v60 }
 0x37b   : > { %v5032_v61 = vpop.eup %5031  ;;  %v3437_v34 = vadd.f32 1.0, %v5030_v58 }
 0x37c   : > { %v3881_v8 = vsel %vm3880_vm6, %v5028_v19, %v3877_v41  ;;  %v3889_v42 = vmul.f32 %v5032_v61, %v3436_v32  ;;  %vm3894_vm8 = vweird.f32 %v5032_v61 }
 0x37d   : > { %v3886_v25 = vsel %vm3883_vm7, %v3885_v50, %v3881_v8  ;;  %5033 = vrcp.f32 %v3437_v34  ;;  %vm3895_vm10 = vmor %vm3893_vm9, %vm3894_vm8  ;;  %v3914_v18 = vand.u32 2147483648, %v3437_v34  ;;  %v3912_v48 = vand.u32 2147483647, %v3437_v34 }
 0x37e   : > { %3948 = vst.msk [vmem:[%s7111_s20 + $0xe8] sm:$0xff] %vm3918_vm11, %v3886_v25  ;;  %v3890_v28 = vsub.f32 1.0, %v3889_v42  ;;  %vm3908_vm14 = vweird.f32 %v3437_v34 }
 0x37f   : > { %v3915_v47 = vor.u32 1.1754944e-38, %v3914_v18  ;;  %vm3913_vm0 = vcmp.eq.f32.partialorder %v3912_v48, 8.507059e+37 }
 0x380   : > { %v3891_v57 = vmul.f32 %v5032_v61, %v3890_v28 }
 0x382   : > { %v3892_v11 = vadd.f32 %v5032_v61, %v3891_v57 }
 0x383   : > { %v5034_v51 = vpop.eup %5033 }
 0x384   : > { %v3896_v55 = vsel %vm3895_vm10, %v5032_v61, %v3892_v11  ;;  %v3904_v26 = vmul.f32 %v5034_v51, %v3437_v34  ;;  %vm3909_vm13 = vweird.f32 %v5034_v51 }
 0x385   : > { %v3901_v1 = vsel %vm3898_vm12, %v3900_v3, %v3896_v55  ;;  %vm3910_vm15 = vmor %vm3908_vm14, %vm3909_vm13 }
 0x386   : > { %3949 = vst.msk [vmem:[%s7111_s20 + $0xf0] sm:$0xff] %vm3918_vm11, %v3901_v1  ;;  %v3905_v24 = vsub.f32 1.0, %v3904_v26 }
 0x388   : > { %v3906_v44 = vmul.f32 %v5034_v51, %v3905_v24 }
 0x38a   : > { %v3907_v38 = vadd.f32 %v5034_v51, %v3906_v44 }
 0x38c   : > { %v3911_v13 = vsel %vm3910_vm15, %v5034_v51, %v3907_v38 }
 0x38d   : > { %v3916_v7 = vsel %vm3913_vm0, %v3915_v47, %v3911_v13 }
 0x38e   : > { %3950 = vst.msk [vmem:[%s7111_s20 + $0xf8] sm:$0xff] %vm3918_vm11, %v3916_v7 }
 0x38f PF: > { %s18_s29 = sadd.s32 1, %s5058_s29   ;;  %s7623_s27 = smov %s5054_s28 }
 0x390   : > { %p15_p5 = scmp.ge.s32.totalorder %s18_s29, 4   ;;  %s7624_s28 = smov %s7626_s30 }
 0x392   :  { %17 = sbr.rel (!%p15_p5) target bundleno = 2 (0x2), region = 88 }

</bundles_post_ra>
